<compile_context>
chip_gen: v6e
topology: v6e:2x2x1
jax: 0.10.0
libtpu: 0.0.40
codegen_flags: <defaults>
</compile_context>

<pallas_src>
import numpy as np

import jax
import jax.numpy as jnp
from jax.experimental import pallas as pl
from jax.experimental.pallas import tpu as pltpu


_ROWS = 8  # output depth rows per grid step (sublane-aligned)


def _interp_matrix_1d(size):
    """(2*size, size) trilinear x2 interpolation matrix (align_corners=False)."""
    m = np.zeros((2 * size, size), dtype=np.float32)
    for i in range(size):
        m[2 * i, max(i - 1, 0)] += 0.25
        m[2 * i, i] += 0.75
        m[2 * i + 1, i] += 0.75
        m[2 * i + 1, min(i + 1, size - 1)] += 0.25
    return m


def head_upsampling_conv_block(x, w1, b1, w2, b2):
    """Forward of HeadUnsamplingConvBlock(n_stages=2, stride=2, 'none').

    x : (N, C_in, D, H, W)
    w1: (C_out, C_in, 3, 3, 3), b1: (C_out,)          Conv3d(k=3, padding=1)
    w2: (C_out2, C_out, 1, 1, 1) or (C_out2, C_out),  b2: (C_out2,)
    returns (N, C_out2, 2D, 2H, 2W)
    """
    n, ci, d, h, w = x.shape
    co = w1.shape[0]
    w2m = w2.reshape(w2.shape[0], w2.shape[1]).astype(jnp.float32)
    co2 = w2m.shape[0]

    od, oh, ow = 2 * d, 2 * h, 2 * w
    r = _ROWS
    assert od % r == 0, "2*D must be a multiple of 8 (D % 4 == 0)"
    cip = ((ci + 7) // 8) * 8            # pad channels to a sublane multiple
    win = h * w                          # input lanes per depth slice
    a = oh * ow                          # output lanes per depth slice
    lp = (oh + 2) * ow + 2               # padded upsampled lanes per depth slice
    odp = od + 2                         # zero-padded upsampled depth
    rows2 = (r + 2) * cip                # scratch rows per depth block (with halo)

    # ---------- small wrapper-side prep (acts on the pre-upsample input) ----
    xt = jnp.transpose(x, (0, 2, 1, 3, 4)).reshape(n, d, ci, win)
    if cip != ci:
        xt = jnp.pad(xt, ((0, 0), (0, 0), (0, cip - ci), (0, 0)))
    xt = xt.astype(jnp.float32)

    # H/W interpolation matrix with the 3x3x3 conv's zero padding baked in.
    # Per-depth lane layout: [1 dummy][OW top pad][OH*OW interior][OW bottom pad][1 dummy]
    t_h = _interp_matrix_1d(h)                      # (OH, H)
    t_w = _interp_matrix_1d(w)                      # (OW, W)
    core = np.kron(t_h, t_w)                        # (OH*OW, H*W)
    t_np = np.zeros((win, lp), dtype=np.float32)
    t_np[:, 1 + ow: 1 + ow + a] = core.T
    t_mat = jnp.asarray(t_np)

    # Banded packing: fold the 3 depth taps and the r output depth rows into a
    # single (Co*r, (r+2)*Cip) weight per (kh, kw) tap.  Output row (o, rr)
    # reads halo rows rr, rr+1, rr+2 of the depth block with weights
    # w1[o, c, kd, kh, kw], so the whole depth block needs only 9 matmuls.
    sel_np = np.zeros((r, 3, r + 2), dtype=np.float32)
    for rr in range(r):
        for kd in range(3):
            sel_np[rr, kd, rr + kd] = 1.0
    sel = jnp.asarray(sel_np)                                       # (r, 3, r+2)
    w1t = jnp.transpose(w1.astype(jnp.float32), (2, 3, 4, 0, 1))    # (3,3,3,Co,Ci)
    w1t = jnp.pad(w1t, ((0, 0),) * 4 + ((0, cip - ci),))
    w1band = jnp.einsum('dhwoc,rdm->hwormc', w1t, sel)              # (3,3,Co,r,r+2,Cip)
    w1band = w1band.reshape(3, 3, co * r, rows2)

    # 1x1x1 conv as a block-diagonal (Co2*r, Co*r) matmul over the r rows.
    eye = jnp.eye(r, dtype=jnp.float32)
    w2big = jnp.einsum('oc,rs->orcs', w2m, eye).reshape(co2 * r, co * r)
    b1big = jnp.repeat(b1.astype(jnp.float32), r).reshape(co * r, 1)
    b2big = jnp.repeat(b2.astype(jnp.float32), r).reshape(co2 * r, 1)

    def kernel(x_ref, t_ref, w1_ref, b1_ref, w2_ref, b2_ref, o_ref, u_scr):
        ob = pl.program_id(1)

        # Build the zero-padded trilinearly-upsampled volume for this sample
        # once per sample and keep it in VMEM scratch across depth blocks.
        @pl.when(ob == 0)
        def _build_upsampled():
            xv = x_ref[0]                                     # (D, Cip, Win)
            xm = jnp.concatenate([xv[:1], xv[:-1]], axis=0)   # clamp(i-1)
            xp = jnp.concatenate([xv[1:], xv[-1:]], axis=0)   # clamp(i+1)
            ev = 0.25 * xm + 0.75 * xv                        # depth rows 2i
            odd = 0.75 * xv + 0.25 * xp                       # depth rows 2i+1
            ud = jnp.stack([ev, odd], axis=1).reshape(od, cip, win)
            zpad = jnp.zeros((1, cip, win), jnp.float32)
            udp = jnp.concatenate([zpad, ud, zpad], axis=0)   # (ODp, Cip, Win)
            u_scr[...] = jnp.dot(udp.reshape(odp * cip, win), t_ref[...],
                                 preferred_element_type=jnp.float32)

        # Depth block: r output rows need padded depths r0 .. r0+r+1 (halo 2).
        srow = pl.multiple_of(ob * (r * cip), r * cip)
        base = u_scr[pl.ds(srow, rows2)]                      # (rows2, Lp)

        # W-boundary masks (flattened H*W lanes would wrap into the next row).
        lane = jax.lax.broadcasted_iota(jnp.int32, (1, a), 1)
        ow_idx = lane % ow
        mask_l = (ow_idx > 0).astype(jnp.float32)
        mask_r = (ow_idx < ow - 1).astype(jnp.float32)

        acc = jnp.zeros((co * r, a), jnp.float32)
        for kw in range(3):
            part = jnp.zeros((co * r, a), jnp.float32)
            for kh in range(3):
                start = kh * ow + kw
                u_tap = base[:, start:start + a]              # (rows2, A)
                part = part + jnp.dot(w1_ref[kh, kw], u_tap,
                                      preferred_element_type=jnp.float32)
            if kw == 0:
                part = part * mask_l
            elif kw == 2:
                part = part * mask_r
            acc = acc + part

        h1 = jnp.maximum(acc + b1_ref[...], 0.0)              # bias + ReLU
        y = jnp.dot(w2_ref[...], h1,
                    preferred_element_type=jnp.float32) + b2_ref[...]
        o_ref[0] = y.reshape(co2, r, a).astype(o_ref.dtype)

    grid = (n, od // r)
    out = pl.pallas_call(
        kernel,
        out_shape=jax.ShapeDtypeStruct((n, co2, od, a), x.dtype),
        grid_spec=pltpu.PrefetchScalarGridSpec(
            num_scalar_prefetch=0,
            grid=grid,
            in_specs=[
                pl.BlockSpec((1, d, cip, win), lambda i, j: (i, 0, 0, 0)),
                pl.BlockSpec((win, lp), lambda i, j: (0, 0)),
                pl.BlockSpec((3, 3, co * r, rows2), lambda i, j: (0, 0, 0, 0)),
                pl.BlockSpec((co * r, 1), lambda i, j: (0, 0)),
                pl.BlockSpec((co2 * r, co * r), lambda i, j: (0, 0)),
                pl.BlockSpec((co2 * r, 1), lambda i, j: (0, 0)),
            ],
            out_specs=pl.BlockSpec((1, co2, r, a), lambda i, j: (i, 0, j, 0)),
            scratch_shapes=[pltpu.VMEM((odp * cip, lp), jnp.float32)],
        ),
        compiler_params=pltpu.CompilerParams(
            dimension_semantics=("parallel", "arbitrary")),
    )(xt, t_mat, w1band, b1big, w2big, b2big)

    # Free row-major reshape: lane axis OH*OW -> (OH, OW).
    return out.reshape(n, co2, od, oh, ow)


def _reference(x, w1, b1, w2, b2):
    """Pure-JAX reference of the module forward (f32, no MXU shortcuts)."""
    def up_axis(arr, axis):
        s = arr.shape[axis]
        src = (jnp.arange(2 * s, dtype=jnp.float32) + 0.5) / 2.0 - 0.5
        src = jnp.clip(src, 0.0, None)
        i0 = jnp.minimum(jnp.floor(src).astype(jnp.int32), s - 1)
        i1 = jnp.minimum(i0 + 1, s - 1)
        lam = src - i0.astype(jnp.float32)
        a0 = jnp.take(arr, i0, axis=axis)
        a1 = jnp.take(arr, i1, axis=axis)
        shape = [1] * arr.ndim
        shape[axis] = 2 * s
        lam = lam.reshape(shape)
        return a0 * (1.0 - lam) + a1 * lam

    u = up_axis(up_axis(up_axis(x.astype(jnp.float32), 2), 3), 4)
    n_, _, od_, oh_, ow_ = u.shape
    co_ = w1.shape[0]
    up = jnp.pad(u, ((0, 0), (0, 0), (1, 1), (1, 1), (1, 1)))
    y = jnp.zeros((n_, co_, od_, oh_, ow_), jnp.float32)
    for kd in range(3):
        for kh in range(3):
            for kw in range(3):
                winv = up[:, :, kd:kd + od_, kh:kh + oh_, kw:kw + ow_]
                y = y + jnp.einsum('oc,ncdhw->nodhw', w1[:, :, kd, kh, kw],
                                   winv, precision=jax.lax.Precision.HIGHEST)
    y = jnp.maximum(y + b1.reshape(1, -1, 1, 1, 1), 0.0)
    w2m = w2.reshape(w2.shape[0], w2.shape[1])
    z = jnp.einsum('oc,ncdhw->nodhw', w2m, y,
                   precision=jax.lax.Precision.HIGHEST)
    return z + b2.reshape(1, -1, 1, 1, 1)


if __name__ == "__main__":
    # HeadUnsamplingConvBlock(n_stages=2, n_filters_in=4, n_filters_out=8,
    #                         stride=2, normalization='none')
    n_filters_in, n_filters_out = 4, 8
    N, D, H, W = 2, 8, 8, 8

    key = jax.random.PRNGKey(0)
    kx, k1, k2, k3, k4 = jax.random.split(key, 5)

    x = jax.random.normal(kx, (N, n_filters_in, D, H, W), dtype=jnp.float32)
    w1 = 0.1 * jax.random.normal(
        k1, (n_filters_out, n_filters_in, 3, 3, 3), dtype=jnp.float32)
    b1 = 0.1 * jax.random.normal(k2, (n_filters_out,), dtype=jnp.float32)
    w2 = 0.1 * jax.random.normal(
        k3, (n_filters_out, n_filters_out, 1, 1, 1), dtype=jnp.float32)
    b2 = 0.1 * jax.random.normal(k4, (n_filters_out,), dtype=jnp.float32)

    out = head_upsampling_conv_block(x, w1, b1, w2, b2)
    out = jax.block_until_ready(out)

    ref = _reference(x, w1, b1, w2, b2)
    assert out.shape == (N, n_filters_out, 2 * D, 2 * H, 2 * W), out.shape
    max_err = float(jnp.max(jnp.abs(out - ref)))
    assert max_err < 1e-3, f"mismatch vs reference: max|diff|={max_err}"

    print("KERNEL_OK")
</pallas_src>

<mosaic_0001>
module attributes {stable_mosaic.version = 11 : i64} {
  func.func @kernel(%arg0: i32, %arg1: i32, %arg2: memref<1x8x8x64xf32, #tpu.memory_space<vmem>>, %arg3: memref<64x290xf32, #tpu.memory_space<vmem>>, %arg4: memref<3x3x64x80xf32, #tpu.memory_space<vmem>>, %arg5: memref<64x1xf32, #tpu.memory_space<vmem>>, %arg6: memref<64x64xf32, #tpu.memory_space<vmem>>, %arg7: memref<64x1xf32, #tpu.memory_space<vmem>>, %arg8: memref<1x8x8x256xf32, #tpu.memory_space<vmem>>, %arg9: memref<144x290xf32, #tpu.memory_space<vmem>>) attributes {dimension_semantics = [#tpu.dimension_semantics<parallel>, #tpu.dimension_semantics<arbitrary>], iteration_bounds = array<i64: 2, 2>, scalar_prefetch = 0 : i64, scratch_operands = 1 : i64, tpu.core_type = #tpu.core_type<tc>, window_params = [{transform_indices = @transform_0, window_bounds = array<i64: 1, 8, 8, 64>}, {pipeline_mode = #tpu.pipeline_mode<synchronous>, transform_indices = @transform_1, window_bounds = array<i64: 64, 290>}, {pipeline_mode = #tpu.pipeline_mode<synchronous>, transform_indices = @transform_2, window_bounds = array<i64: 3, 3, 64, 80>}, {pipeline_mode = #tpu.pipeline_mode<synchronous>, transform_indices = @transform_3, window_bounds = array<i64: 64, 1>}, {pipeline_mode = #tpu.pipeline_mode<synchronous>, transform_indices = @transform_4, window_bounds = array<i64: 64, 64>}, {pipeline_mode = #tpu.pipeline_mode<synchronous>, transform_indices = @transform_5, window_bounds = array<i64: 64, 1>}, {transform_indices = @transform_6, window_bounds = array<i64: 1, 8, 8, 256>}]} {
    %c0_i32 = arith.constant 0 : i32
    %0 = arith.cmpi eq, %arg1, %c0_i32 : i32
    %1 = arith.extui %0 : i1 to i32
    %c0_i32_0 = arith.constant 0 : i32
    %2 = arith.cmpi ne, %1, %c0_i32_0 : i32
    scf.if %2 {
      %c0_64 = arith.constant 0 : index
      %c0_65 = arith.constant 0 : index
      %c0_66 = arith.constant 0 : index
      %c0_67 = arith.constant 0 : index
      %102 = vector.load %arg2[%c0_64, %c0_65, %c0_66, %c0_67] : memref<1x8x8x64xf32, #tpu.memory_space<vmem>>, vector<1x8x8x64xf32>
      %103 = vector.shape_cast %102 : vector<1x8x8x64xf32> to vector<8x8x64xf32>
      %104 = vector.extract_strided_slice %103 {offsets = [0, 0, 0], sizes = [1, 8, 64], strides = [1, 1, 1]} : vector<8x8x64xf32> to vector<1x8x64xf32>
      %105 = vector.extract_strided_slice %103 {offsets = [0, 0, 0], sizes = [7, 8, 64], strides = [1, 1, 1]} : vector<8x8x64xf32> to vector<7x8x64xf32>
      %106 = tpu.concatenate %104, %105 in 0 : vector<1x8x64xf32>, vector<7x8x64xf32> -> vector<8x8x64xf32>
      %107 = vector.extract_strided_slice %103 {offsets = [1, 0, 0], sizes = [7, 8, 64], strides = [1, 1, 1]} : vector<8x8x64xf32> to vector<7x8x64xf32>
      %108 = vector.extract_strided_slice %103 {offsets = [7, 0, 0], sizes = [1, 8, 64], strides = [1, 1, 1]} : vector<8x8x64xf32> to vector<1x8x64xf32>
      %109 = tpu.concatenate %107, %108 in 0 : vector<7x8x64xf32>, vector<1x8x64xf32> -> vector<8x8x64xf32>
      %cst_68 = arith.constant 2.500000e-01 : f32
      %110 = vector.broadcast %cst_68 : f32 to vector<8x8x64xf32>
      %111 = arith.mulf %110, %106 : vector<8x8x64xf32>
      %cst_69 = arith.constant 7.500000e-01 : f32
      %112 = vector.broadcast %cst_69 : f32 to vector<8x8x64xf32>
      %113 = arith.mulf %112, %103 : vector<8x8x64xf32>
      %114 = arith.addf %111, %113 : vector<8x8x64xf32>
      %cst_70 = arith.constant 7.500000e-01 : f32
      %115 = vector.broadcast %cst_70 : f32 to vector<8x8x64xf32>
      %116 = arith.mulf %115, %103 : vector<8x8x64xf32>
      %cst_71 = arith.constant 2.500000e-01 : f32
      %117 = vector.broadcast %cst_71 : f32 to vector<8x8x64xf32>
      %118 = arith.mulf %117, %109 : vector<8x8x64xf32>
      %119 = arith.addf %116, %118 : vector<8x8x64xf32>
      %120 = vector.shape_cast %114 : vector<8x8x64xf32> to vector<8x1x8x64xf32>
      %121 = vector.shape_cast %119 : vector<8x8x64xf32> to vector<8x1x8x64xf32>
      %122 = tpu.concatenate %120, %121 in 1 : vector<8x1x8x64xf32>, vector<8x1x8x64xf32> -> vector<8x2x8x64xf32>
      %123 = vector.shape_cast %122 : vector<8x2x8x64xf32> to vector<16x8x64xf32>
      %cst_72 = arith.constant 0.000000e+00 : f32
      %124 = vector.broadcast %cst_72 : f32 to vector<1x8x64xf32>
      %125 = tpu.concatenate %124, %123, %124 in 0 : vector<1x8x64xf32>, vector<16x8x64xf32>, vector<1x8x64xf32> -> vector<18x8x64xf32>
      %126 = vector.shape_cast %125 : vector<18x8x64xf32> to vector<144x64xf32>
      %c0_73 = arith.constant 0 : index
      %c0_74 = arith.constant 0 : index
      %127 = vector.load %arg3[%c0_73, %c0_74] : memref<64x290xf32, #tpu.memory_space<vmem>>, vector<64x290xf32>
      %cst_75 = arith.constant dense<0.000000e+00> : vector<144x290xf32>
      %128 = tpu.matmul %126, %127, %cst_75 {dimension_numbers = #tpu.dot_dimension_numbers<[1], [0], [0], [1], [0, 0, 1, 1], [], []>} : vector<144x64xf32>, vector<64x290xf32>, vector<144x290xf32> -> vector<144x290xf32>
      %c0_76 = arith.constant 0 : index
      %c0_77 = arith.constant 0 : index
      %129 = vector.load %arg9[%c0_76, %c0_77] : memref<144x290xf32, #tpu.memory_space<vmem>>, vector<144x290xf32>
      tpu.vector_store %arg9[%c0_76, %c0_77], %128 {strides = array<i32>} : memref<144x290xf32, #tpu.memory_space<vmem>>, vector<144x290xf32>,
    } else {
    }
    %c64_i32 = arith.constant 64 : i32
    %3 = arith.muli %arg1, %c64_i32 : i32
    %4 = tpu.assume_multiple %3, 64 : i32
    %5 = arith.index_cast %4 : i32 to index
    %c0 = arith.constant 0 : index
    %6 = vector.load %arg9[%5, %c0] : memref<144x290xf32, #tpu.memory_space<vmem>>, vector<80x290xf32>
    %7 = tpu.iota {dimensions = array<i32: 1>} : vector<1x256xi32>
    %c16_i32 = arith.constant 16 : i32
    %c0_i32_1 = arith.constant 0 : i32
    %8 = arith.cmpi eq, %c16_i32, %c0_i32_1 : i32
    %c1_i32 = arith.constant 1 : i32
    %9 = arith.select %8, %c1_i32, %c16_i32 : i32
    %10 = vector.broadcast %9 : i32 to vector<1x256xi32>
    %11 = arith.remsi %7, %10 : vector<1x256xi32>
    %c0_i32_2 = arith.constant 0 : i32
    %12 = vector.broadcast %c0_i32_2 : i32 to vector<1x256xi32>
    %13 = arith.cmpi ne, %11, %12 : vector<1x256xi32>
    %c0_i32_3 = arith.constant 0 : i32
    %14 = vector.broadcast %c0_i32_3 : i32 to vector<1x256xi32>
    %15 = arith.cmpi slt, %11, %14 : vector<1x256xi32>
    %c0_i32_4 = arith.constant 0 : i32
    %16 = arith.cmpi slt, %9, %c0_i32_4 : i32
    %17 = vector.broadcast %16 : i1 to vector<1x256xi1>
    %18 = vector.broadcast %17 : vector<1x256xi1> to vector<1x256xi1>
    %19 = arith.xori %15, %18 : vector<1x256xi1>
    %20 = arith.andi %19, %13 : vector<1x256xi1>
    %21 = vector.broadcast %9 : i32 to vector<1x256xi32>
    %22 = arith.addi %11, %21 : vector<1x256xi32>
    %23 = arith.select %20, %22, %11 : vector<1x256xi1>, vector<1x256xi32>
    %c0_i32_5 = arith.constant 0 : i32
    %24 = vector.broadcast %c0_i32_5 : i32 to vector<1x256xi32>
    %25 = arith.cmpi sgt, %23, %24 : vector<1x256xi32>
    %26 = arith.extui %25 : vector<1x256xi1> to vector<1x256xi32>
    %27 = arith.sitofp %26 : vector<1x256xi32> to vector<1x256xf32>
    %c15_i32 = arith.constant 15 : i32
    %28 = vector.broadcast %c15_i32 : i32 to vector<1x256xi32>
    %29 = arith.cmpi slt, %23, %28 : vector<1x256xi32>
    %30 = arith.extui %29 : vector<1x256xi1> to vector<1x256xi32>
    %31 = arith.sitofp %30 : vector<1x256xi32> to vector<1x256xf32>
    %cst = arith.constant 0.000000e+00 : f32
    %32 = vector.broadcast %cst : f32 to vector<64x256xf32>
    %cst_6 = arith.constant 0.000000e+00 : f32
    %33 = vector.broadcast %cst_6 : f32 to vector<64x256xf32>
    %34 = vector.extract_strided_slice %6 {offsets = [0, 0], sizes = [80, 256], strides = [1, 1]} : vector<80x290xf32> to vector<80x256xf32>
    %c0_7 = arith.constant 0 : index
    %c0_8 = arith.constant 0 : index
    %c0_9 = arith.constant 0 : index
    %c0_10 = arith.constant 0 : index
    %35 = vector.load %arg4[%c0_7, %c0_8, %c0_9, %c0_10] : memref<3x3x64x80xf32, #tpu.memory_space<vmem>>, vector<1x1x64x80xf32>
    %36 = vector.shape_cast %35 : vector<1x1x64x80xf32> to vector<64x80xf32>
    %cst_11 = arith.constant dense<0.000000e+00> : vector<64x256xf32>
    %37 = tpu.matmul %36, %34, %cst_11 {dimension_numbers = #tpu.dot_dimension_numbers<[1], [0], [0], [1], [0, 0, 1, 1], [], []>} : vector<64x80xf32>, vector<80x256xf32>, vector<64x256xf32> -> vector<64x256xf32>
    %38 = arith.addf %33, %37 : vector<64x256xf32>
    %39 = vector.extract_strided_slice %6 {offsets = [0, 16], sizes = [80, 256], strides = [1, 1]} : vector<80x290xf32> to vector<80x256xf32>
    %c1 = arith.constant 1 : index
    %c0_12 = arith.constant 0 : index
    %c0_13 = arith.constant 0 : index
    %c0_14 = arith.constant 0 : index
    %40 = vector.load %arg4[%c1, %c0_12, %c0_13, %c0_14] : memref<3x3x64x80xf32, #tpu.memory_space<vmem>>, vector<1x1x64x80xf32>
    %41 = vector.shape_cast %40 : vector<1x1x64x80xf32> to vector<64x80xf32>
    %cst_15 = arith.constant dense<0.000000e+00> : vector<64x256xf32>
    %42 = tpu.matmul %41, %39, %cst_15 {dimension_numbers = #tpu.dot_dimension_numbers<[1], [0], [0], [1], [0, 0, 1, 1], [], []>} : vector<64x80xf32>, vector<80x256xf32>, vector<64x256xf32> -> vector<64x256xf32>
    %43 = arith.addf %38, %42 : vector<64x256xf32>
    %44 = vector.extract_strided_slice %6 {offsets = [0, 32], sizes = [80, 256], strides = [1, 1]} : vector<80x290xf32> to vector<80x256xf32>
    %c2 = arith.constant 2 : index
    %c0_16 = arith.constant 0 : index
    %c0_17 = arith.constant 0 : index
    %c0_18 = arith.constant 0 : index
    %45 = vector.load %arg4[%c2, %c0_16, %c0_17, %c0_18] : memref<3x3x64x80xf32, #tpu.memory_space<vmem>>, vector<1x1x64x80xf32>
    %46 = vector.shape_cast %45 : vector<1x1x64x80xf32> to vector<64x80xf32>
    %cst_19 = arith.constant dense<0.000000e+00> : vector<64x256xf32>
    %47 = tpu.matmul %46, %44, %cst_19 {dimension_numbers = #tpu.dot_dimension_numbers<[1], [0], [0], [1], [0, 0, 1, 1], [], []>} : vector<64x80xf32>, vector<80x256xf32>, vector<64x256xf32> -> vector<64x256xf32>
    %48 = arith.addf %43, %47 : vector<64x256xf32>
    %49 = vector.broadcast %27 : vector<1x256xf32> to vector<64x256xf32>
    %50 = arith.mulf %48, %49 : vector<64x256xf32>
    %51 = arith.addf %32, %50 : vector<64x256xf32>
    %cst_20 = arith.constant 0.000000e+00 : f32
    %52 = vector.broadcast %cst_20 : f32 to vector<64x256xf32>
    %53 = vector.extract_strided_slice %6 {offsets = [0, 1], sizes = [80, 256], strides = [1, 1]} : vector<80x290xf32> to vector<80x256xf32>
    %c0_21 = arith.constant 0 : index
    %c1_22 = arith.constant 1 : index
    %c0_23 = arith.constant 0 : index
    %c0_24 = arith.constant 0 : index
    %54 = vector.load %arg4[%c0_21, %c1_22, %c0_23, %c0_24] : memref<3x3x64x80xf32, #tpu.memory_space<vmem>>, vector<1x1x64x80xf32>
    %55 = vector.shape_cast %54 : vector<1x1x64x80xf32> to vector<64x80xf32>
    %cst_25 = arith.constant dense<0.000000e+00> : vector<64x256xf32>
    %56 = tpu.matmul %55, %53, %cst_25 {dimension_numbers = #tpu.dot_dimension_numbers<[1], [0], [0], [1], [0, 0, 1, 1], [], []>} : vector<64x80xf32>, vector<80x256xf32>, vector<64x256xf32> -> vector<64x256xf32>
    %57 = arith.addf %52, %56 : vector<64x256xf32>
    %58 = vector.extract_strided_slice %6 {offsets = [0, 17], sizes = [80, 256], strides = [1, 1]} : vector<80x290xf32> to vector<80x256xf32>
    %c1_26 = arith.constant 1 : index
    %c1_27 = arith.constant 1 : index
    %c0_28 = arith.constant 0 : index
    %c0_29 = arith.constant 0 : index
    %59 = vector.load %arg4[%c1_26, %c1_27, %c0_28, %c0_29] : memref<3x3x64x80xf32, #tpu.memory_space<vmem>>, vector<1x1x64x80xf32>
    %60 = vector.shape_cast %59 : vector<1x1x64x80xf32> to vector<64x80xf32>
    %cst_30 = arith.constant dense<0.000000e+00> : vector<64x256xf32>
    %61 = tpu.matmul %60, %58, %cst_30 {dimension_numbers = #tpu.dot_dimension_numbers<[1], [0], [0], [1], [0, 0, 1, 1], [], []>} : vector<64x80xf32>, vector<80x256xf32>, vector<64x256xf32> -> vector<64x256xf32>
    %62 = arith.addf %57, %61 : vector<64x256xf32>
    %63 = vector.extract_strided_slice %6 {offsets = [0, 33], sizes = [80, 256], strides = [1, 1]} : vector<80x290xf32> to vector<80x256xf32>
    %c2_31 = arith.constant 2 : index
    %c1_32 = arith.constant 1 : index
    %c0_33 = arith.constant 0 : index
    %c0_34 = arith.constant 0 : index
    %64 = vector.load %arg4[%c2_31, %c1_32, %c0_33, %c0_34] : memref<3x3x64x80xf32, #tpu.memory_space<vmem>>, vector<1x1x64x80xf32>
    %65 = vector.shape_cast %64 : vector<1x1x64x80xf32> to vector<64x80xf32>
    %cst_35 = arith.constant dense<0.000000e+00> : vector<64x256xf32>
    %66 = tpu.matmul %65, %63, %cst_35 {dimension_numbers = #tpu.dot_dimension_numbers<[1], [0], [0], [1], [0, 0, 1, 1], [], []>} : vector<64x80xf32>, vector<80x256xf32>, vector<64x256xf32> -> vector<64x256xf32>
    %67 = arith.addf %62, %66 : vector<64x256xf32>
    %68 = arith.addf %51, %67 : vector<64x256xf32>
    %cst_36 = arith.constant 0.000000e+00 : f32
    %69 = vector.broadcast %cst_36 : f32 to vector<64x256xf32>
    %70 = vector.extract_strided_slice %6 {offsets = [0, 2], sizes = [80, 256], strides = [1, 1]} : vector<80x290xf32> to vector<80x256xf32>
    %c0_37 = arith.constant 0 : index
    %c2_38 = arith.constant 2 : index
    %c0_39 = arith.constant 0 : index
    %c0_40 = arith.constant 0 : index
    %71 = vector.load %arg4[%c0_37, %c2_38, %c0_39, %c0_40] : memref<3x3x64x80xf32, #tpu.memory_space<vmem>>, vector<1x1x64x80xf32>
    %72 = vector.shape_cast %71 : vector<1x1x64x80xf32> to vector<64x80xf32>
    %cst_41 = arith.constant dense<0.000000e+00> : vector<64x256xf32>
    %73 = tpu.matmul %72, %70, %cst_41 {dimension_numbers = #tpu.dot_dimension_numbers<[1], [0], [0], [1], [0, 0, 1, 1], [], []>} : vector<64x80xf32>, vector<80x256xf32>, vector<64x256xf32> -> vector<64x256xf32>
    %74 = arith.addf %69, %73 : vector<64x256xf32>
    %75 = vector.extract_strided_slice %6 {offsets = [0, 18], sizes = [80, 256], strides = [1, 1]} : vector<80x290xf32> to vector<80x256xf32>
    %c1_42 = arith.constant 1 : index
    %c2_43 = arith.constant 2 : index
    %c0_44 = arith.constant 0 : index
    %c0_45 = arith.constant 0 : index
    %76 = vector.load %arg4[%c1_42, %c2_43, %c0_44, %c0_45] : memref<3x3x64x80xf32, #tpu.memory_space<vmem>>, vector<1x1x64x80xf32>
    %77 = vector.shape_cast %76 : vector<1x1x64x80xf32> to vector<64x80xf32>
    %cst_46 = arith.constant dense<0.000000e+00> : vector<64x256xf32>
    %78 = tpu.matmul %77, %75, %cst_46 {dimension_numbers = #tpu.dot_dimension_numbers<[1], [0], [0], [1], [0, 0, 1, 1], [], []>} : vector<64x80xf32>, vector<80x256xf32>, vector<64x256xf32> -> vector<64x256xf32>
    %79 = arith.addf %74, %78 : vector<64x256xf32>
    %80 = vector.extract_strided_slice %6 {offsets = [0, 34], sizes = [80, 256], strides = [1, 1]} : vector<80x290xf32> to vector<80x256xf32>
    %c2_47 = arith.constant 2 : index
    %c2_48 = arith.constant 2 : index
    %c0_49 = arith.constant 0 : index
    %c0_50 = arith.constant 0 : index
    %81 = vector.load %arg4[%c2_47, %c2_48, %c0_49, %c0_50] : memref<3x3x64x80xf32, #tpu.memory_space<vmem>>, vector<1x1x64x80xf32>
    %82 = vector.shape_cast %81 : vector<1x1x64x80xf32> to vector<64x80xf32>
    %cst_51 = arith.constant dense<0.000000e+00> : vector<64x256xf32>
    %83 = tpu.matmul %82, %80, %cst_51 {dimension_numbers = #tpu.dot_dimension_numbers<[1], [0], [0], [1], [0, 0, 1, 1], [], []>} : vector<64x80xf32>, vector<80x256xf32>, vector<64x256xf32> -> vector<64x256xf32>
    %84 = arith.addf %79, %83 : vector<64x256xf32>
    %85 = vector.broadcast %31 : vector<1x256xf32> to vector<64x256xf32>
    %86 = arith.mulf %84, %85 : vector<64x256xf32>
    %87 = arith.addf %68, %86 : vector<64x256xf32>
    %c0_52 = arith.constant 0 : index
    %c0_53 = arith.constant 0 : index
    %88 = vector.load %arg5[%c0_52, %c0_53] : memref<64x1xf32, #tpu.memory_space<vmem>>, vector<64x1xf32>
    %89 = vector.broadcast %88 : vector<64x1xf32> to vector<64x256xf32>
    %90 = arith.addf %87, %89 : vector<64x256xf32>
    %cst_54 = arith.constant 0.000000e+00 : f32
    %91 = vector.broadcast %cst_54 : f32 to vector<64x256xf32>
    %92 = arith.maximumf %90, %91 : vector<64x256xf32>
    %c0_55 = arith.constant 0 : index
    %c0_56 = arith.constant 0 : index
    %93 = vector.load %arg6[%c0_55, %c0_56] : memref<64x64xf32, #tpu.memory_space<vmem>>, vector<64x64xf32>
    %cst_57 = arith.constant dense<0.000000e+00> : vector<64x256xf32>
    %94 = tpu.matmul %93, %92, %cst_57 {dimension_numbers = #tpu.dot_dimension_numbers<[1], [0], [0], [1], [0, 0, 1, 1], [], []>} : vector<64x64xf32>, vector<64x256xf32>, vector<64x256xf32> -> vector<64x256xf32>
    %c0_58 = arith.constant 0 : index
    %c0_59 = arith.constant 0 : index
    %95 = vector.load %arg7[%c0_58, %c0_59] : memref<64x1xf32, #tpu.memory_space<vmem>>, vector<64x1xf32>
    %96 = vector.broadcast %95 : vector<64x1xf32> to vector<64x256xf32>
    %97 = arith.addf %94, %96 : vector<64x256xf32>
    %98 = vector.shape_cast %97 : vector<64x256xf32> to vector<8x8x256xf32>
    %c0_60 = arith.constant 0 : index
    %c0_61 = arith.constant 0 : index
    %c0_62 = arith.constant 0 : index
    %c0_63 = arith.constant 0 : index
    %99 = vector.load %arg8[%c0_60, %c0_61, %c0_62, %c0_63] : memref<1x8x8x256xf32, #tpu.memory_space<vmem>>, vector<1x8x8x256xf32>
    %100 = vector.shape_cast %99 : vector<1x8x8x256xf32> to vector<8x8x256xf32>
    %101 = vector.shape_cast %98 : vector<8x8x256xf32> to vector<1x8x8x256xf32>
    tpu.vector_store %arg8[%c0_60, %c0_61, %c0_62, %c0_63], %101 {strides = array<i32>} : memref<1x8x8x256xf32, #tpu.memory_space<vmem>>, vector<1x8x8x256xf32>,
    return
  }
  func.func @transform_0(%arg0: i32, %arg1: i32) -> (i32, i32, i32, i32) {
    %c0_i32 = arith.constant 0 : i32
    %c0_i32_0 = arith.constant 0 : i32
    %c0_i32_1 = arith.constant 0 : i32
    %c0_i32_2 = arith.constant 0 : i32
    return %arg0, %c0_i32, %c0_i32_0, %c0_i32_1 : i32, i32, i32, i32
  }
  func.func @transform_1(%arg0: i32, %arg1: i32) -> (i32, i32) {
    %c0_i32 = arith.constant 0 : i32
    %c0_i32_0 = arith.constant 0 : i32
    %c0_i32_1 = arith.constant 0 : i32
    return %c0_i32, %c0_i32_0 : i32, i32
  }
  func.func @transform_2(%arg0: i32, %arg1: i32) -> (i32, i32, i32, i32) {
    %c0_i32 = arith.constant 0 : i32
    %c0_i32_0 = arith.constant 0 : i32
    %c0_i32_1 = arith.constant 0 : i32
    %c0_i32_2 = arith.constant 0 : i32
    %c0_i32_3 = arith.constant 0 : i32
    return %c0_i32, %c0_i32_0, %c0_i32_1, %c0_i32_2 : i32, i32, i32, i32
  }
  func.func @transform_3(%arg0: i32, %arg1: i32) -> (i32, i32) {
    %c0_i32 = arith.constant 0 : i32
    %c0_i32_0 = arith.constant 0 : i32
    %c0_i32_1 = arith.constant 0 : i32
    return %c0_i32, %c0_i32_0 : i32, i32
  }
  func.func @transform_4(%arg0: i32, %arg1: i32) -> (i32, i32) {
    %c0_i32 = arith.constant 0 : i32
    %c0_i32_0 = arith.constant 0 : i32
    %c0_i32_1 = arith.constant 0 : i32
    return %c0_i32, %c0_i32_0 : i32, i32
  }
  func.func @transform_5(%arg0: i32, %arg1: i32) -> (i32, i32) {
    %c0_i32 = arith.constant 0 : i32
    %c0_i32_0 = arith.constant 0 : i32
    %c0_i32_1 = arith.constant 0 : i32
    return %c0_i32, %c0_i32_0 : i32, i32
  }
  func.func @transform_6(%arg0: i32, %arg1: i32) -> (i32, i32, i32, i32) {
    %c0_i32 = arith.constant 0 : i32
    %c0_i32_0 = arith.constant 0 : i32
    %c0_i32_1 = arith.constant 0 : i32
    return %arg0, %c0_i32, %arg1, %c0_i32_0 : i32, i32, i32, i32
  }
}

</mosaic_0001>

<bundles_post_ra>
// kernel: tpu_custom_call.1
= control target key start
LH: loop header
LB: loop body
LE: loop exit
PB: predicated region body
PF: predicated region fallthrough
CT: control target
= control target key end

     0   :  { %11 = vsyncpa [#allocation4], 0  ;;  %s5732_s0 = inlined_call_operand.vmem [shape: f32[2,8,8,64], index: 0, kind: input, shape index: {}]   ;;  %s5733_s1 = inlined_call_operand.hbm [shape: f32[64,290], index: 1, kind: input, shape index: {}]   ;;  %s5734_s2 = inlined_call_operand.hbm [shape: f32[3,3,64,80], index: 2, kind: input, shape index: {}]   ;;  %s5735_s3 = inlined_call_operand.vmem [shape: f32[64,1], index: 3, kind: input, shape index: {}]   ;;  %s5736_s4 = inlined_call_operand.hbm [shape: f32[64,64], index: 4, kind: input, shape index: {}]   ;;  %s5737_s5 = inlined_call_operand.vmem [shape: f32[64,1], index: 5, kind: input, shape index: {}]   ;;  %s5738_s6 = inlined_call_operand.hbm [shape: f32[2,8,16,256], index: 6, kind: output, shape index: {}]  }
   0x1   :  { %12 = vsyncpa [#allocation7], 0 }
   0x2   :  { %13 = vsyncpa [#allocation5], 0 }
   0x3   :  { %15 = vsyncpa [#allocation5 + $0x1], 0  ;;  %s4196_s21 = smov 0   ;;  %s4198_s22 = smov 0  }
   0x4   :  { %s4200_s23 = smov 0   ;;  %s4202_s24 = smov 0  }
   0x5   :  { %s4204_s25 = smov 0   ;;  %s4206_s26 = smov 0  }
   0x6   :  { %s4208_s27 = smov 0   ;;  %s4210_s28 = smov 0  }
   0x7 LB: > { %s3581_s29 = sadd.s32 4294967295, %s4137_s28   ;;  %s3582_s30 = sadd.s32 4294967294, %s4137_s28   ;;  %s4137_s28 = sphi %s4210_s28, %s21_s28   ;;  %s4133_s27 = sphi %s4208_s27, %s5793_s27   ;;  %s4129_s26 = sphi %s4206_s26, %s5792_s26   ;;  %s4125_s25 = sphi %s4204_s25, %s5791_s25   ;;  %s4121_s24 = sphi %s4202_s24, %s5790_s24   ;;  %s4117_s23 = sphi %s4200_s23, %s5789_s23   ;;  %s4113_s22 = sphi %s4198_s22, %s5788_s22   ;;  %s4109_s21 = sphi %s4196_s21, %s5787_s21  }
   0x8   : > { %s30_s7 = sadd.s32 1, %s4129_s26  ;;  %s33_s8 = sadd.s32 1, %s4133_s27 }
   0x9   : > { %p31_p0 = scmp.ge.s32.totalorder %s30_s7, 2  ;;  %s173_s9 = sadd.s32 1, %s4117_s23 }
   0xa   : > { %p183_p1 = scmp.ne.s32.totalorder %s4117_s23, %s4113_s22  ;;  %p184_p2 = scmp.eq.s32.totalorder %s3581_s29, 3 }
   0xb   : > { %s5795_s7 = smov (%p31_p0, %s30_s7), 0  ;;  %s5797_s8 = smov (!%p31_p0, %s33_s8), %s4133_s27 }
   0xc   : > { %5744 = sst [smem:[#allocation13_spill]] %s5795_s7  ;;  %s169_s10 = ssub.s32 %s4129_s26, %s5795_s7 }
   0xd   : > { %p4248_p3 = por %p184_p2, %p183_p1  ;;  %p35_p4 = scmp.ge.s32.totalorder %s5797_s8, 2 }
   0xe   : > { %p189_p5 = scmp.ne.s32.totalorder %s4113_s22, %s4109_s21  ;;  %p190_p6 = scmp.eq.s32.totalorder %s3582_s30, 3 }
   0xf   : > { %p3583_p7 = scmp.ge.s32.totalorder %s4137_s28, 1  ;;  %s5799_s8 = smov (%p35_p4, %s5797_s8), 0 }
  0x10   : > { %5746 = sst [smem:[#allocation14_spill]] %s5799_s8  ;;  %p4257_p8 = por %p190_p6, %p189_p5 }
  0x11   : > { %p197_p9 = scmp.lt.s32.totalorder %s4137_s28, 5  ;;  %s168_s13 = ssub.s32 %s4133_s27, %s5799_s8 }
  0x12   : > { %s170_s14 = sor.u32 %s169_s10, %s168_s13  ;;  %p4268_p12 = scmp.eq.s32.totalorder %s3581_s29, 0 }
  0x13   : > { %p4264_p10 = pnand %p3583_p7, %p197_p9  ;;  %p171_p11 = scmp.eq.s32.totalorder %s170_s14, 0 }
  0x14   : > { %s4139_s19 = smov [#allocation6]  }
  0x15   : > { %p3821_p13 = pneg %p4264_p10  ;;  %s222_s20 = sshll.u32 %s4139_s19, 4  ;;  %s223_s20 = int_to_ptr.vmem [resolvable:$true] %s222_s20 }
  0x16   : > { %s4275_s17 = scalar_select %p171_p11, %s4117_s23, %s173_s9  }
  0x17   : > { %p4279_p0 = pnand %p4268_p12, %p3821_p13  ;;  %s3970_s29 = scalar_lea.vmem %s223_s20, 9216 }
  0x18   : > { %p3971_p2 = scmp.ne.s32.totalorder %s223_s20, %s3970_s29  ;;  %p3978_p6 = scmp.lt.s32.totalorder %s223_s20, %s223_s20 }
  0x19   : > { %p3961_p1 = pneg %p4279_p0  ;;  %p3979_p7 = scmp.lt.s32.totalorder %s3970_s29, %s3970_s29 }
  0x1b   : > { %p3973_p4 = pnand %p3971_p2, %p3961_p1  ;;  %p3980_p9 = por %p3979_p7, %p3978_p6 }
  0x1d   : > { %p3974_p5 = pneg %p3973_p4 }
  0x1f   : > { %p3981_p11 = pnand %p3980_p9, %p3974_p5 }
  0x21   : > { %3984 = shalt.err (!%p3981_p11)
}
  0x22   : > { %s5741_s30 = smov 128   ;;  %s4141_s9 = smov 8  }
  0x23   : > { %3827 = dma.hbm_to_vmem [thread:$0]  (!%p4279_p0), %s5734_s2, 9216, %s223_s20, [#allocation7], %s5741_s30, %s5741_s30, %s4141_s9  }
  0x24   : > { %s4142_s14 = smov [#allocation3]  }
  0x25   : > { %s209_s19 = sshll.u32 %s4142_s14, 4  ;;  %s210_s19 = int_to_ptr.vmem [resolvable:$true] %s209_s19 }
  0x26   : > { %s3996_s8 = scalar_lea.vmem %s210_s19, 3072  ;;  %p4004_p5 = scmp.lt.s32.totalorder %s210_s19, %s210_s19 }
  0x27   : > { %p3997_p13 = scmp.ne.s32.totalorder %s210_s19, %s3996_s8  ;;  %p4005_p6 = scmp.lt.s32.totalorder %s3996_s8, %s3996_s8 }
  0x29   : > { %p3999_p2 = pnand %p3997_p13, %p3961_p1  ;;  %p4006_p7 = por %p4005_p6, %p4004_p5 }
  0x2b   : > { %p4000_p4 = pneg %p3999_p2 }
  0x2d   : > { %p4007_p9 = pnand %p4006_p7, %p4000_p4 }
  0x2f   : > { %4010 = shalt.err (!%p4007_p9)
}
  0x30   : > { %s4143_s29 = smov 384   ;;  %s4144_s7 = smov 24  }
  0x31   : > { %3824 = dma.hbm_to_vmem [thread:$0]  (!%p4279_p0), %s5733_s1, 3072, %s210_s19, [#allocation4], %s4143_s29, %s4143_s29, %s4144_s7  }
  0x32   : > { %s4145_s13 = smov [#allocation8]  }
  0x33   : > { %s238_s14 = sshll.u32 %s4145_s13, 4  ;;  %s239_s14 = int_to_ptr.vmem [resolvable:$true] %s238_s14 }
  0x34   : > { %s4022_s30 = scalar_lea.vmem %s239_s14, 1024  ;;  %p4030_p4 = scmp.lt.s32.totalorder %s239_s14, %s239_s14 }
  0x35   : > { %p4023_p11 = scmp.ne.s32.totalorder %s239_s14, %s4022_s30  ;;  %p4031_p5 = scmp.lt.s32.totalorder %s4022_s30, %s4022_s30 }
  0x37   : > { %p4025_p13 = pnand %p4023_p11, %p3961_p1  ;;  %p4032_p6 = por %p4031_p5, %p4030_p4 }
  0x39   : > { %p4026_p2 = pneg %p4025_p13 }
  0x3b   : > { %p4033_p7 = pnand %p4032_p6, %p4026_p2 }
  0x3d   : > { %4036 = shalt.err (!%p4033_p7)
}
  0x3e   : > { %s5751_s8 = smov 128   ;;  %265 = sbr.rel (%p4264_p10) target bundleno = 1433 (0x599), region = 44 }
  0x3f   : > { %3830 = dma.hbm_to_vmem [thread:$0]  (!%p4279_p0), %s5736_s4, 1024, %s239_s14, [#allocation7], %s5751_s8, %s5751_s8, %s4141_s9  }
  0x43   : > { %4096 = dma.done.wait (%p4268_p12), [#allocation4], 3072  }
  0x44   : > { %4098 = vsyncadd (%p4268_p12), [#allocation4], 4294964224 }
  0x45   : > { %4100 = dma.done.wait (%p4268_p12), [#allocation7], 10240  }
  0x46   : > { %4102 = vsyncadd (%p4268_p12), [#allocation7], 4294957056  ;;  %s300_s18 = sand.u32 1, %s4113_s22   ;;  %p303_p0 = scmp.lt.s32.totalorder %s4125_s25, 1 }
  0x47   : > { %s3592_s15 = sshll.u32 %s300_s18, 7  ;;  %p3595_p10 = scmp.ne.s32.totalorder %s4121_s24, 0 }
  0x48   : > { %s304_s30 = scalar_select %p303_p0, %s4125_s25, 1 }
  0x49   : > { %s4335_s13 = scalar_lea.vmem [#allocation9], %s3592_s15  ;;  %311 = sbr.rel (%p3595_p10) target bundleno = 343 (0x157), region = 60 }
  0x4a   : > { %s3720_s9 = sshll.u32 %s304_s30, 6 }
  0x4b   : > { %s4333_s10 = scalar_lea.vmem %s5732_s0, %s3720_s9 }
  0x4e   : > { %v374_v0 = vld [vmem:[#allocation3 + $0xb0] sm:$0xff]  ;;  %v373_v1 = vld [vmem:[#allocation3 + $0xa8] sm:$0xff]  ;;  %v371_v2 = vld [vmem:[#allocation3 + $0x98] sm:$0xff]  ;;  %v4146_v24 = vmov 0.0   ;;  %vm376_vm0 = vcmask 523264   ;;  %vm758_vm1 = vcmask 277504  }
  0x4f   : > { %444 = vmatprep.subr.mxu0 %v374_v0  ;;  %3791 = vmatprep.subr.mxu1 %v374_v0  ;;  %v370_v3 = vld [vmem:[#allocation3 + $0x90] sm:$0xff]  ;;  %v368_v4 = vld [vmem:[#allocation3 + $0x80] sm:$0xff]  ;;  %v367_v5 = vld [vmem:[#allocation3 + $0x78] sm:$0xff] }
  0x50   : > { %445 = vmatpush1.msra.mxu0 %v373_v1  ;;  %3799 = vmatpush1.msra.mxu1 %v373_v1  ;;  %v365_v6 = vld [vmem:[#allocation3 + $0x68] sm:$0xff]  ;;  %v364_v7 = vld [vmem:[#allocation3 + $0x60] sm:$0xff]  ;;  %v362_v8 = vld [vmem:[#allocation3 + $0x50] sm:$0xff] }
  0x51   : > { %446 = vmatprep.subr.mxu0 %v371_v2  ;;  %3792 = vmatprep.subr.mxu1 %v371_v2  ;;  %v361_v9 = vld [vmem:[#allocation3 + $0x48] sm:$0xff]  ;;  %v359_v10 = vld [vmem:[#allocation3 + $0x38] sm:$0xff]  ;;  %v318_v11 = vld [vmem:[%s4333_s10 + $0x30] sm:$0xff] }
  0x52   : > { %447 = vmatpush1.msra.mxu0 %v370_v3  ;;  %3800 = vmatpush1.msra.mxu1 %v370_v3  ;;  %v319_v12 = vld [vmem:[%s4333_s10 + $0x38] sm:$0xff]  ;;  %v358_v13 = vld [vmem:[#allocation3 + $0x30] sm:$0xff]  ;;  %v356_v14 = vld [vmem:[#allocation3 + $0x20] sm:$0xff]  ;;  %v4341_v17 = vmul.f32 0.75, %v318_v11  ;;  %v4348_v27 = vmul.f32 0.25, %v318_v11 }
  0x53   : > { %448 = vmatprep.subr.mxu0 %v368_v4  ;;  %3793 = vmatprep.subr.mxu1 %v368_v4  ;;  %v312_v15 = vld [vmem:[%s4333_s10] sm:$0xff]  ;;  %v355_v16 = vld [vmem:[#allocation3 + $0x18] sm:$0xff]  ;;  %v343_v18 = vmul.f32 0.25, %v319_v12  ;;  %v353_v19 = vld [vmem:[#allocation3 + $0x8] sm:$0xff]  ;;  %v334_v28 = vmul.f32 0.75, %v319_v12 }
  0x54   : > { %449 = vmatpush1.msra.mxu0 %v367_v5  ;;  %3801 = vmatpush1.msra.mxu1 %v367_v5  ;;  %v352_v20 = vld [vmem:[#allocation3] sm:$0xff]  ;;  %v320_v21 = vmul.f32 0.25, %v312_v15  ;;  %v327_v22 = vmul.f32 0.75, %v312_v15  ;;  %v313_v23 = vld [vmem:[%s4333_s10 + $0x8] sm:$0xff]  ;;  %v369_v33 = vld [vmem:[#allocation3 + $0x88] sm:$0xff] }
  0x55   : > { %450 = vmatprep.subr.mxu0 %v365_v6  ;;  %3794 = vmatprep.subr.mxu1 %v365_v6  ;;  %v4346_v25 = vadd.f32 %v343_v18, %v4341_v17  ;;  %v375_v26 = vld [vmem:[#allocation3 + $0xb8] sm:$0xff]  ;;  %v321_v30 = vmul.f32 0.25, %v313_v23  ;;  %v372_v31 = vld [vmem:[#allocation3 + $0xa0] sm:$0xff]  ;;  %v4356_v32 = vadd.f32 %v334_v28, %v4348_v27  ;;  %v328_v35 = vmul.f32 0.75, %v313_v23  ;;  %v366_v36 = vld [vmem:[#allocation3 + $0x70] sm:$0xff] }
  0x56   : > { %451 = vmatpush1.msra.mxu0 %v364_v7  ;;  %3802 = vmatpush1.msra.mxu1 %v364_v7  ;;  %v335_v29 = vadd.f32 %v327_v22, %v320_v21  ;;  %v314_v37 = vld [vmem:[%s4333_s10 + $0x10] sm:$0xff]  ;;  %v4364_v38 = vadd.f32 %v343_v18, %v334_v28  ;;  %v363_v39 = vld [vmem:[#allocation3 + $0x58] sm:$0xff]  ;;  %v357_v43 = vld [vmem:[#allocation3 + $0x28] sm:$0xff] }
  0x57   : > { %452 = vmatprep.subr.mxu0 %v362_v8  ;;  %3795 = vmatprep.subr.mxu1 %v362_v8  ;;  %v344_v34 = vadd.f32 %v327_v22, %v321_v30  ;;  %v336_v40 = vadd.f32 %v328_v35, %v320_v21  ;;  %v322_v41 = vmul.f32 0.25, %v314_v37  ;;  %v360_v42 = vld [vmem:[#allocation3 + $0x40] sm:$0xff]  ;;  %v329_v45 = vmul.f32 0.75, %v314_v37  ;;  %v354_v46 = vld [vmem:[#allocation3 + $0x10] sm:$0xff]  ;;  %v315_v47 = vld [vmem:[%s4333_s10 + $0x18] sm:$0xff] }
  0x58   : > { %453 = vmatpush1.msra.mxu0 %v361_v9  ;;  %3803 = vmatpush1.msra.mxu1 %v361_v9  ;;  %v323_v49 = vmul.f32 0.25, %v315_v47  ;;  %v330_v51 = vmul.f32 0.75, %v315_v47  ;;  %v316_v52 = vld [vmem:[%s4333_s10 + $0x20] sm:$0xff]  ;;  %v317_v55 = vld [vmem:[%s4333_s10 + $0x28] sm:$0xff] }
  0x59   : > { %454 = vmatprep.subr.mxu0 %v359_v10  ;;  %3796 = vmatprep.subr.mxu1 %v359_v10  ;;  %v345_v44 = vadd.f32 %v328_v35, %v322_v41  ;;  %v337_v48 = vadd.f32 %v329_v45, %v321_v30  ;;  %v324_v53 = vmul.f32 0.25, %v316_v52  ;;  %v331_v56 = vmul.f32 0.75, %v316_v52 }
  0x5a   : > { %455 = vmatpush1.msra.mxu0 %v358_v13  ;;  %3804 = vmatpush1.msra.mxu1 %v358_v13  ;;  %v346_v50 = vadd.f32 %v329_v45, %v323_v49  ;;  %v338_v54 = vadd.f32 %v330_v51, %v322_v41  ;;  %v325_v58 = vmul.f32 0.25, %v317_v55  ;;  %v332_v60 = vmul.f32 0.75, %v317_v55 }
  0x5b   : > { %456 = vmatprep.subr.mxu0 %v356_v14  ;;  %3797 = vmatprep.subr.mxu1 %v356_v14  ;;  %v347_v57 = vadd.f32 %v330_v51, %v324_v53  ;;  %v339_v59 = vadd.f32 %v331_v56, %v323_v49 }
  0x5c   : > { %457 = vmatpush1.msra.mxu0 %v355_v16  ;;  %3805 = vmatpush1.msra.mxu1 %v355_v16  ;;  %v348_v61 = vadd.f32 %v331_v56, %v325_v58  ;;  %v340_v62 = vadd.f32 %v332_v60, %v324_v53  ;;  %v349_v63 = vadd.f32 %v332_v60, %v4348_v27 }
  0x5d   : > { %458 = vmatprep.subr.mxu0 %v353_v19  ;;  %492 = vmatprep.mubr.f32.mxu0 %v4146_v24  ;;  %v341_v0 = vadd.f32 %v4341_v17, %v325_v58 }
  0x5e   : > { %459 = vmatpush1.msra.mxu0 %v352_v20  ;;  %3798 = vmatprep.subr.mxu1 %v353_v19 }
  0x5f   : > { %493 = vmatmul.mubr.f32.vlgmr.msra.gmra.mxu0 %v4146_v24  ;;  %3806 = vmatpush1.msra.mxu1 %v352_v20 }
  0x60   : > { %576 = vmatprep.mubr.f32.mxu1 %v4146_v24  ;;  %3748 = vmatprep.subr.mxu1 %v375_v26 }
  0x61   : > { %3609 = vmatmul.mubr.msk.f32.vlgmr.msra.gmra.mxu1 %vm376_vm0, %v4346_v25  ;;  %498 = vmatprep.mubr.f32.mxu0 %v4146_v24 }
  0x62   : > { %3749 = vmatpush3.msra.mxu1 %v375_v26  ;;  %582 = vmatprep.mubr.f32.mxu1 %v4146_v24 }
  0x63   : > { %3596 = vmatmul.mubr.msk.f32.gmra.mxu0 %vm376_vm0, %v335_v29  ;;  %3750 = vmatprep.subr.mxu1 %v372_v31 }
  0x64   : > { %3751 = vmatpush3.msra.mxu1 %v372_v31  ;;  %504 = vmatprep.mubr.f32.mxu0 %v4146_v24 }
  0x65   : > { %3610 = vmatmul.mubr.msk.f32.gmra.mxu1 %vm376_vm0, %v4356_v32  ;;  %3752 = vmatprep.subr.mxu1 %v369_v33 }
  0x66   : > { %3753 = vmatpush3.msra.mxu1 %v369_v33  ;;  %588 = vmatprep.mubr.f32.mxu1 %v4146_v24 }
  0x67   : > { %3597 = vmatmul.mubr.msk.f32.gmra.mxu0 %vm376_vm0, %v344_v34  ;;  %3754 = vmatprep.subr.mxu1 %v366_v36 }
  0x68   : > { %3755 = vmatpush3.msra.mxu1 %v366_v36  ;;  %510 = vmatprep.mubr.f32.mxu0 %v4146_v24 }
  0x69   : > { %3611 = vmatmul.mubr.msk.f32.gmra.mxu1 %vm376_vm0, %v4364_v38  ;;  %3756 = vmatprep.subr.mxu1 %v363_v39 }
  0x6a   : > { %3757 = vmatpush3.msra.mxu1 %v363_v39  ;;  %594 = vmatprep.mubr.f32.mxu1 %v4146_v24 }
  0x6b   : > { %3598 = vmatmul.mubr.msk.f32.gmra.mxu0 %vm376_vm0, %v336_v40  ;;  %3758 = vmatprep.subr.mxu1 %v360_v42 }
  0x6c   : > { %3759 = vmatpush3.msra.mxu1 %v360_v42  ;;  %516 = vmatprep.mubr.f32.mxu0 %v4146_v24 }
  0x6d   : > { %595 = vmatmul.mubr.f32.gmra.mxu1 %v4146_v24  ;;  %3760 = vmatprep.subr.mxu1 %v357_v43 }
  0x6e   : > { %3761 = vmatpush3.msra.mxu1 %v357_v43  ;;  %3764 = vmatprep.mubr.f32.mxu1 %v4146_v24 }
  0x6f   : > { %3599 = vmatmul.mubr.msk.f32.gmra.mxu0 %vm376_vm0, %v345_v44  ;;  %3762 = vmatprep.subr.mxu1 %v354_v46 }
  0x70   : > { %3763 = vmatpush3.msra.mxu1 %v354_v46  ;;  %522 = vmatprep.mubr.f32.mxu0 %v4146_v24 }
  0x71   : > { %3765 = vmatmul.mubr.msk.f32.vlgmr.msra.gmra.mxu1 %vm376_vm0, %v335_v29 }
  0x72   : > { %3767 = vmatprep.mubr.msk.f32.mxu1 %vm376_vm0, %v344_v34 }
  0x73   : > { %3600 = vmatmul.mubr.msk.f32.gmra.mxu0 %vm376_vm0, %v337_v48 }
  0x74   : > { %528 = vmatprep.mubr.f32.mxu0 %v4146_v24 }
  0x75   : > { %3768 = vmatmul.mubr.msk.f32.gmra.mxu1 %vm376_vm0, %v336_v40 }
  0x76   : > { %3770 = vmatprep.mubr.msk.f32.mxu1 %vm376_vm0, %v345_v44 }
  0x77   : > { %3601 = vmatmul.mubr.msk.f32.gmra.mxu0 %vm376_vm0, %v346_v50 }
  0x78   : > { %534 = vmatprep.mubr.f32.mxu0 %v4146_v24 }
  0x79   : > { %3771 = vmatmul.mubr.msk.f32.gmra.mxu1 %vm376_vm0, %v337_v48 }
  0x7a   : > { %3773 = vmatprep.mubr.msk.f32.mxu1 %vm376_vm0, %v346_v50 }
  0x7b   : > { %3602 = vmatmul.mubr.msk.f32.gmra.mxu0 %vm376_vm0, %v338_v54 }
  0x7c   : > { %540 = vmatprep.mubr.f32.mxu0 %v4146_v24 }
  0x7d   : > { %3774 = vmatmul.mubr.msk.f32.gmra.mxu1 %vm376_vm0, %v338_v54 }
  0x7e   : > { %3776 = vmatprep.mubr.msk.f32.mxu1 %vm376_vm0, %v347_v57 }
  0x7f   : > { %3603 = vmatmul.mubr.msk.f32.gmra.mxu0 %vm376_vm0, %v347_v57 }
  0x80   : > { %546 = vmatprep.mubr.f32.mxu0 %v4146_v24 }
  0x81   : > { %3777 = vmatmul.mubr.msk.f32.gmra.mxu1 %vm376_vm0, %v339_v59 }
  0x82   : > { %3779 = vmatprep.mubr.msk.f32.mxu1 %vm376_vm0, %v348_v61 }
  0x83   : > { %3604 = vmatmul.mubr.msk.f32.gmra.mxu0 %vm376_vm0, %v339_v59 }
  0x84   : > { %552 = vmatprep.mubr.f32.mxu0 %v4146_v24 }
  0x85   : > { %3780 = vmatmul.mubr.msk.f32.gmra.mxu1 %vm376_vm0, %v340_v62 }
  0x86   : > { %3782 = vmatprep.mubr.msk.f32.mxu1 %vm376_vm0, %v349_v63 }
  0x87   : > { %3605 = vmatmul.mubr.msk.f32.gmra.mxu0 %vm376_vm0, %v348_v61 }
  0x88   : > { %558 = vmatprep.mubr.f32.mxu0 %v4146_v24 }
  0x89   : > { %3783 = vmatmul.mubr.msk.f32.gmra.mxu1 %vm376_vm0, %v341_v0 }
  0x8a   : > { %3785 = vmatprep.mubr.msk.f32.mxu1 %vm376_vm0, %v4346_v25 }
  0x8b   : > { %3606 = vmatmul.mubr.msk.f32.gmra.mxu0 %vm376_vm0, %v340_v62 }
  0x8c   : > { %564 = vmatprep.mubr.f32.mxu0 %v4146_v24 }
  0x8d   : > { %3786 = vmatmul.mubr.msk.f32.gmra.mxu1 %vm376_vm0, %v4356_v32 }
  0x8e   : > { %3788 = vmatprep.mubr.msk.f32.mxu1 %vm376_vm0, %v4364_v38 }
  0x8f   : > { %3607 = vmatmul.mubr.msk.f32.gmra.mxu0 %vm376_vm0, %v349_v63 }
  0x90   : > { %570 = vmatprep.mubr.f32.mxu0 %v4146_v24 }
  0x91   : > { %3789 = vmatmul.mubr.f32.gmra.mxu1 %v4146_v24 }
  0x93   : > { %3608 = vmatmul.mubr.msk.f32.gmra.mxu0 %vm376_vm0, %v341_v0 }
 0x11f   : > { %v494_v1 = vpop.f32.mrf.mxu0 }
 0x120   : > { %756 = vst [vmem:[#allocation2] sm:$0xff] %v494_v1 }
 0x121   : > { %v496_v2 = vpop.f32.mrf.mxu0  ;;  %v578_v3 = vpop.f32.mrf.mxu1 }
 0x122   : > { %757 = vst [vmem:[#allocation2 + $0x8] sm:$0xff] %v496_v2  ;;  %799 = vst [vmem:[#allocation2 + $0x150] sm:$0xff] %v578_v3 }
 0x123   : > { %v500_v4 = vpop.f32.mrf.mxu0  ;;  %v580_v5 = vpop.f32.mrf.mxu1 }
 0x124   : > { %760 = vst [vmem:[#allocation2 + $0x18] sm:$0xff] %v500_v4  ;;  %800 = vst [vmem:[#allocation2 + $0x158] sm:$0xff] %v580_v5 }
 0x125   : > { %v502_v6 = vpop.f32.mrf.mxu0  ;;  %v584_v7 = vpop.f32.mrf.mxu1 }
 0x126   : > { %761 = vst [vmem:[#allocation2 + $0x20] sm:$0xff] %v502_v6  ;;  %802 = vst [vmem:[#allocation2 + $0x168] sm:$0xff] %v584_v7 }
 0x127   : > { %v506_v8 = vpop.f32.mrf.mxu0  ;;  %v586_v9 = vpop.f32.mrf.mxu1 }
 0x128   : > { %763 = vst [vmem:[#allocation2 + $0x30] sm:$0xff] %v506_v8  ;;  %803 = vst [vmem:[#allocation2 + $0x170] sm:$0xff] %v586_v9 }
 0x129   : > { %v508_v10 = vpop.f32.mrf.mxu0  ;;  %v590_v11 = vpop.f32.mrf.mxu1 }
 0x12a   : > { %764 = vst [vmem:[#allocation2 + $0x38] sm:$0xff] %v508_v10  ;;  %805 = vst [vmem:[#allocation2 + $0x180] sm:$0xff] %v590_v11 }
 0x12b   : > { %v512_v12 = vpop.f32.mrf.mxu0  ;;  %v592_v13 = vpop.f32.mrf.mxu1 }
 0x12c   : > { %766 = vst [vmem:[#allocation2 + $0x48] sm:$0xff] %v512_v12  ;;  %806 = vst [vmem:[#allocation2 + $0x188] sm:$0xff] %v592_v13 }
 0x12d   : > { %v514_v14 = vpop.f32.mrf.mxu0  ;;  %v596_v15 = vpop.f32.mrf.mxu1 }
 0x12e   : > { %767 = vst [vmem:[#allocation2 + $0x50] sm:$0xff] %v514_v14  ;;  %808 = vst [vmem:[#allocation2 + $0x198] sm:$0xff] %v596_v15 }
 0x12f   : > { %v518_v16 = vpop.f32.mrf.mxu0  ;;  %v598_v17 = vpop.f32.mrf.mxu1 }
 0x130   : > { %769 = vst [vmem:[#allocation2 + $0x60] sm:$0xff] %v518_v16  ;;  %809 = vst [vmem:[#allocation2 + $0x1a0] sm:$0xff] %v598_v17 }
 0x131   : > { %v520_v18 = vpop.f32.mrf.mxu0  ;;  %v3766_v19 = vpop.f32.mrf.mxu1 }
 0x132   : > { %770 = vst [vmem:[#allocation2 + $0x68] sm:$0xff] %v520_v18  ;;  %762 = vst.msk [vmem:[#allocation2 + $0x28] sm:$0xff] %vm758_vm1, %v3766_v19 }
 0x133   : > { %v524_v20 = vpop.f32.mrf.mxu0  ;;  %v667_v21 = vpop.f32.mrf.mxu1 }
 0x134   : > { %772 = vst [vmem:[#allocation2 + $0x78] sm:$0xff] %v524_v20  ;;  %759 = vst.msk [vmem:[#allocation2 + $0x10] sm:$0xff] %vm758_vm1, %v667_v21 }
 0x135   : > { %v526_v22 = vpop.f32.mrf.mxu0  ;;  %v3769_v23 = vpop.f32.mrf.mxu1 }
 0x136   : > { %773 = vst [vmem:[#allocation2 + $0x80] sm:$0xff] %v526_v22  ;;  %768 = vst.msk [vmem:[#allocation2 + $0x58] sm:$0xff] %vm758_vm1, %v3769_v23 }
 0x137   : > { %v530_v24 = vpop.f32.mrf.mxu0  ;;  %v677_v25 = vpop.f32.mrf.mxu1 }
 0x138   : > { %775 = vst [vmem:[#allocation2 + $0x90] sm:$0xff] %v530_v24  ;;  %765 = vst.msk [vmem:[#allocation2 + $0x40] sm:$0xff] %vm758_vm1, %v677_v25 }
 0x139   : > { %v532_v26 = vpop.f32.mrf.mxu0  ;;  %v3772_v27 = vpop.f32.mrf.mxu1 }
 0x13a   : > { %776 = vst [vmem:[#allocation2 + $0x98] sm:$0xff] %v532_v26  ;;  %774 = vst.msk [vmem:[#allocation2 + $0x88] sm:$0xff] %vm758_vm1, %v3772_v27 }
 0x13b   : > { %v536_v28 = vpop.f32.mrf.mxu0  ;;  %v687_v29 = vpop.f32.mrf.mxu1 }
 0x13c   : > { %778 = vst [vmem:[#allocation2 + $0xa8] sm:$0xff] %v536_v28  ;;  %771 = vst.msk [vmem:[#allocation2 + $0x70] sm:$0xff] %vm758_vm1, %v687_v29 }
 0x13d   : > { %v538_v30 = vpop.f32.mrf.mxu0  ;;  %v3775_v31 = vpop.f32.mrf.mxu1 }
 0x13e   : > { %779 = vst [vmem:[#allocation2 + $0xb0] sm:$0xff] %v538_v30  ;;  %780 = vst.msk [vmem:[#allocation2 + $0xb8] sm:$0xff] %vm758_vm1, %v3775_v31 }
 0x13f   : > { %v542_v32 = vpop.f32.mrf.mxu0  ;;  %v697_v33 = vpop.f32.mrf.mxu1 }
 0x140   : > { %781 = vst [vmem:[#allocation2 + $0xc0] sm:$0xff] %v542_v32  ;;  %777 = vst.msk [vmem:[#allocation2 + $0xa0] sm:$0xff] %vm758_vm1, %v697_v33 }
 0x141   : > { %v544_v34 = vpop.f32.mrf.mxu0  ;;  %v3778_v35 = vpop.f32.mrf.mxu1 }
 0x142   : > { %782 = vst [vmem:[#allocation2 + $0xc8] sm:$0xff] %v544_v34  ;;  %786 = vst.msk [vmem:[#allocation2 + $0xe8] sm:$0xff] %vm758_vm1, %v3778_v35 }
 0x143   : > { %v548_v36 = vpop.f32.mrf.mxu0  ;;  %v707_v37 = vpop.f32.mrf.mxu1 }
 0x144   : > { %784 = vst [vmem:[#allocation2 + $0xd8] sm:$0xff] %v548_v36  ;;  %783 = vst.msk [vmem:[#allocation2 + $0xd0] sm:$0xff] %vm758_vm1, %v707_v37 }
 0x145   : > { %v550_v38 = vpop.f32.mrf.mxu0  ;;  %v3781_v39 = vpop.f32.mrf.mxu1 }
 0x146   : > { %785 = vst [vmem:[#allocation2 + $0xe0] sm:$0xff] %v550_v38  ;;  %792 = vst.msk [vmem:[#allocation2 + $0x118] sm:$0xff] %vm758_vm1, %v3781_v39 }
 0x147   : > { %v554_v40 = vpop.f32.mrf.mxu0  ;;  %v717_v41 = vpop.f32.mrf.mxu1 }
 0x148   : > { %787 = vst [vmem:[#allocation2 + $0xf0] sm:$0xff] %v554_v40  ;;  %789 = vst.msk [vmem:[#allocation2 + $0x100] sm:$0xff] %vm758_vm1, %v717_v41 }
 0x149   : > { %v556_v42 = vpop.f32.mrf.mxu0  ;;  %v3784_v43 = vpop.f32.mrf.mxu1 }
 0x14a   : > { %788 = vst [vmem:[#allocation2 + $0xf8] sm:$0xff] %v556_v42  ;;  %798 = vst.msk [vmem:[#allocation2 + $0x148] sm:$0xff] %vm758_vm1, %v3784_v43 }
 0x14b   : > { %v560_v44 = vpop.f32.mrf.mxu0  ;;  %v727_v45 = vpop.f32.mrf.mxu1 }
 0x14c   : > { %790 = vst [vmem:[#allocation2 + $0x108] sm:$0xff] %v560_v44  ;;  %795 = vst.msk [vmem:[#allocation2 + $0x130] sm:$0xff] %vm758_vm1, %v727_v45 }
 0x14d   : > { %v562_v46 = vpop.f32.mrf.mxu0  ;;  %v3787_v47 = vpop.f32.mrf.mxu1 }
 0x14e   : > { %791 = vst [vmem:[#allocation2 + $0x110] sm:$0xff] %v562_v46  ;;  %804 = vst.msk [vmem:[#allocation2 + $0x178] sm:$0xff] %vm758_vm1, %v3787_v47 }
 0x14f   : > { %v566_v48 = vpop.f32.mrf.mxu0  ;;  %v737_v49 = vpop.f32.mrf.mxu1 }
 0x150   : > { %793 = vst [vmem:[#allocation2 + $0x120] sm:$0xff] %v566_v48  ;;  %801 = vst.msk [vmem:[#allocation2 + $0x160] sm:$0xff] %vm758_vm1, %v737_v49 }
 0x151   : > { %v568_v50 = vpop.f32.mrf.mxu0  ;;  %v3790_v51 = vpop.f32.mrf.mxu1 }
 0x152   : > { %794 = vst [vmem:[#allocation2 + $0x128] sm:$0xff] %v568_v50  ;;  %810 = vst.msk [vmem:[#allocation2 + $0x1a8] sm:$0xff] %vm758_vm1, %v3790_v51 }
 0x153   : > { %v572_v52 = vpop.f32.mrf.mxu0  ;;  %v747_v53 = vpop.f32.mrf.mxu1 }
 0x154   : > { %796 = vst [vmem:[#allocation2 + $0x138] sm:$0xff] %v572_v52  ;;  %807 = vst.msk [vmem:[#allocation2 + $0x190] sm:$0xff] %vm758_vm1, %v747_v53 }
 0x155   : > { %v574_v54 = vpop.f32.mrf.mxu0 }
 0x156   : > { %797 = vst [vmem:[#allocation2 + $0x140] sm:$0xff] %v574_v54 }
 0x157 PF: > { %s3628_s16 = sshll.u32 %s4121_s24, 6  ;;  %s4147_s19 = smov 112   ;;  %v5742_v21 = vmov 0.0   ;;  %vm1034_vm2 = vcmask 654336   ;;  %v886_v22 = vld [vmem:[#allocation6] sm:$0xff]  ;;  %vm993_vm3 = vcmask 916480  }
 0x158   : > { %s812_s14 = sshra.s32 %s3628_s16, 3  ;;  %1123 = vmatprep.mubr.f32.mxu0 %v5742_v21  ;;  %1260 = vmatprep.mubr.f32.mxu1 %v5742_v21  ;;  %s4149_s15 = smov 96   ;;  %vm1378_vm4 = vcmask 785408   ;;  %vm1682_vm5 = vcmask 908288   ;;  %vm1920_vm6 = vcmask 1039360   ;;  %vm2167_vm7 = vcmask 777216  }
 0x159   : > { %s3721_s8 = smul.u32 24, %s812_s14  ;;  %s4150_s30 = smov 111   ;;  %vm2455_vm8 = vcmask 900096   ;;  %vm2693_vm9 = vcmask 1031168   ;;  %vm2940_vm10 = vcmask 769024   ;;  %vm3302_vm15 = vcmask 523264  }
 0x15a   : > { %s4151_s9 = smov 127   ;;  %s4152_s29 = smov 95  }
 0x15b   : > { %s4439_s7 = scalar_lea.vmem [#allocation2], %s3721_s8  ;;  %s4153_s20 = smov 110  }
 0x15c   : > { %s4154_s10 = smov 126   ;;  %s4155_s16 = smov 94  }
 0x15d   : > { %v4442_v55 = vld [vmem:[%s4439_s7 + $0xe0] sm:$0xff]  ;;  %v4445_v56 = vld [vmem:[%s4439_s7 + $0xd8] sm:$0xff]  ;;  %v4452_v57 = vld [vmem:[%s4439_s7 + $0xe8] sm:$0xff]  ;;  %s3716_s14 = sshll.u32 %s4125_s25, 5 }
 0x15e   : > { %989 = vrot.lane.b32.xlu0 %v4442_v55, %s4147_s19  ;;  %987 = vrot.lane.b32.xlu1 %v4445_v56, %s4147_s19  ;;  %v4455_v58 = vld [vmem:[%s4439_s7 + $0xc8] sm:$0xff]  ;;  %v4465_v59 = vld [vmem:[%s4439_s7 + $0xc0] sm:$0xff] }
 0x15f   : > { %1208 = vmatprep.subr.mxu1 %v4442_v55  ;;  %v4468_v60 = vld [vmem:[%s4439_s7 + $0xd0] sm:$0xff]  ;;  %v4475_v62 = vld [vmem:[%s4439_s7 + $0xa8] sm:$0xff]  ;;  %v4484_v63 = vld [vmem:[%s4439_s7 + $0x98] sm:$0xff] }
 0x160   : > { %1209 = vmatpush1.msra.mxu1 %v4445_v56  ;;  %v4471_v61 = vld [vmem:[%s4439_s7 + $0xb0] sm:$0xff]  ;;  %v4487_v0 = vld [vmem:[%s4439_s7 + $0xb8] sm:$0xff]  ;;  %v4494_v2 = vld [vmem:[%s4439_s7 + $0x80] sm:$0xff] }
 0x161   : > { %1210 = vmatprep.subr.mxu1 %v4455_v58  ;;  %v4490_v1 = vld [vmem:[%s4439_s7 + $0x90] sm:$0xff]  ;;  %v4503_v3 = vld [vmem:[%s4439_s7 + $0x78] sm:$0xff]  ;;  %v4506_v4 = vld [vmem:[%s4439_s7 + $0x68] sm:$0xff] }
 0x162   : > { %991 = vrot.lane.b32.xlu0 %v4452_v57, %s4147_s19  ;;  %983 = vrot.lane.b32.xlu1 %v4455_v58, %s4147_s19  ;;  %v4510_v5 = vld [vmem:[%s4439_s7 + $0x60] sm:$0xff]  ;;  %v4519_v6 = vld [vmem:[%s4439_s7 + $0x50] sm:$0xff] }
 0x163   : > { %1211 = vmatpush1.msra.mxu1 %v4465_v59  ;;  %v4522_v7 = vld [vmem:[%s4439_s7 + $0xa0] sm:$0xff]  ;;  %v4525_v8 = vld [vmem:[%s4439_s7 + $0x48] sm:$0xff]  ;;  %v4529_v9 = vld [vmem:[%s4439_s7 + $0x38] sm:$0xff] }
 0x164   : > { %1212 = vmatprep.subr.mxu1 %v4471_v61  ;;  %v4538_v10 = vld [vmem:[%s4439_s7 + $0x30] sm:$0xff]  ;;  %v4541_v11 = vld [vmem:[%s4439_s7 + $0x88] sm:$0xff]  ;;  %v4544_v12 = vld [vmem:[%s4439_s7 + $0x20] sm:$0xff] }
 0x165   : > { %1213 = vmatpush1.msra.mxu1 %v4475_v62  ;;  %v4548_v13 = vld [vmem:[%s4439_s7 + $0x18] sm:$0xff]  ;;  %v4557_v14 = vld [vmem:[%s4439_s7 + $0x8] sm:$0xff]  ;;  %v4560_v15 = vld [vmem:[%s4439_s7] sm:$0xff] }
 0x166   : > { %985 = vrot.lane.b32.xlu0 %v4468_v60, %s4147_s19  ;;  %981 = vrot.lane.b32.xlu1 %v4465_v59, %s4147_s19  ;;  %v4569_v16 = vld [vmem:[%s4439_s7 + $0x70] sm:$0xff]  ;;  %v4576_v17 = vld [vmem:[%s4439_s7 + $0x58] sm:$0xff] }
 0x167   : > { %1214 = vmatprep.subr.mxu1 %v4484_v63  ;;  %v4587_v18 = vld [vmem:[%s4439_s7 + $0x40] sm:$0xff]  ;;  %v4594_v19 = vld [vmem:[%s4439_s7 + $0x28] sm:$0xff]  ;;  %v4605_v20 = vld [vmem:[%s4439_s7 + $0x10] sm:$0xff] }
 0x168   : > { %1215 = vmatpush1.msra.mxu1 %v4490_v1 }
 0x169   : > { %1216 = vmatprep.subr.mxu1 %v4494_v2 }
 0x16a   : > { %979 = vrot.lane.b32.xlu1 %v4487_v0, %s4147_s19  ;;  %977 = vrot.lane.b32.xlu0 %v4471_v61, %s4147_s19 }
 0x16b   : > { %1217 = vmatpush1.msra.mxu1 %v4503_v3 }
 0x16c   : > { %1218 = vmatprep.subr.mxu1 %v4506_v4 }
 0x16d   : > { %1219 = vmatpush1.msra.mxu1 %v4510_v5 }
 0x16e   : > { %975 = vrot.lane.b32.xlu0 %v4475_v62, %s4147_s19  ;;  %971 = vrot.lane.b32.xlu1 %v4484_v63, %s4147_s19 }
 0x16f   : > { %1220 = vmatprep.subr.mxu1 %v4519_v6 }
 0x170   : > { %1221 = vmatpush1.msra.mxu1 %v4525_v8 }
 0x171   : > { %1222 = vmatprep.subr.mxu1 %v4529_v9 }
 0x172   : > { %973 = vrot.lane.b32.xlu0 %v4522_v7, %s4147_s19  ;;  %969 = vrot.lane.b32.xlu1 %v4490_v1, %s4147_s19 }
 0x173   : > { %1223 = vmatpush1.msra.mxu1 %v4538_v10 }
 0x174   : > { %1224 = vmatprep.subr.mxu1 %v4544_v12 }
 0x175   : > { %1225 = vmatpush1.msra.mxu1 %v4548_v13 }
 0x176   : > { %967 = vrot.lane.b32.xlu1 %v4541_v11, %s4147_s19  ;;  %965 = vrot.lane.b32.xlu0 %v4494_v2, %s4147_s19 }
 0x177   : > { %1226 = vmatprep.subr.mxu1 %v4557_v14 }
 0x178   : > { %1227 = vmatpush1.msra.mxu1 %v4560_v15 }
 0x179   : > { %3642 = vmatmul.mubr.msk.f32.vlgmr.msra.gmra.mxu1 %vm1034_vm2, %v886_v22 }
 0x17a   : > { %963 = vrot.lane.b32.xlu0 %v4503_v3, %s4147_s19  ;;  %959 = vrot.lane.b32.xlu1 %v4506_v4, %s4147_s19 }
 0x17b   : > { %1266 = vmatprep.mubr.f32.mxu1 %v5742_v21 }
 0x17e   : > { %961 = vrot.lane.b32.xlu0 %v4569_v16, %s4147_s19  ;;  %957 = vrot.lane.b32.xlu1 %v4510_v5, %s4147_s19 }
 0x182   : > { %955 = vrot.lane.b32.xlu1 %v4576_v17, %s4147_s19  ;;  %953 = vrot.lane.b32.xlu0 %v4519_v6, %s4147_s19 }
 0x186   : > { %951 = vrot.lane.b32.xlu0 %v4525_v8, %s4147_s19  ;;  %947 = vrot.lane.b32.xlu1 %v4529_v9, %s4147_s19 }
 0x18a   : > { %949 = vrot.lane.b32.xlu0 %v4587_v18, %s4147_s19  ;;  %945 = vrot.lane.b32.xlu1 %v4538_v10, %s4147_s19 }
 0x18e   : > { %943 = vrot.lane.b32.xlu1 %v4594_v19, %s4147_s19  ;;  %941 = vrot.lane.b32.xlu0 %v4544_v12, %s4147_s19 }
 0x192   : > { %939 = vrot.lane.b32.xlu0 %v4548_v13, %s4147_s19  ;;  %935 = vrot.lane.b32.xlu1 %v4557_v14, %s4147_s19 }
 0x196   : > { %937 = vrot.lane.b32.xlu0 %v4605_v20, %s4147_s19  ;;  %933 = vrot.lane.b32.xlu1 %v4560_v15, %s4147_s19 }
 0x19a   : > { %1374 = vrot.lane.b32.xlu0 %v4442_v55, %s4149_s15  ;;  %1376 = vrot.lane.b32.xlu1 %v4452_v57, %s4149_s15 }
 0x19e   : > { %1372 = vrot.lane.b32.xlu0 %v4445_v56, %s4149_s15  ;;  %1368 = vrot.lane.b32.xlu1 %v4455_v58, %s4149_s15 }
 0x1a2   : > { %1370 = vrot.lane.b32.xlu0 %v4468_v60, %s4149_s15  ;;  %1366 = vrot.lane.b32.xlu1 %v4465_v59, %s4149_s15 }
 0x1a6   : > { %1362 = vrot.lane.b32.xlu0 %v4471_v61, %s4149_s15  ;;  %1364 = vrot.lane.b32.xlu1 %v4487_v0, %s4149_s15 }
 0x1aa   : > { %1360 = vrot.lane.b32.xlu0 %v4475_v62, %s4149_s15  ;;  %1356 = vrot.lane.b32.xlu1 %v4484_v63, %s4149_s15 }
 0x1ae   : > { %1358 = vrot.lane.b32.xlu0 %v4522_v7, %s4149_s15  ;;  %1354 = vrot.lane.b32.xlu1 %v4490_v1, %s4149_s15 }
 0x1b2   : > { %1350 = vrot.lane.b32.xlu0 %v4494_v2, %s4149_s15  ;;  %1352 = vrot.lane.b32.xlu1 %v4541_v11, %s4149_s15 }
 0x1b6   : > { %1348 = vrot.lane.b32.xlu0 %v4503_v3, %s4149_s15  ;;  %1344 = vrot.lane.b32.xlu1 %v4506_v4, %s4149_s15 }
 0x1ba   : > { %1346 = vrot.lane.b32.xlu0 %v4569_v16, %s4149_s15  ;;  %1342 = vrot.lane.b32.xlu1 %v4510_v5, %s4149_s15 }
 0x1be   : > { %1338 = vrot.lane.b32.xlu0 %v4519_v6, %s4149_s15  ;;  %1340 = vrot.lane.b32.xlu1 %v4576_v17, %s4149_s15 }
 0x1c2   : > { %1336 = vrot.lane.b32.xlu0 %v4525_v8, %s4149_s15  ;;  %1332 = vrot.lane.b32.xlu1 %v4529_v9, %s4149_s15 }
 0x1c6   : > { %1334 = vrot.lane.b32.xlu0 %v4587_v18, %s4149_s15  ;;  %1330 = vrot.lane.b32.xlu1 %v4538_v10, %s4149_s15 }
 0x1ca   : > { %1326 = vrot.lane.b32.xlu0 %v4544_v12, %s4149_s15  ;;  %1328 = vrot.lane.b32.xlu1 %v4594_v19, %s4149_s15 }
 0x1ce   : > { %1324 = vrot.lane.b32.xlu0 %v4548_v13, %s4149_s15  ;;  %1320 = vrot.lane.b32.xlu1 %v4557_v14, %s4149_s15 }
 0x1d0   : > { %v990_v23 = vpop.permute.xlu0 %989  ;;  %v988_v24 = vpop.permute.xlu1 %987 }
 0x1d1   : > { %v1012_v28 = vsel %vm993_vm3, %v988_v24, %v990_v23 }
 0x1d2   : > { %1322 = vrot.lane.b32.xlu0 %v4605_v20, %s4149_s15  ;;  %1318 = vrot.lane.b32.xlu1 %v4560_v15, %s4149_s15 }
 0x1d4   : > { %v992_v25 = vpop.permute.xlu0 %991  ;;  %v984_v26 = vpop.permute.xlu1 %983 }
 0x1d5   : > { %v1013_v27 = vsel %vm993_vm3, %v990_v23, %v992_v25 }
 0x1d6   : > { %1071 = vmatprep.subr.mxu0 %v1013_v27  ;;  %1678 = vrot.lane.b32.xlu0 %v4442_v55, %s4150_s30 }
 0x1d7   : > { %1680 = vrot.lane.b32.xlu1 %v4452_v57, %s4150_s30  ;;  %1072 = vmatpush1.msra.mxu0 %v1012_v28 }
 0x1d8   : > { %v986_v29 = vpop.permute.xlu0 %985  ;;  %v982_v30 = vpop.permute.xlu1 %981 }
 0x1d9   : > { %v1011_v31 = vsel %vm993_vm3, %v984_v26, %v986_v29  ;;  %v1010_v32 = vsel %vm993_vm3, %v982_v30, %v984_v26 }
 0x1da   : > { %1073 = vmatprep.subr.mxu0 %v1011_v31  ;;  %1676 = vrot.lane.b32.xlu0 %v4445_v56, %s4150_s30 }
 0x1db   : > { %1672 = vrot.lane.b32.xlu1 %v4455_v58, %s4150_s30  ;;  %1074 = vmatpush1.msra.mxu0 %v1010_v32 }
 0x1dc   : > { %v980_v33 = vpop.permute.xlu1 %979  ;;  %v978_v34 = vpop.permute.xlu0 %977 }
 0x1dd   : > { %v1009_v35 = vsel %vm993_vm3, %v978_v34, %v980_v33 }
 0x1de   : > { %1075 = vmatprep.subr.mxu0 %v1009_v35  ;;  %1674 = vrot.lane.b32.xlu0 %v4468_v60, %s4150_s30 }
 0x1df   : > { %1916 = vrot.lane.b32.xlu1 %v4442_v55, %s4151_s9 }
 0x1e0   : > { %v976_v36 = vpop.permute.xlu0 %975  ;;  %v972_v37 = vpop.permute.xlu1 %971 }
 0x1e1   : > { %v1008_v38 = vsel %vm993_vm3, %v976_v36, %v978_v34 }
 0x1e2   : > { %1076 = vmatpush1.msra.mxu0 %v1008_v38  ;;  %1918 = vrot.lane.b32.xlu0 %v4452_v57, %s4151_s9 }
 0x1e3   : > { %1670 = vrot.lane.b32.xlu1 %v4465_v59, %s4150_s30 }
 0x1e4   : > { %v974_v39 = vpop.permute.xlu0 %973  ;;  %v970_v40 = vpop.permute.xlu1 %969 }
 0x1e5   : > { %v1007_v41 = vsel %vm993_vm3, %v972_v37, %v974_v39  ;;  %v1006_v42 = vsel %vm993_vm3, %v970_v40, %v972_v37  ;;  %v895_v40 = vld [vmem:[#allocation6 + $0xc0] sm:$0xff] }
 0x1e6   : > { %1077 = vmatprep.subr.mxu0 %v1007_v41  ;;  %1914 = vrot.lane.b32.xlu0 %v4445_v56, %s4151_s9 }
 0x1e7   : > { %1666 = vrot.lane.b32.xlu1 %v4471_v61, %s4150_s30  ;;  %1078 = vmatpush1.msra.mxu0 %v1006_v42 }
 0x1e8   : > { %v968_v43 = vpop.permute.xlu1 %967  ;;  %v966_v44 = vpop.permute.xlu0 %965 }
 0x1e9   : > { %v1005_v45 = vsel %vm993_vm3, %v966_v44, %v968_v43 }
 0x1ea   : > { %1079 = vmatprep.subr.mxu0 %v1005_v45  ;;  %1668 = vrot.lane.b32.xlu0 %v4487_v0, %s4150_s30 }
 0x1eb   : > { %1910 = vrot.lane.b32.xlu1 %v4455_v58, %s4151_s9 }
 0x1ec   : > { %v964_v46 = vpop.permute.xlu0 %963  ;;  %v960_v47 = vpop.permute.xlu1 %959 }
 0x1ed   : > { %v1004_v48 = vsel %vm993_vm3, %v964_v46, %v966_v44  ;;  %v896_v44 = vld [vmem:[#allocation6 + $0xc8] sm:$0xff] }
 0x1ee   : > { %1080 = vmatpush1.msra.mxu0 %v1004_v48  ;;  %1912 = vrot.lane.b32.xlu0 %v4468_v60, %s4151_s9  ;;  %v897_v48 = vld [vmem:[#allocation6 + $0xd0] sm:$0xff] }
 0x1ef   : > { %1664 = vrot.lane.b32.xlu1 %v4475_v62, %s4150_s30 }
 0x1f0   : > { %v962_v49 = vpop.permute.xlu0 %961  ;;  %v958_v50 = vpop.permute.xlu1 %957 }
 0x1f1   : > { %v1003_v51 = vsel %vm993_vm3, %v960_v47, %v962_v49  ;;  %v1002_v52 = vsel %vm993_vm3, %v958_v50, %v960_v47 }
 0x1f2   : > { %1081 = vmatprep.subr.mxu0 %v1003_v51  ;;  %1908 = vrot.lane.b32.xlu0 %v4465_v59, %s4151_s9 }
 0x1f3   : > { %1660 = vrot.lane.b32.xlu1 %v4484_v63, %s4150_s30  ;;  %1082 = vmatpush1.msra.mxu0 %v1002_v52 }
 0x1f4   : > { %v956_v53 = vpop.permute.xlu1 %955  ;;  %v954_v54 = vpop.permute.xlu0 %953 }
 0x1f5   : > { %v1001_v22 = vsel %vm993_vm3, %v954_v54, %v956_v53  ;;  %v898_v53 = vld [vmem:[#allocation6 + $0xd8] sm:$0xff] }
 0x1f6   : > { %1083 = vmatprep.subr.mxu0 %v1001_v22  ;;  %1662 = vrot.lane.b32.xlu0 %v4522_v7, %s4150_s30 }
 0x1f7   : > { %1904 = vrot.lane.b32.xlu1 %v4471_v61, %s4151_s9 }
 0x1f8   : > { %v952_v23 = vpop.permute.xlu0 %951  ;;  %v948_v24 = vpop.permute.xlu1 %947 }
 0x1f9   : > { %v1000_v25 = vsel %vm993_vm3, %v952_v23, %v954_v54 }
 0x1fa   : > { %1084 = vmatpush1.msra.mxu0 %v1000_v25  ;;  %1906 = vrot.lane.b32.xlu0 %v4487_v0, %s4151_s9 }
 0x1fb   : > { %1658 = vrot.lane.b32.xlu1 %v4490_v1, %s4150_s30 }
 0x1fc   : > { %v950_v26 = vpop.permute.xlu0 %949  ;;  %v946_v27 = vpop.permute.xlu1 %945 }
 0x1fd   : > { %v999_v28 = vsel %vm993_vm3, %v948_v24, %v950_v26  ;;  %v998_v29 = vsel %vm993_vm3, %v946_v27, %v948_v24  ;;  %v899_v24 = vld [vmem:[#allocation6 + $0xe0] sm:$0xff] }
 0x1fe   : > { %1085 = vmatprep.subr.mxu0 %v999_v28  ;;  %1902 = vrot.lane.b32.xlu0 %v4475_v62, %s4151_s9  ;;  %v900_v28 = vld [vmem:[#allocation6 + $0xe8] sm:$0xff] }
 0x1ff   : > { %1654 = vrot.lane.b32.xlu1 %v4494_v2, %s4150_s30  ;;  %1086 = vmatpush1.msra.mxu0 %v998_v29 }
 0x200   : > { %v944_v30 = vpop.permute.xlu1 %943  ;;  %v942_v31 = vpop.permute.xlu0 %941 }
 0x201   : > { %v997_v32 = vsel %vm993_vm3, %v942_v31, %v944_v30 }
 0x202   : > { %1087 = vmatprep.subr.mxu0 %v997_v32  ;;  %1656 = vrot.lane.b32.xlu0 %v4541_v11, %s4150_s30 }
 0x203   : > { %1898 = vrot.lane.b32.xlu1 %v4484_v63, %s4151_s9 }
 0x204   : > { %v940_v33 = vpop.permute.xlu0 %939  ;;  %v936_v34 = vpop.permute.xlu1 %935 }
 0x205   : > { %v996_v35 = vsel %vm993_vm3, %v940_v33, %v942_v31  ;;  %v901_v33 = vld [vmem:[#allocation6 + $0xf0] sm:$0xff] }
 0x206   : > { %1088 = vmatpush1.msra.mxu0 %v996_v35  ;;  %1900 = vrot.lane.b32.xlu0 %v4522_v7, %s4151_s9 }
 0x207   : > { %1652 = vrot.lane.b32.xlu1 %v4503_v3, %s4150_s30 }
 0x208   : > { %v938_v36 = vpop.permute.xlu0 %937  ;;  %v934_v37 = vpop.permute.xlu1 %933 }
 0x209   : > { %v995_v38 = vsel %vm993_vm3, %v936_v34, %v938_v36  ;;  %v994_v39 = vsel %vm993_vm3, %v934_v37, %v936_v34  ;;  %v902_v37 = vld [vmem:[#allocation6 + $0xf8] sm:$0xff] }
 0x20a   : > { %1896 = vrot.lane.b32.xlu0 %v4490_v1, %s4151_s9  ;;  %1089 = vmatprep.subr.mxu0 %v995_v38 }
 0x20b   : > { %1648 = vrot.lane.b32.xlu1 %v4506_v4, %s4150_s30  ;;  %1090 = vmatpush1.msra.mxu0 %v994_v39 }
 0x20c   : > { %v1375_v41 = vpop.permute.xlu0 %1374  ;;  %v1377_v42 = vpop.permute.xlu1 %1376  ;;  %3634 = vmatmul.mubr.msk.f32.vlgmr.msra.gmra.mxu0 %vm1034_vm2, %v895_v40 }
 0x20d   : > { %v1398_v43 = vsel %vm1378_vm4, %v1375_v41, %v1377_v42  ;;  %1129 = vmatprep.mubr.f32.mxu0 %v5742_v21 }
 0x20e   : > { %1650 = vrot.lane.b32.xlu0 %v4569_v16, %s4150_s30  ;;  %1455 = vmatprep.subr.mxu0 %v1398_v43 }
 0x20f   : > { %1892 = vrot.lane.b32.xlu1 %v4494_v2, %s4151_s9 }
 0x210   : > { %v1373_v45 = vpop.permute.xlu0 %1372  ;;  %v1369_v46 = vpop.permute.xlu1 %1368  ;;  %3635 = vmatmul.mubr.msk.f32.gmra.mxu0 %vm1034_vm2, %v896_v44 }
 0x211   : > { %v1397_v47 = vsel %vm1378_vm4, %v1373_v45, %v1375_v41  ;;  %1135 = vmatprep.mubr.f32.mxu0 %v5742_v21  ;;  %v887_v41 = vld [vmem:[#allocation6 + $0x8] sm:$0xff] }
 0x212   : > { %1894 = vrot.lane.b32.xlu0 %v4541_v11, %s4151_s9  ;;  %1456 = vmatpush1.msra.mxu0 %v1397_v47 }
 0x213   : > { %1646 = vrot.lane.b32.xlu1 %v4510_v5, %s4150_s30  ;;  %3643 = vmatmul.mubr.msk.f32.gmra.mxu1 %vm1034_vm2, %v887_v41 }
 0x214   : > { %v1371_v49 = vpop.permute.xlu0 %1370  ;;  %v1367_v50 = vpop.permute.xlu1 %1366  ;;  %3636 = vmatmul.mubr.msk.f32.gmra.mxu0 %vm1034_vm2, %v897_v48  ;;  %1272 = vmatprep.mubr.f32.mxu1 %v5742_v21 }
 0x215   : > { %v1395_v51 = vsel %vm1378_vm4, %v1367_v50, %v1369_v46  ;;  %v1396_v52 = vsel %vm1378_vm4, %v1369_v46, %v1371_v49  ;;  %1141 = vmatprep.mubr.f32.mxu0 %v5742_v21  ;;  %v888_v46 = vld [vmem:[#allocation6 + $0x10] sm:$0xff]  ;;  %v889_v50 = vld [vmem:[#allocation6 + $0x18] sm:$0xff] }
 0x216   : > { %1890 = vrot.lane.b32.xlu0 %v4503_v3, %s4151_s9  ;;  %1457 = vmatprep.subr.mxu0 %v1396_v52 }
 0x217   : > { %1642 = vrot.lane.b32.xlu1 %v4519_v6, %s4150_s30  ;;  %1458 = vmatpush1.msra.mxu0 %v1395_v51 }
 0x218   : > { %v1363_v54 = vpop.permute.xlu0 %1362  ;;  %v1365_v22 = vpop.permute.xlu1 %1364  ;;  %3637 = vmatmul.mubr.msk.f32.gmra.mxu0 %vm1034_vm2, %v898_v53  ;;  %3644 = vmatmul.mubr.msk.f32.gmra.mxu1 %vm1034_vm2, %v888_v46 }
 0x219   : > { %v1394_v23 = vsel %vm1378_vm4, %v1363_v54, %v1365_v22  ;;  %1147 = vmatprep.mubr.f32.mxu0 %v5742_v21  ;;  %1278 = vmatprep.mubr.f32.mxu1 %v5742_v21 }
 0x21a   : > { %1644 = vrot.lane.b32.xlu0 %v4576_v17, %s4150_s30  ;;  %1459 = vmatprep.subr.mxu0 %v1394_v23 }
 0x21b   : > { %1886 = vrot.lane.b32.xlu1 %v4506_v4, %s4151_s9 }
 0x21c   : > { %v1361_v25 = vpop.permute.xlu0 %1360  ;;  %v1357_v26 = vpop.permute.xlu1 %1356  ;;  %3638 = vmatmul.mubr.msk.f32.gmra.mxu0 %vm1034_vm2, %v899_v24  ;;  %3645 = vmatmul.mubr.msk.f32.gmra.mxu1 %vm1034_vm2, %v889_v50 }
 0x21d   : > { %v1393_v27 = vsel %vm1378_vm4, %v1361_v25, %v1363_v54  ;;  %1153 = vmatprep.mubr.f32.mxu0 %v5742_v21  ;;  %1284 = vmatprep.mubr.f32.mxu1 %v5742_v21  ;;  %v890_v54 = vld [vmem:[#allocation6 + $0x20] sm:$0xff] }
 0x21e   : > { %1888 = vrot.lane.b32.xlu0 %v4569_v16, %s4151_s9  ;;  %1460 = vmatpush1.msra.mxu0 %v1393_v27 }
 0x21f   : > { %1640 = vrot.lane.b32.xlu1 %v4525_v8, %s4150_s30 }
 0x220   : > { %v1359_v29 = vpop.permute.xlu0 %1358  ;;  %v1355_v30 = vpop.permute.xlu1 %1354  ;;  %3639 = vmatmul.mubr.msk.f32.gmra.mxu0 %vm1034_vm2, %v900_v28  ;;  %3646 = vmatmul.mubr.msk.f32.gmra.mxu1 %vm1034_vm2, %v890_v54 }
 0x221   : > { %v1391_v31 = vsel %vm1378_vm4, %v1355_v30, %v1357_v26  ;;  %v1392_v32 = vsel %vm1378_vm4, %v1357_v26, %v1359_v29  ;;  %1159 = vmatprep.mubr.f32.mxu0 %v5742_v21  ;;  %1290 = vmatprep.mubr.f32.mxu1 %v5742_v21  ;;  %v891_v26 = vld [vmem:[#allocation6 + $0x28] sm:$0xff]  ;;  %v892_v30 = vld [vmem:[#allocation6 + $0x30] sm:$0xff] }
 0x222   : > { %1884 = vrot.lane.b32.xlu0 %v4510_v5, %s4151_s9  ;;  %1461 = vmatprep.subr.mxu0 %v1392_v32 }
 0x223   : > { %1636 = vrot.lane.b32.xlu1 %v4529_v9, %s4150_s30  ;;  %1462 = vmatpush1.msra.mxu0 %v1391_v31 }
 0x224   : > { %v1351_v34 = vpop.permute.xlu0 %1350  ;;  %v1353_v35 = vpop.permute.xlu1 %1352  ;;  %3640 = vmatmul.mubr.msk.f32.gmra.mxu0 %vm1034_vm2, %v901_v33  ;;  %3647 = vmatmul.mubr.msk.f32.gmra.mxu1 %vm1034_vm2, %v891_v26 }
 0x225   : > { %v1390_v36 = vsel %vm1378_vm4, %v1351_v34, %v1353_v35  ;;  %1165 = vmatprep.mubr.f32.mxu0 %v5742_v21  ;;  %1296 = vmatprep.mubr.f32.mxu1 %v5742_v21 }
 0x226   : > { %1638 = vrot.lane.b32.xlu0 %v4587_v18, %s4150_s30  ;;  %1463 = vmatprep.subr.mxu0 %v1390_v36 }
 0x227   : > { %1880 = vrot.lane.b32.xlu1 %v4519_v6, %s4151_s9 }
 0x228   : > { %v1349_v38 = vpop.permute.xlu0 %1348  ;;  %v1345_v39 = vpop.permute.xlu1 %1344  ;;  %3641 = vmatmul.mubr.msk.f32.gmra.mxu0 %vm1034_vm2, %v902_v37  ;;  %3648 = vmatmul.mubr.msk.f32.gmra.mxu1 %vm1034_vm2, %v892_v30  ;;  %v1317_v30 = vld [vmem:[#allocation6 + $0x1b8] sm:$0xff] }
 0x229   : > { %v1389_v40 = vsel %vm1378_vm4, %v1349_v38, %v1351_v34  ;;  %1507 = vmatprep.mubr.f32.mxu0 %v5742_v21  ;;  %1302 = vmatprep.mubr.f32.mxu1 %v5742_v21  ;;  %v893_v34 = vld [vmem:[#allocation6 + $0x38] sm:$0xff] }
 0x22a   : > { %1882 = vrot.lane.b32.xlu0 %v4576_v17, %s4151_s9  ;;  %1464 = vmatpush1.msra.mxu0 %v1389_v40 }
 0x22b   : > { %1634 = vrot.lane.b32.xlu1 %v4538_v10, %s4150_s30 }
 0x22c   : > { %v1347_v42 = vpop.permute.xlu0 %1346  ;;  %v1343_v43 = vpop.permute.xlu1 %1342  ;;  %3649 = vmatmul.mubr.msk.f32.gmra.mxu1 %vm1034_vm2, %v893_v34 }
 0x22d   : > { %v1387_v44 = vsel %vm1378_vm4, %v1343_v43, %v1345_v39  ;;  %v1388_v45 = vsel %vm1378_vm4, %v1345_v39, %v1347_v42  ;;  %v1310_v39 = vld [vmem:[#allocation6 + $0x180] sm:$0xff]  ;;  %1811 = vmatprep.mubr.f32.mxu1 %v5742_v21  ;;  %v1311_v42 = vld [vmem:[#allocation6 + $0x188] sm:$0xff] }
 0x22e   : > { %1878 = vrot.lane.b32.xlu0 %v4525_v8, %s4151_s9  ;;  %1465 = vmatprep.subr.mxu0 %v1388_v45  ;;  %v1312_v45 = vld [vmem:[#allocation6 + $0x190] sm:$0xff] }
 0x22f   : > { %1630 = vrot.lane.b32.xlu1 %v4544_v12, %s4150_s30  ;;  %1466 = vmatpush1.msra.mxu0 %v1387_v44 }
 0x230   : > { %v1339_v47 = vpop.permute.xlu0 %1338  ;;  %v1341_v48 = vpop.permute.xlu1 %1340 }
 0x231   : > { %v1386_v49 = vsel %vm1378_vm4, %v1339_v47, %v1341_v48  ;;  %v1313_v48 = vld [vmem:[#allocation6 + $0x198] sm:$0xff] }
 0x232   : > { %1632 = vrot.lane.b32.xlu0 %v4594_v19, %s4150_s30  ;;  %1467 = vmatprep.subr.mxu0 %v1386_v49 }
 0x233   : > { %1874 = vrot.lane.b32.xlu1 %v4529_v9, %s4151_s9 }
 0x234   : > { %v1337_v51 = vpop.permute.xlu0 %1336  ;;  %v1333_v52 = vpop.permute.xlu1 %1332 }
 0x235   : > { %v1385_v53 = vsel %vm1378_vm4, %v1337_v51, %v1339_v47 }
 0x236   : > { %1876 = vrot.lane.b32.xlu0 %v4587_v18, %s4151_s9  ;;  %1468 = vmatpush1.msra.mxu0 %v1385_v53 }
 0x237   : > { %1628 = vrot.lane.b32.xlu1 %v4548_v13, %s4150_s30 }
 0x238   : > { %v1335_v22 = vpop.permute.xlu0 %1334  ;;  %v1331_v23 = vpop.permute.xlu1 %1330 }
 0x239   : > { %v1383_v24 = vsel %vm1378_vm4, %v1331_v23, %v1333_v52  ;;  %v1384_v25 = vsel %vm1378_vm4, %v1333_v52, %v1335_v22  ;;  %v1314_v52 = vld [vmem:[#allocation6 + $0x1a0] sm:$0xff] }
 0x23a   : > { %1872 = vrot.lane.b32.xlu0 %v4538_v10, %s4151_s9  ;;  %1469 = vmatprep.subr.mxu0 %v1384_v25 }
 0x23b   : > { %1624 = vrot.lane.b32.xlu1 %v4557_v14, %s4150_s30  ;;  %1470 = vmatpush1.msra.mxu0 %v1383_v24  ;;  %v1315_v24 = vld [vmem:[#allocation6 + $0x1a8] sm:$0xff] }
 0x23c   : > { %v1327_v27 = vpop.permute.xlu0 %1326  ;;  %v1329_v28 = vpop.permute.xlu1 %1328 }
 0x23d   : > { %v1382_v29 = vsel %vm1378_vm4, %v1327_v27, %v1329_v28 }
 0x23e   : > { %1626 = vrot.lane.b32.xlu0 %v4605_v20, %s4150_s30  ;;  %1471 = vmatprep.subr.mxu0 %v1382_v29 }
 0x23f   : > { %1868 = vrot.lane.b32.xlu1 %v4544_v12, %s4151_s9 }
 0x240   : > { %v1325_v31 = vpop.permute.xlu0 %1324  ;;  %v1321_v32 = vpop.permute.xlu1 %1320 }
 0x241   : > { %v1381_v33 = vsel %vm1378_vm4, %v1325_v31, %v1327_v27  ;;  %v1316_v27 = vld [vmem:[#allocation6 + $0x1b0] sm:$0xff] }
 0x242   : > { %1870 = vrot.lane.b32.xlu0 %v4594_v19, %s4151_s9  ;;  %1472 = vmatpush1.msra.mxu0 %v1381_v33 }
 0x243   : > { %1622 = vrot.lane.b32.xlu1 %v4560_v15, %s4150_s30  ;;  %s5681_s30 = scalar_lea.sflag [#allocation5], %s300_s18 }
 0x244   : > { %v1323_v35 = vpop.permute.xlu0 %1322  ;;  %v1319_v36 = vpop.permute.xlu1 %1318 }
 0x245   : > { %v1379_v37 = vsel %vm1378_vm4, %v1319_v36, %v1321_v32  ;;  %v1380_v38 = vsel %vm1378_vm4, %v1321_v32, %v1323_v35 }
 0x246   : > { %1866 = vrot.lane.b32.xlu0 %v4548_v13, %s4151_s9  ;;  %1473 = vmatprep.subr.mxu0 %v1380_v38 }
 0x247   : > { %1862 = vrot.lane.b32.xlu1 %v4557_v14, %s4151_s9  ;;  %1474 = vmatpush1.msra.mxu0 %v1379_v37 }
 0x248   : > { %v1679_v40 = vpop.permute.xlu0 %1678  ;;  %3650 = vmatmul.mubr.msk.f32.vlgmr.msra.gmra.mxu0 %vm1034_vm2, %v1310_v39 }
 0x249   : > { %v1681_v41 = vpop.permute.xlu1 %1680  ;;  %1513 = vmatprep.mubr.f32.mxu0 %v5742_v21 }
 0x24a   : > { %1864 = vrot.lane.b32.xlu0 %v4605_v20, %s4151_s9  ;;  %v1702_v43 = vsel %vm1682_vm5, %v1679_v40, %v1681_v41 }
 0x24b   : > { %1860 = vrot.lane.b32.xlu1 %v4560_v15, %s4151_s9  ;;  %1759 = vmatprep.subr.mxu1 %v1702_v43 }
 0x24c   : > { %v1677_v13 = vpop.permute.xlu0 %1676  ;;  %3651 = vmatmul.mubr.msk.f32.gmra.mxu0 %vm1034_vm2, %v1311_v42 }
 0x24d   : > { %v1701_v14 = vsel %vm1682_vm5, %v1677_v13, %v1679_v40  ;;  %v1673_v44 = vpop.permute.xlu1 %1672  ;;  %1519 = vmatprep.mubr.f32.mxu0 %v5742_v21 }
 0x24e   : > { %2163 = vrot.lane.b32.xlu0 %v4442_v55, %s4152_s29  ;;  %1760 = vmatpush1.msra.mxu1 %v1701_v14 }
 0x24f   : > { %2165 = vrot.lane.b32.xlu1 %v4452_v57, %s4152_s29 }
 0x250   : > { %v1675_v46 = vpop.permute.xlu0 %1674  ;;  %3652 = vmatmul.mubr.msk.f32.gmra.mxu0 %vm1034_vm2, %v1312_v45 }
 0x251   : > { %v1917_v15 = vpop.permute.xlu1 %1916  ;;  %v1700_v47 = vsel %vm1682_vm5, %v1673_v44, %v1675_v46  ;;  %1525 = vmatprep.mubr.f32.mxu0 %v5742_v21 }
 0x252   : > { %2161 = vrot.lane.b32.xlu0 %v4445_v56, %s4152_s29  ;;  %1761 = vmatprep.subr.mxu1 %v1700_v47 }
 0x253   : > { %2157 = vrot.lane.b32.xlu1 %v4455_v58, %s4152_s29 }
 0x254   : > { %v1919_v49 = vpop.permute.xlu0 %1918  ;;  %3653 = vmatmul.mubr.msk.f32.gmra.mxu0 %vm1034_vm2, %v1313_v48 }
 0x255   : > { %v1671_v50 = vpop.permute.xlu1 %1670  ;;  %v1940_v51 = vsel %vm1920_vm6, %v1917_v15, %v1919_v49  ;;  %1531 = vmatprep.mubr.f32.mxu0 %v5742_v21 }
 0x256   : > { %v1699_v53 = vsel %vm1682_vm5, %v1671_v50, %v1673_v44  ;;  %2159 = vrot.lane.b32.xlu0 %v4468_v60, %s4152_s29  ;;  %1997 = vmatprep.subr.mxu0 %v1940_v51 }
 0x257   : > { %2451 = vrot.lane.b32.xlu1 %v4442_v55, %s4153_s20  ;;  %1762 = vmatpush1.msra.mxu1 %v1699_v53 }
 0x258   : > { %v1915_v54 = vpop.permute.xlu0 %1914  ;;  %3654 = vmatmul.mubr.msk.f32.gmra.mxu0 %vm1034_vm2, %v1314_v52 }
 0x259   : > { %v1939_v22 = vsel %vm1920_vm6, %v1915_v54, %v1917_v15  ;;  %v1667_v23 = vpop.permute.xlu1 %1666  ;;  %1537 = vmatprep.mubr.f32.mxu0 %v5742_v21 }
 0x25a   : > { %2453 = vrot.lane.b32.xlu0 %v4452_v57, %s4153_s20  ;;  %1998 = vmatpush1.msra.mxu0 %v1939_v22 }
 0x25b   : > { %2155 = vrot.lane.b32.xlu1 %v4465_v59, %s4152_s29 }
 0x25c   : > { %v1669_v25 = vpop.permute.xlu0 %1668  ;;  %3655 = vmatmul.mubr.msk.f32.gmra.mxu0 %vm1034_vm2, %v1315_v24 }
 0x25d   : > { %v1911_v55 = vpop.permute.xlu1 %1910  ;;  %v1698_v26 = vsel %vm1682_vm5, %v1667_v23, %v1669_v25  ;;  %1543 = vmatprep.mubr.f32.mxu0 %v5742_v21 }
 0x25e   : > { %2449 = vrot.lane.b32.xlu0 %v4445_v56, %s4153_s20  ;;  %1763 = vmatprep.subr.mxu1 %v1698_v26 }
 0x25f   : > { %2151 = vrot.lane.b32.xlu1 %v4471_v61, %s4152_s29 }
 0x260   : > { %v1913_v57 = vpop.permute.xlu0 %1912  ;;  %3656 = vmatmul.mubr.msk.f32.gmra.mxu0 %vm1034_vm2, %v1316_v27 }
 0x261   : > { %v1665_v28 = vpop.permute.xlu1 %1664  ;;  %v1938_v29 = vsel %vm1920_vm6, %v1911_v55, %v1913_v57  ;;  %1549 = vmatprep.mubr.f32.mxu0 %v5742_v21 }
 0x262   : > { %v1697_v31 = vsel %vm1682_vm5, %v1665_v28, %v1667_v23  ;;  %2153 = vrot.lane.b32.xlu0 %v4487_v0, %s4152_s29  ;;  %1999 = vmatprep.subr.mxu0 %v1938_v29 }
 0x263   : > { %2445 = vrot.lane.b32.xlu1 %v4455_v58, %s4153_s20  ;;  %1764 = vmatpush1.msra.mxu1 %v1697_v31 }
 0x264   : > { %v1909_v56 = vpop.permute.xlu0 %1908  ;;  %3657 = vmatmul.mubr.msk.f32.gmra.mxu0 %vm1034_vm2, %v1317_v30 }
 0x265   : > { %v1937_v32 = vsel %vm1920_vm6, %v1909_v56, %v1911_v55  ;;  %v1661_v33 = vpop.permute.xlu1 %1660  ;;  %2049 = vmatprep.mubr.f32.mxu0 %v5742_v21 }
 0x266   : > { %2447 = vrot.lane.b32.xlu0 %v4468_v60, %s4153_s20  ;;  %2000 = vmatpush1.msra.mxu0 %v1937_v32 }
 0x267   : > { %2149 = vrot.lane.b32.xlu1 %v4475_v62, %s4152_s29 }
 0x268   : > { %v1663_v34 = vpop.permute.xlu0 %1662 }
 0x269   : > { %v1905_v35 = vpop.permute.xlu1 %1904  ;;  %v1696_v58 = vsel %vm1682_vm5, %v1661_v33, %v1663_v34 }
 0x26a   : > { %2443 = vrot.lane.b32.xlu0 %v4465_v59, %s4153_s20  ;;  %1765 = vmatprep.subr.mxu1 %v1696_v58 }
 0x26b   : > { %2145 = vrot.lane.b32.xlu1 %v4484_v63, %s4152_s29 }
 0x26c   : > { %v1907_v36 = vpop.permute.xlu0 %1906 }
 0x26d   : > { %v1659_v37 = vpop.permute.xlu1 %1658  ;;  %v1936_v38 = vsel %vm1920_vm6, %v1905_v35, %v1907_v36 }
 0x26e   : > { %v1695_v60 = vsel %vm1682_vm5, %v1659_v37, %v1661_v33  ;;  %2147 = vrot.lane.b32.xlu0 %v4522_v7, %s4152_s29  ;;  %2001 = vmatprep.subr.mxu0 %v1936_v38  ;;  %v5023_v37 = vld [vmem:[%s4439_s7 + $0x30] sm:$0xff]  ;;  %v5028_v38 = vld [vmem:[%s4439_s7 + $0x8] sm:$0xff] }
 0x26f   : > { %2439 = vrot.lane.b32.xlu1 %v4471_v61, %s4153_s20  ;;  %1766 = vmatpush1.msra.mxu1 %v1695_v60 }
 0x270   : > { %v1903_v39 = vpop.permute.xlu0 %1902 }
 0x271   : > { %v1935_v59 = vsel %vm1920_vm6, %v1903_v39, %v1905_v35  ;;  %v1655_v40 = vpop.permute.xlu1 %1654  ;;  %v5017_v35 = vld [vmem:[%s4439_s7 + $0x18] sm:$0xff] }
 0x272   : > { %2441 = vrot.lane.b32.xlu0 %v4487_v0, %s4153_s20  ;;  %2002 = vmatpush1.msra.mxu0 %v1935_v59  ;;  %v1614_v59 = vld [vmem:[#allocation6 + $0x100] sm:$0xff] }
 0x273   : > { %2143 = vrot.lane.b32.xlu1 %v4490_v1, %s4152_s29 }
 0x274   : > { %v1657_v41 = vpop.permute.xlu0 %1656 }
 0x275   : > { %v1899_v42 = vpop.permute.xlu1 %1898  ;;  %v1694_v43 = vsel %vm1682_vm5, %v1655_v40, %v1657_v41  ;;  %v5037_v41 = vld [vmem:[%s4439_s7 + $0x20] sm:$0xff] }
 0x276   : > { %2437 = vrot.lane.b32.xlu0 %v4475_v62, %s4153_s20  ;;  %1767 = vmatprep.subr.mxu1 %v1694_v43 }
 0x277   : > { %2139 = vrot.lane.b32.xlu1 %v4494_v2, %s4152_s29 }
 0x278   : > { %v1901_v61 = vpop.permute.xlu0 %1900 }
 0x279   : > { %v1653_v13 = vpop.permute.xlu1 %1652  ;;  %v1934_v14 = vsel %vm1920_vm6, %v1899_v42, %v1901_v61 }
 0x27a   : > { %v1693_v0 = vsel %vm1682_vm5, %v1653_v13, %v1655_v40  ;;  %2141 = vrot.lane.b32.xlu0 %v4541_v11, %s4152_s29  ;;  %2003 = vmatprep.subr.mxu0 %v1934_v14  ;;  %v1615_v13 = vld [vmem:[#allocation6 + $0x108] sm:$0xff]  ;;  %v5045_v14 = vld [vmem:[%s4439_s7 + $0x28] sm:$0xff] }
 0x27b   : > { %2433 = vrot.lane.b32.xlu1 %v4484_v63, %s4153_s20  ;;  %1768 = vmatpush1.msra.mxu1 %v1693_v0 }
 0x27c   : > { %v1897_v44 = vpop.permute.xlu0 %1896 }
 0x27d   : > { %v1933_v62 = vsel %vm1920_vm6, %v1897_v44, %v1899_v42  ;;  %v1649_v45 = vpop.permute.xlu1 %1648 }
 0x27e   : > { %2435 = vrot.lane.b32.xlu0 %v4522_v7, %s4153_s20  ;;  %2004 = vmatpush1.msra.mxu0 %v1933_v62 }
 0x27f   : > { %2137 = vrot.lane.b32.xlu1 %v4503_v3, %s4152_s29 }
 0x280   : > { %v1651_v46 = vpop.permute.xlu0 %1650 }
 0x281   : > { %v1893_v15 = vpop.permute.xlu1 %1892  ;;  %v1692_v47 = vsel %vm1682_vm5, %v1649_v45, %v1651_v46  ;;  %v1616_v46 = vld [vmem:[#allocation6 + $0x110] sm:$0xff] }
 0x282   : > { %2431 = vrot.lane.b32.xlu0 %v4490_v1, %s4153_s20  ;;  %1769 = vmatprep.subr.mxu1 %v1692_v47 }
 0x283   : > { %2133 = vrot.lane.b32.xlu1 %v4506_v4, %s4152_s29 }
 0x284   : > { %v1895_v63 = vpop.permute.xlu0 %1894 }
 0x285   : > { %v1647_v48 = vpop.permute.xlu1 %1646  ;;  %v1932_v49 = vsel %vm1920_vm6, %v1893_v15, %v1895_v63 }
 0x286   : > { %v1691_v7 = vsel %vm1682_vm5, %v1647_v48, %v1649_v45  ;;  %2135 = vrot.lane.b32.xlu0 %v4569_v16, %s4152_s29  ;;  %2005 = vmatprep.subr.mxu0 %v1932_v49  ;;  %v1605_v45 = vld [vmem:[#allocation6 + $0x40] sm:$0xff]  ;;  %v1617_v48 = vld [vmem:[#allocation6 + $0x118] sm:$0xff]  ;;  %v1606_v49 = vld [vmem:[#allocation6 + $0x48] sm:$0xff] }
 0x287   : > { %2427 = vrot.lane.b32.xlu1 %v4494_v2, %s4153_s20  ;;  %1770 = vmatpush1.msra.mxu1 %v1691_v7  ;;  %v5067_v7 = vld [vmem:[%s4439_s7 + $0x10] sm:$0xff] }
 0x288   : > { %v1891_v50 = vpop.permute.xlu0 %1890 }
 0x289   : > { %v1931_v1 = vsel %vm1920_vm6, %v1891_v50, %v1893_v15  ;;  %v1643_v51 = vpop.permute.xlu1 %1642 }
 0x28a   : > { %2429 = vrot.lane.b32.xlu0 %v4541_v11, %s4153_s20  ;;  %2006 = vmatpush1.msra.mxu0 %v1931_v1 }
 0x28b   : > { %2131 = vrot.lane.b32.xlu1 %v4510_v5, %s4152_s29 }
 0x28c   : > { %v1645_v52 = vpop.permute.xlu0 %1644 }
 0x28d   : > { %v1887_v53 = vpop.permute.xlu1 %1886  ;;  %v1690_v54 = vsel %vm1682_vm5, %v1643_v51, %v1645_v52 }
 0x28e   : > { %2425 = vrot.lane.b32.xlu0 %v4503_v3, %s4153_s20  ;;  %1771 = vmatprep.subr.mxu1 %v1690_v54  ;;  %v1607_v54 = vld [vmem:[#allocation6 + $0x50] sm:$0xff] }
 0x28f   : > { %2127 = vrot.lane.b32.xlu1 %v4519_v6, %s4152_s29 }
 0x290   : > { %v1889_v2 = vpop.permute.xlu0 %1888 }
 0x291   : > { %v1641_v22 = vpop.permute.xlu1 %1640  ;;  %v1930_v23 = vsel %vm1920_vm6, %v1887_v53, %v1889_v2  ;;  %v3937_v2 = vld [vmem:[%s4439_s7 + $0xe0] sm:$0xff] }
 0x292   : > { %v1689_v11 = vsel %vm1682_vm5, %v1641_v22, %v1643_v51  ;;  %2129 = vrot.lane.b32.xlu0 %v4576_v17, %s4152_s29  ;;  %2007 = vmatprep.subr.mxu0 %v1930_v23  ;;  %v3938_v22 = vld [vmem:[%s4439_s7 + $0xe8] sm:$0xff] }
 0x293   : > { %2421 = vrot.lane.b32.xlu1 %v4506_v4, %s4153_s20  ;;  %1772 = vmatpush1.msra.mxu1 %v1689_v11 }
 0x294   : > { %v1885_v24 = vpop.permute.xlu0 %1884 }
 0x295   : > { %v1929_v3 = vsel %vm1920_vm6, %v1885_v24, %v1887_v53  ;;  %v1637_v25 = vpop.permute.xlu1 %1636  ;;  %v1618_v53 = vld [vmem:[#allocation6 + $0x120] sm:$0xff] }
 0x296   : > { %2423 = vrot.lane.b32.xlu0 %v4569_v16, %s4153_s20  ;;  %2008 = vmatpush1.msra.mxu0 %v1929_v3  ;;  %v1619_v3 = vld [vmem:[#allocation6 + $0x128] sm:$0xff] }
 0x297   : > { %2125 = vrot.lane.b32.xlu1 %v4525_v8, %s4152_s29 }
 0x298   : > { %v1639_v55 = vpop.permute.xlu0 %1638 }
 0x299   : > { %v1881_v26 = vpop.permute.xlu1 %1880  ;;  %v1688_v27 = vsel %vm1682_vm5, %v1637_v25, %v1639_v55  ;;  %v3939_v55 = vld [vmem:[%s4439_s7 + $0xd8] sm:$0xff] }
 0x29a   : > { %2419 = vrot.lane.b32.xlu0 %v4510_v5, %s4153_s20  ;;  %1773 = vmatprep.subr.mxu1 %v1688_v27 }
 0x29b   : > { %2121 = vrot.lane.b32.xlu1 %v4529_v9, %s4152_s29 }
 0x29c   : > { %v1883_v4 = vpop.permute.xlu0 %1882 }
 0x29d   : > { %v1635_v57 = vpop.permute.xlu1 %1634  ;;  %v1928_v28 = vsel %vm1920_vm6, %v1881_v26, %v1883_v4 }
 0x29e   : > { %v1687_v16 = vsel %vm1682_vm5, %v1635_v57, %v1637_v25  ;;  %2123 = vrot.lane.b32.xlu0 %v4587_v18, %s4152_s29  ;;  %2009 = vmatprep.subr.mxu0 %v1928_v28  ;;  %v1608_v25 = vld [vmem:[#allocation6 + $0x58] sm:$0xff]  ;;  %v1620_v28 = vld [vmem:[#allocation6 + $0x130] sm:$0xff] }
 0x29f   : > { %2415 = vrot.lane.b32.xlu1 %v4519_v6, %s4153_s20  ;;  %1774 = vmatpush1.msra.mxu1 %v1687_v16  ;;  %v1609_v16 = vld [vmem:[#allocation6 + $0x60] sm:$0xff] }
 0x2a0   : > { %v1879_v29 = vpop.permute.xlu0 %1878 }
 0x2a1   : > { %v1927_v5 = vsel %vm1920_vm6, %v1879_v29, %v1881_v26  ;;  %v1631_v30 = vpop.permute.xlu1 %1630  ;;  %v3940_v26 = vld [vmem:[%s4439_s7 + $0xc8] sm:$0xff] }
 0x2a2   : > { %2417 = vrot.lane.b32.xlu0 %v4576_v17, %s4153_s20  ;;  %2010 = vmatpush1.msra.mxu0 %v1927_v5  ;;  %v3941_v5 = vld [vmem:[%s4439_s7 + $0xd0] sm:$0xff] }
 0x2a3   : > { %2119 = vrot.lane.b32.xlu1 %v4538_v10, %s4152_s29  ;;  %v5009_v10 = vld [vmem:[%s4439_s7 + $0x38] sm:$0xff] }
 0x2a4   : > { %v1633_v9 = vpop.permute.xlu0 %1632 }
 0x2a5   : > { %v1875_v31 = vpop.permute.xlu1 %1874  ;;  %v1686_v56 = vsel %vm1682_vm5, %v1631_v30, %v1633_v9 }
 0x2a6   : > { %2413 = vrot.lane.b32.xlu0 %v4525_v8, %s4153_s20  ;;  %1775 = vmatprep.subr.mxu1 %v1686_v56  ;;  %v1621_v56 = vld [vmem:[#allocation6 + $0x138] sm:$0xff] }
 0x2a7   : > { %2115 = vrot.lane.b32.xlu1 %v4544_v12, %s4152_s29 }
 0x2a8   : > { %v1877_v6 = vpop.permute.xlu0 %1876 }
 0x2a9   : > { %v1629_v32 = vpop.permute.xlu1 %1628  ;;  %v1926_v17 = vsel %vm1920_vm6, %v1875_v31, %v1877_v6  ;;  %v1610_v6 = vld [vmem:[#allocation6 + $0x68] sm:$0xff] }
 0x2aa   : > { %v1685_v33 = vsel %vm1682_vm5, %v1629_v32, %v1631_v30  ;;  %2117 = vrot.lane.b32.xlu0 %v4594_v19, %s4152_s29  ;;  %2011 = vmatprep.subr.mxu0 %v1926_v17  ;;  %v3942_v32 = vld [vmem:[%s4439_s7 + $0xc0] sm:$0xff] }
 0x2ab   : > { %2409 = vrot.lane.b32.xlu1 %v5009_v10, %s4153_s20  ;;  %1776 = vmatpush1.msra.mxu1 %v1685_v33 }
 0x2ac   : > { %v1873_v8 = vpop.permute.xlu0 %1872 }
 0x2ad   : > { %v1925_v12 = vsel %vm1920_vm6, %v1873_v8, %v1875_v31  ;;  %v1625_v34 = vpop.permute.xlu1 %1624 }
 0x2ae   : > { %2411 = vrot.lane.b32.xlu0 %v4587_v18, %s4153_s20  ;;  %2012 = vmatpush1.msra.mxu0 %v1925_v12  ;;  %v1611_v12 = vld [vmem:[#allocation6 + $0x70] sm:$0xff] }
 0x2af   : > { %2113 = vrot.lane.b32.xlu1 %v5017_v35, %s4152_s29 }
 0x2b0   : > { %v1627_v19 = vpop.permute.xlu0 %1626 }
 0x2b1   : > { %v1869_v58 = vpop.permute.xlu1 %1868  ;;  %v1684_v36 = vsel %vm1682_vm5, %v1625_v34, %v1627_v19 }
 0x2b2   : > { %2407 = vrot.lane.b32.xlu0 %v5023_v37, %s4153_s20  ;;  %1777 = vmatprep.subr.mxu1 %v1684_v36 }
 0x2b3   : > { %2109 = vrot.lane.b32.xlu1 %v5028_v38, %s4152_s29 }
 0x2b4   : > { %v1871_v18 = vpop.permute.xlu0 %1870 }
 0x2b5   : > { %v1623_v60 = vpop.permute.xlu1 %1622  ;;  %v1924_v39 = vsel %vm1920_vm6, %v1869_v58, %v1871_v18  ;;  %v1612_v18 = vld [vmem:[#allocation6 + $0x78] sm:$0xff] }
 0x2b6   : > { %v1683_v40 = vsel %vm1682_vm5, %v1623_v60, %v1625_v34  ;;  %2111 = vrot.lane.b32.xlu0 %v4605_v20, %s4152_s29  ;;  %2013 = vmatprep.subr.mxu0 %v1924_v39  ;;  %v5050_v20 = vld [vmem:[%s4439_s7] sm:$0xff]  ;;  %v3943_v34 = vld [vmem:[%s4439_s7 + $0xb0] sm:$0xff]  ;;  %v3944_v39 = vld [vmem:[%s4439_s7 + $0xb8] sm:$0xff] }
 0x2b7   : > { %2403 = vrot.lane.b32.xlu1 %v5037_v41, %s4153_s20  ;;  %1778 = vmatpush1.msra.mxu1 %v1683_v40 }
 0x2b8   : > { %v1867_v42 = vpop.permute.xlu0 %1866  ;;  %3658 = vmatmul.mubr.msk.f32.vlgmr.msra.gmra.mxu1 %vm1034_vm2, %v1614_v59 }
 0x2b9   : > { %v1923_v43 = vsel %vm1920_vm6, %v1867_v42, %v1869_v58  ;;  %v1863_v61 = vpop.permute.xlu1 %1862  ;;  %1817 = vmatprep.mubr.f32.mxu1 %v5742_v21 }
 0x2ba   : > { %2405 = vrot.lane.b32.xlu0 %v5045_v14, %s4153_s20  ;;  %2014 = vmatpush1.msra.mxu0 %v1923_v43  ;;  %v3945_v43 = vld [vmem:[%s4439_s7 + $0xa8] sm:$0xff] }
 0x2bb   : > { %2107 = vrot.lane.b32.xlu1 %v5050_v20, %s4152_s29  ;;  %s4157_s29 = smov [#allocation9]  }
 0x2bc   : > { %v1865_v0 = vpop.permute.xlu0 %1864  ;;  %3659 = vmatmul.mubr.msk.f32.gmra.mxu1 %vm1034_vm2, %v1615_v13 }
 0x2bd   : > { %v1861_v44 = vpop.permute.xlu1 %1860  ;;  %v1922_v62 = vsel %vm1920_vm6, %v1863_v61, %v1865_v0  ;;  %1823 = vmatprep.mubr.f32.mxu1 %v5742_v21 }
 0x2be   : > { %v1921_v15 = vsel %vm1920_vm6, %v1861_v44, %v1863_v61  ;;  %2401 = vrot.lane.b32.xlu0 %v5017_v35, %s4153_s20  ;;  %2015 = vmatprep.subr.mxu0 %v1922_v62  ;;  %v3946_v44 = vld [vmem:[%s4439_s7 + $0x98] sm:$0xff] }
 0x2bf   : > { %2397 = vrot.lane.b32.xlu1 %v5028_v38, %s4153_s20  ;;  %2016 = vmatpush1.msra.mxu0 %v1921_v15 }
 0x2c0   : > { %v2164_v47 = vpop.permute.xlu0 %2163  ;;  %3666 = vmatmul.mubr.msk.f32.vlgmr.msra.gmra.mxu0 %vm1034_vm2, %v1605_v45  ;;  %3660 = vmatmul.mubr.msk.f32.gmra.mxu1 %vm1034_vm2, %v1616_v46 }
 0x2c1   : > { %v2166_v63 = vpop.permute.xlu1 %2165  ;;  %1829 = vmatprep.mubr.f32.mxu1 %v5742_v21  ;;  %2055 = vmatprep.mubr.f32.mxu0 %v5742_v21 }
 0x2c2   : > { %2399 = vrot.lane.b32.xlu0 %v5067_v7, %s4153_s20  ;;  %v2187_v50 = vsel %vm2167_vm7, %v2164_v47, %v2166_v63 }
 0x2c3   : > { %2395 = vrot.lane.b32.xlu1 %v5050_v20, %s4153_s20  ;;  %2244 = vmatprep.subr.mxu1 %v2187_v50  ;;  %v3948_v50 = vld [vmem:[%s4439_s7 + $0x90] sm:$0xff]  ;;  %s4041_s20 = sshll.u32 %s4157_s29, 4  ;;  %s4042_s20 = int_to_ptr.vmem [resolvable:$false] %s4041_s20 }
 0x2c4   : > { %v2162_v1 = vpop.permute.xlu0 %2161  ;;  %3661 = vmatmul.mubr.msk.f32.gmra.mxu1 %vm1034_vm2, %v1617_v48  ;;  %3667 = vmatmul.mubr.msk.f32.gmra.mxu0 %vm1034_vm2, %v1606_v49 }
 0x2c5   : > { %v2186_v51 = vsel %vm2167_vm7, %v2162_v1, %v2164_v47  ;;  %v2158_v52 = vpop.permute.xlu1 %2157  ;;  %1835 = vmatprep.mubr.f32.mxu1 %v5742_v21  ;;  %2061 = vmatprep.mubr.f32.mxu0 %v5742_v21  ;;  %v3947_v47 = vld [vmem:[%s4439_s7 + $0xa0] sm:$0xff] }
 0x2c6   : > { %2689 = vrot.lane.b32.xlu0 %v3937_v2, %s4154_s10  ;;  %2245 = vmatpush1.msra.mxu1 %v2186_v51 }
 0x2c7   : > { %2691 = vrot.lane.b32.xlu1 %v3938_v22, %s4154_s10 }
 0x2c8   : > { %v2160_v23 = vpop.permute.xlu0 %2159  ;;  %3662 = vmatmul.mubr.msk.f32.gmra.mxu1 %vm1034_vm2, %v1618_v53  ;;  %3668 = vmatmul.mubr.msk.f32.gmra.mxu0 %vm1034_vm2, %v1607_v54  ;;  %v3949_v53 = vld [vmem:[%s4439_s7 + $0x80] sm:$0xff] }
 0x2c9   : > { %v2452_v11 = vpop.permute.xlu1 %2451  ;;  %v2185_v24 = vsel %vm2167_vm7, %v2158_v52, %v2160_v23  ;;  %1841 = vmatprep.mubr.f32.mxu1 %v5742_v21  ;;  %2067 = vmatprep.mubr.f32.mxu0 %v5742_v21 }
 0x2ca   : > { %2687 = vrot.lane.b32.xlu0 %v3939_v55, %s4154_s10  ;;  %2246 = vmatprep.subr.mxu1 %v2185_v24 }
 0x2cb   : > { %2683 = vrot.lane.b32.xlu1 %v3940_v26, %s4154_s10 }
 0x2cc   : > { %v2454_v27 = vpop.permute.xlu0 %2453  ;;  %3663 = vmatmul.mubr.msk.f32.gmra.mxu1 %vm1034_vm2, %v1619_v3  ;;  %3669 = vmatmul.mubr.msk.f32.gmra.mxu0 %vm1034_vm2, %v1608_v25 }
 0x2cd   : > { %v2156_v4 = vpop.permute.xlu1 %2155  ;;  %v2475_v57 = vsel %vm2455_vm8, %v2452_v11, %v2454_v27  ;;  %1847 = vmatprep.mubr.f32.mxu1 %v5742_v21  ;;  %2073 = vmatprep.mubr.f32.mxu0 %v5742_v21 }
 0x2ce   : > { %v2184_v29 = vsel %vm2167_vm7, %v2156_v4, %v2158_v52  ;;  %2685 = vrot.lane.b32.xlu0 %v3941_v5, %s4154_s10  ;;  %2532 = vmatprep.subr.mxu0 %v2475_v57  ;;  %v3952_v57 = vld [vmem:[%s4439_s7 + $0x68] sm:$0xff] }
 0x2cf   : > { %2936 = vrot.lane.b32.xlu1 %v3937_v2, %s4155_s16  ;;  %2247 = vmatpush1.msra.mxu1 %v2184_v29 }
 0x2d0   : > { %v2450_v30 = vpop.permute.xlu0 %2449  ;;  %3664 = vmatmul.mubr.msk.f32.gmra.mxu1 %vm1034_vm2, %v1620_v28  ;;  %3670 = vmatmul.mubr.msk.f32.gmra.mxu0 %vm1034_vm2, %v1609_v16 }
 0x2d1   : > { %v2474_v9 = vsel %vm2455_vm8, %v2450_v30, %v2452_v11  ;;  %v2152_v31 = vpop.permute.xlu1 %2151  ;;  %1853 = vmatprep.mubr.f32.mxu1 %v5742_v21  ;;  %2079 = vmatprep.mubr.f32.mxu0 %v5742_v21  ;;  %v3950_v11 = vld [vmem:[%s4439_s7 + $0x88] sm:$0xff]  ;;  %v3953_v30 = vld [vmem:[%s4439_s7 + $0x70] sm:$0xff] }
 0x2d2   : > { %2938 = vrot.lane.b32.xlu0 %v3938_v22, %s4155_s16  ;;  %2533 = vmatpush1.msra.mxu0 %v2474_v9 }
 0x2d3   : > { %2681 = vrot.lane.b32.xlu1 %v3942_v32, %s4154_s10 }
 0x2d4   : > { %v2154_v17 = vpop.permute.xlu0 %2153  ;;  %3665 = vmatmul.mubr.msk.f32.gmra.mxu1 %vm1034_vm2, %v1621_v56  ;;  %3671 = vmatmul.mubr.msk.f32.gmra.mxu0 %vm1034_vm2, %v1610_v6  ;;  %v3954_v6 = vld [vmem:[%s4439_s7 + $0x60] sm:$0xff] }
 0x2d5   : > { %v2446_v33 = vpop.permute.xlu1 %2445  ;;  %v2183_v8 = vsel %vm2167_vm7, %v2152_v31, %v2154_v17  ;;  %2296 = vmatprep.mubr.f32.mxu1 %v5742_v21  ;;  %2085 = vmatprep.mubr.f32.mxu0 %v5742_v21 }
 0x2d6   : > { %2934 = vrot.lane.b32.xlu0 %v3939_v55, %s4155_s16  ;;  %2248 = vmatprep.subr.mxu1 %v2183_v8  ;;  %v3951_v55 = vld [vmem:[%s4439_s7 + $0x78] sm:$0xff]  ;;  %v3955_v8 = vld [vmem:[%s4439_s7 + $0x50] sm:$0xff] }
 0x2d7   : > { %2677 = vrot.lane.b32.xlu1 %v3943_v34, %s4154_s10 }
 0x2d8   : > { %v2448_v19 = vpop.permute.xlu0 %2447  ;;  %3672 = vmatmul.mubr.msk.f32.gmra.mxu0 %vm1034_vm2, %v1611_v12 }
 0x2d9   : > { %v2150_v58 = vpop.permute.xlu1 %2149  ;;  %v2473_v36 = vsel %vm2455_vm8, %v2446_v33, %v2448_v19  ;;  %2091 = vmatprep.mubr.f32.mxu0 %v5742_v21 }
 0x2da   : > { %v2182_v60 = vsel %vm2167_vm7, %v2150_v58, %v2152_v31  ;;  %2679 = vrot.lane.b32.xlu0 %v3944_v39, %s4154_s10  ;;  %2534 = vmatprep.subr.mxu0 %v2473_v36  ;;  %v3956_v36 = vld [vmem:[%s4439_s7 + $0x58] sm:$0xff] }
 0x2db   : > { %2930 = vrot.lane.b32.xlu1 %v3940_v26, %s4155_s16  ;;  %2249 = vmatpush1.msra.mxu1 %v2182_v60 }
 0x2dc   : > { %v2444_v59 = vpop.permute.xlu0 %2443  ;;  %3673 = vmatmul.mubr.msk.f32.gmra.mxu0 %vm1034_vm2, %v1612_v18 }
 0x2dd   : > { %v2472_v40 = vsel %vm2455_vm8, %v2444_v59, %v2446_v33  ;;  %v2146_v42 = vpop.permute.xlu1 %2145  ;;  %2584 = vmatprep.mubr.f32.mxu0 %v5742_v21  ;;  %v3957_v59 = vld [vmem:[%s4439_s7 + $0x48] sm:$0xff] }
 0x2de   : > { %2932 = vrot.lane.b32.xlu0 %v3941_v5, %s4155_s16  ;;  %2535 = vmatpush1.msra.mxu0 %v2472_v40 }
 0x2df   : > { %2675 = vrot.lane.b32.xlu1 %v3945_v43, %s4154_s10 }
 0x2e0   : > { %v2148_v61 = vpop.permute.xlu0 %2147 }
 0x2e1   : > { %v2440_v13 = vpop.permute.xlu1 %2439  ;;  %v2181_v0 = vsel %vm2167_vm7, %v2146_v42, %v2148_v61 }
 0x2e2   : > { %2928 = vrot.lane.b32.xlu0 %v3942_v32, %s4155_s16  ;;  %2250 = vmatprep.subr.mxu1 %v2181_v0 }
 0x2e3   : > { %2671 = vrot.lane.b32.xlu1 %v3946_v44, %s4154_s10 }
 0x2e4   : > { %v2442_v62 = vpop.permute.xlu0 %2441 }
 0x2e5   : > { %v2144_v45 = vpop.permute.xlu1 %2143  ;;  %v2471_v46 = vsel %vm2455_vm8, %v2440_v13, %v2442_v62  ;;  %v3958_v62 = vld [vmem:[%s4439_s7 + $0x40] sm:$0xff] }
 0x2e6   : > { %v2180_v15 = vsel %vm2167_vm7, %v2144_v45, %v2146_v42  ;;  %2673 = vrot.lane.b32.xlu0 %v3947_v47, %s4154_s10  ;;  %2536 = vmatprep.subr.mxu0 %v2471_v46 }
 0x2e7   : > { %2924 = vrot.lane.b32.xlu1 %v3943_v34, %s4155_s16  ;;  %2251 = vmatpush1.msra.mxu1 %v2180_v15 }
 0x2e8   : > { %v2438_v63 = vpop.permute.xlu0 %2437 }
 0x2e9   : > { %v2470_v48 = vsel %vm2455_vm8, %v2438_v63, %v2440_v13  ;;  %v2140_v49 = vpop.permute.xlu1 %2139 }
 0x2ea   : > { %2926 = vrot.lane.b32.xlu0 %v3944_v39, %s4155_s16  ;;  %2537 = vmatpush1.msra.mxu0 %v2470_v48 }
 0x2eb   : > { %2669 = vrot.lane.b32.xlu1 %v3948_v50, %s4154_s10 }
 0x2ec   : > { %v2142_v1 = vpop.permute.xlu0 %2141 }
 0x2ed   : > { %v2434_v51 = vpop.permute.xlu1 %2433  ;;  %v2179_v52 = vsel %vm2167_vm7, %v2140_v49, %v2142_v1 }
 0x2ee   : > { %2922 = vrot.lane.b32.xlu0 %v3945_v43, %s4155_s16  ;;  %2252 = vmatprep.subr.mxu1 %v2179_v52 }
 0x2ef   : > { %2665 = vrot.lane.b32.xlu1 %v3949_v53, %s4154_s10 }
 0x2f0   : > { %v2436_v54 = vpop.permute.xlu0 %2435 }
 0x2f1   : > { %v2138_v2 = vpop.permute.xlu1 %2137  ;;  %v2469_v22 = vsel %vm2455_vm8, %v2434_v51, %v2436_v54 }
 0x2f2   : > { %v2178_v23 = vsel %vm2167_vm7, %v2138_v2, %v2140_v49  ;;  %2667 = vrot.lane.b32.xlu0 %v3950_v11, %s4154_s10  ;;  %2538 = vmatprep.subr.mxu0 %v2469_v22 }
 0x2f3   : > { %2918 = vrot.lane.b32.xlu1 %v3946_v44, %s4155_s16  ;;  %2253 = vmatpush1.msra.mxu1 %v2178_v23 }
 0x2f4   : > { %v2432_v24 = vpop.permute.xlu0 %2431 }
 0x2f5   : > { %v2468_v3 = vsel %vm2455_vm8, %v2432_v24, %v2434_v51  ;;  %v2134_v25 = vpop.permute.xlu1 %2133 }
 0x2f6   : > { %2920 = vrot.lane.b32.xlu0 %v3947_v47, %s4155_s16  ;;  %2539 = vmatpush1.msra.mxu0 %v2468_v3  ;;  %v2099_v3 = vld [vmem:[#allocation6 + $0x1c0] sm:$0xff] }
 0x2f7   : > { %2663 = vrot.lane.b32.xlu1 %v3951_v55, %s4154_s10 }
 0x2f8   : > { %v2136_v26 = vpop.permute.xlu0 %2135 }
 0x2f9   : > { %v2428_v27 = vpop.permute.xlu1 %2427  ;;  %v2177_v4 = vsel %vm2167_vm7, %v2134_v25, %v2136_v26 }
 0x2fa   : > { %2916 = vrot.lane.b32.xlu0 %v3948_v50, %s4155_s16  ;;  %2254 = vmatprep.subr.mxu1 %v2177_v4  ;;  %v2100_v4 = vld [vmem:[#allocation6 + $0x1c8] sm:$0xff] }
 0x2fb   : > { %2659 = vrot.lane.b32.xlu1 %v3952_v57, %s4154_s10 }
 0x2fc   : > { %v2430_v28 = vpop.permute.xlu0 %2429 }
 0x2fd   : > { %v2132_v16 = vpop.permute.xlu1 %2131  ;;  %v2467_v29 = vsel %vm2455_vm8, %v2428_v27, %v2430_v28 }
 0x2fe   : > { %v2176_v5 = vsel %vm2167_vm7, %v2132_v16, %v2134_v25  ;;  %2661 = vrot.lane.b32.xlu0 %v3953_v30, %s4154_s10  ;;  %2540 = vmatprep.subr.mxu0 %v2467_v29 }
 0x2ff   : > { %2912 = vrot.lane.b32.xlu1 %v3949_v53, %s4155_s16  ;;  %2255 = vmatpush1.msra.mxu1 %v2176_v5 }
 0x300   : > { %v2426_v9 = vpop.permute.xlu0 %2425 }
 0x301   : > { %v2466_v31 = vsel %vm2455_vm8, %v2426_v9, %v2428_v27  ;;  %v2128_v56 = vpop.permute.xlu1 %2127  ;;  %v2101_v9 = vld [vmem:[#allocation6 + $0x1d0] sm:$0xff] }
 0x302   : > { %2914 = vrot.lane.b32.xlu0 %v3950_v11, %s4155_s16  ;;  %2541 = vmatpush1.msra.mxu0 %v2466_v31  ;;  %v2387_v31 = vld [vmem:[#allocation6 + $0x140] sm:$0xff] }
 0x303   : > { %2657 = vrot.lane.b32.xlu1 %v3954_v6, %s4154_s10 }
 0x304   : > { %v2130_v32 = vpop.permute.xlu0 %2129 }
 0x305   : > { %v2422_v17 = vpop.permute.xlu1 %2421  ;;  %v2175_v33 = vsel %vm2167_vm7, %v2128_v56, %v2130_v32 }
 0x306   : > { %2910 = vrot.lane.b32.xlu0 %v3951_v55, %s4155_s16  ;;  %2256 = vmatprep.subr.mxu1 %v2175_v33  ;;  %v1125_v55 = vpop.f32.mrf.mxu0 }
 0x307   : > { %2653 = vrot.lane.b32.xlu1 %v3955_v8, %s4154_s10 }
 0x308   : > { %v2424_v12 = vpop.permute.xlu0 %2423  ;;  %v1127_v28 = vpop.f32.mrf.mxu0 }
 0x309   : > { %v2126_v34 = vpop.permute.xlu1 %2125  ;;  %v2465_v19 = vsel %vm2455_vm8, %v2422_v17, %v2424_v12 }
 0x30a   : > { %v2174_v58 = vsel %vm2167_vm7, %v2126_v34, %v2128_v56  ;;  %2655 = vrot.lane.b32.xlu0 %v3956_v36, %s4154_s10  ;;  %2542 = vmatprep.subr.mxu0 %v2465_v19  ;;  %v1131_v29 = vpop.f32.mrf.mxu0  ;;  %v2388_v19 = vld [vmem:[#allocation6 + $0x148] sm:$0xff] }
 0x30b   : > { %2906 = vrot.lane.b32.xlu1 %v3952_v57, %s4155_s16  ;;  %2257 = vmatpush1.msra.mxu1 %v2174_v58  ;;  %v1262_v57 = vpop.f32.mrf.mxu1 }
 0x30c   : > { %v2420_v18 = vpop.permute.xlu0 %2419  ;;  %v5225_v16 = vadd.f32 %v1262_v57, %v1125_v55  ;;  %v1133_v32 = vpop.f32.mrf.mxu0 }
 0x30d   : > { %v2464_v60 = vsel %vm2455_vm8, %v2420_v18, %v2422_v17  ;;  %v2122_v39 = vpop.permute.xlu1 %2121  ;;  %v1264_v56 = vpop.f32.mrf.mxu1 }
 0x30e   : > { %2908 = vrot.lane.b32.xlu0 %v3953_v30, %s4155_s16  ;;  %2543 = vmatpush1.msra.mxu0 %v2464_v60  ;;  %v1137_v12 = vpop.f32.mrf.mxu0 }
 0x30f   : > { %2651 = vrot.lane.b32.xlu1 %v3957_v59, %s4154_s10  ;;  %v1268_v17 = vpop.f32.mrf.mxu1 }
 0x310   : > { %v2124_v40 = vpop.permute.xlu0 %2123  ;;  %v1139_v18 = vpop.f32.mrf.mxu0 }
 0x311   : > { %v2416_v42 = vpop.permute.xlu1 %2415  ;;  %v2173_v43 = vsel %vm2167_vm7, %v2122_v39, %v2124_v40  ;;  %v1270_v58 = vpop.f32.mrf.mxu1 }
 0x312   : > { %2904 = vrot.lane.b32.xlu0 %v3954_v6, %s4155_s16  ;;  %2258 = vmatprep.subr.mxu1 %v2173_v43  ;;  %v5235_v6 = vadd.f32 %v1264_v56, %v1127_v28  ;;  %v1143_v40 = vpop.f32.mrf.mxu0  ;;  %v2103_v43 = vld [vmem:[#allocation6 + $0x1e0] sm:$0xff]  ;;  %v2106_v28 = vld [vmem:[#allocation6 + $0x1f8] sm:$0xff] }
 0x313   : > { %2647 = vrot.lane.b32.xlu1 %v5009_v10, %s4154_s10  ;;  %v1274_v60 = vpop.f32.mrf.mxu1 }
 0x314   : > { %v2418_v61 = vpop.permute.xlu0 %2417 }
 0x315   : > { %v2120_v13 = vpop.permute.xlu1 %2119  ;;  %v2463_v0 = vsel %vm2455_vm8, %v2416_v42, %v2418_v61  ;;  %v2389_v61 = vld [vmem:[#allocation6 + $0x150] sm:$0xff] }
 0x316   : > { %v2172_v44 = vsel %vm2167_vm7, %v2120_v13, %v2122_v39  ;;  %2649 = vrot.lane.b32.xlu0 %v3958_v62, %s4154_s10  ;;  %2544 = vmatprep.subr.mxu0 %v2463_v0  ;;  %v1145_v0 = vpop.f32.mrf.mxu0 }
 0x317   : > { %2900 = vrot.lane.b32.xlu1 %v3955_v8, %s4155_s16  ;;  %2259 = vmatpush1.msra.mxu1 %v2172_v44  ;;  %v5241_v8 = vadd.f32 %v1268_v17, %v1131_v29 }
 0x318   : > { %v2414_v45 = vpop.permute.xlu0 %2413 }
 0x319   : > { %v2462_v46 = vsel %vm2455_vm8, %v2414_v45, %v2416_v42  ;;  %v2116_v15 = vpop.permute.xlu1 %2115 }
 0x31a   : > { %2902 = vrot.lane.b32.xlu0 %v3956_v36, %s4155_s16  ;;  %2545 = vmatpush1.msra.mxu0 %v2462_v46  ;;  %v5248_v36 = vadd.f32 %v1270_v58, %v1133_v32  ;;  %v1149_v46 = vpop.f32.mrf.mxu0  ;;  %v3173_v32 = vld [vmem:[%s5735_s3 + $0x38] sm:$0xff]  ;;  %v4156_v58 = vmov 0  }
 0x31b   : > { %2645 = vrot.lane.b32.xlu1 %v5023_v37, %s4154_s10  ;;  %3927 = vset.pattern.permute.xlu0 %v4156_v58 }
 0x31c   : > { %v2118_v47 = vpop.permute.xlu0 %2117  ;;  %3928 = vset.pattern.permute.xlu1 %v4156_v58 }
 0x31d   : > { %v2410_v63 = vpop.permute.xlu1 %2409  ;;  %v2171_v48 = vsel %vm2167_vm7, %v2116_v15, %v2118_v47 }
 0x31e   : > { %2898 = vrot.lane.b32.xlu0 %v3957_v59, %s4155_s16  ;;  %2260 = vmatprep.subr.mxu1 %v2171_v48  ;;  %v5254_v59 = vadd.f32 %v1274_v60, %v1137_v12  ;;  %v2390_v48 = vld [vmem:[#allocation6 + $0x158] sm:$0xff]  ;;  %v2393_v12 = vld [vmem:[#allocation6 + $0x170] sm:$0xff] }
 0x31f   : > { %2641 = vrot.lane.b32.xlu1 %v5037_v41, %s4154_s10 }
 0x320   : > { %v2412_v49 = vpop.permute.xlu0 %2411 }
 0x321   : > { %v2114_v50 = vpop.permute.xlu1 %2113  ;;  %v2461_v1 = vsel %vm2455_vm8, %v2410_v63, %v2412_v49 }
 0x322   : > { %v2170_v51 = vsel %vm2167_vm7, %v2114_v50, %v2116_v15  ;;  %2643 = vrot.lane.b32.xlu0 %v5045_v14, %s4154_s10  ;;  %2546 = vmatprep.subr.mxu0 %v2461_v1  ;;  %v1151_v1 = vpop.f32.mrf.mxu0 }
 0x323   : > { %2894 = vrot.lane.b32.xlu1 %v5009_v10, %s4155_s16  ;;  %2261 = vmatpush1.msra.mxu1 %v2170_v51 }
 0x324   : > { %v2408_v52 = vpop.permute.xlu0 %2407 }
 0x325   : > { %v2460_v53 = vsel %vm2455_vm8, %v2408_v52, %v2410_v63  ;;  %v2110_v54 = vpop.permute.xlu1 %2109  ;;  %v2104_v63 = vld [vmem:[#allocation6 + $0x1e8] sm:$0xff] }
 0x326   : > { %2896 = vrot.lane.b32.xlu0 %v3958_v62, %s4155_s16  ;;  %2547 = vmatpush1.msra.mxu0 %v2460_v53 }
 0x327   : > { %2639 = vrot.lane.b32.xlu1 %v5017_v35, %s4154_s10 }
 0x328   : > { %v2112_v2 = vpop.permute.xlu0 %2111 }
 0x329   : > { %v2404_v22 = vpop.permute.xlu1 %2403  ;;  %v2169_v23 = vsel %vm2167_vm7, %v2110_v54, %v2112_v2 }
 0x32a   : > { %2892 = vrot.lane.b32.xlu0 %v5023_v37, %s4155_s16  ;;  %2262 = vmatprep.subr.mxu1 %v2169_v23  ;;  %v2105_v23 = vld [vmem:[#allocation6 + $0x1f0] sm:$0xff] }
 0x32b   : > { %2635 = vrot.lane.b32.xlu1 %v5028_v38, %s4154_s10 }
 0x32c   : > { %v2406_v10 = vpop.permute.xlu0 %2405 }
 0x32d   : > { %v2108_v11 = vpop.permute.xlu1 %2107  ;;  %v2459_v24 = vsel %vm2455_vm8, %v2404_v22, %v2406_v10  ;;  %v2391_v10 = vld [vmem:[#allocation6 + $0x160] sm:$0xff] }
 0x32e   : > { %v2168_v25 = vsel %vm2167_vm7, %v2108_v11, %v2110_v54  ;;  %2637 = vrot.lane.b32.xlu0 %v5067_v7, %s4154_s10  ;;  %2548 = vmatprep.subr.mxu0 %v2459_v24  ;;  %v1155_v54 = vpop.f32.mrf.mxu0 }
 0x32f   : > { %2888 = vrot.lane.b32.xlu1 %v5037_v41, %s4155_s16  ;;  %2263 = vmatpush1.msra.mxu1 %v2168_v25 }
 0x330   : > { %v2402_v37 = vpop.permute.xlu0 %2401  ;;  %3674 = vmatmul.mubr.msk.f32.vlgmr.msra.gmra.mxu1 %vm1034_vm2, %v2099_v3  ;;  %v1157_v25 = vpop.f32.mrf.mxu0 }
 0x331   : > { %v2458_v26 = vsel %vm2455_vm8, %v2402_v37, %v2404_v22  ;;  %v2398_v27 = vpop.permute.xlu1 %2397  ;;  %2302 = vmatprep.mubr.f32.mxu1 %v5742_v21 }
 0x332   : > { %2890 = vrot.lane.b32.xlu0 %v5045_v14, %s4155_s16  ;;  %2549 = vmatpush1.msra.mxu0 %v2458_v26 }
 0x333   : > { %2633 = vrot.lane.b32.xlu1 %v5050_v20, %s4154_s10  ;;  %s4043_s10 = scalar_lea.vmem %s4042_s20, 4096 }
 0x334   : > { %v2400_v41 = vpop.permute.xlu0 %2399  ;;  %3675 = vmatmul.mubr.msk.f32.gmra.mxu1 %vm1034_vm2, %v2100_v4 }
 0x335   : > { %v2396_v5 = vpop.permute.xlu1 %2395  ;;  %v2457_v30 = vsel %vm2455_vm8, %v2398_v27, %v2400_v41  ;;  %2308 = vmatprep.mubr.f32.mxu1 %v5742_v21  ;;  %v2392_v41 = vld [vmem:[#allocation6 + $0x168] sm:$0xff] }
 0x336   : > { %v2456_v14 = vsel %vm2455_vm8, %v2396_v5, %v2398_v27  ;;  %2886 = vrot.lane.b32.xlu0 %v5017_v35, %s4155_s16  ;;  %2550 = vmatprep.subr.mxu0 %v2457_v30  ;;  %v2102_v35 = vld [vmem:[#allocation6 + $0x1d8] sm:$0xff]  ;;  %v1161_v27 = vpop.f32.mrf.mxu0 }
 0x337   : > { %2882 = vrot.lane.b32.xlu1 %v5028_v38, %s4155_s16  ;;  %2551 = vmatpush1.msra.mxu0 %v2456_v14 }
 0x338   : > { %v2690_v33 = vpop.permute.xlu0 %2689  ;;  %3676 = vmatmul.mubr.msk.f32.gmra.mxu1 %vm1034_vm2, %v2101_v9  ;;  %3682 = vmatmul.mubr.msk.f32.vlgmr.msra.gmra.mxu0 %vm1034_vm2, %v2387_v31  ;;  %v1163_v30 = vpop.f32.mrf.mxu0 }
 0x339   : > { %v2692_v34 = vpop.permute.xlu1 %2691  ;;  %2314 = vmatprep.mubr.f32.mxu1 %v5742_v21  ;;  %2590 = vmatprep.mubr.f32.mxu0 %v5742_v21 }
 0x33a   : > { %2884 = vrot.lane.b32.xlu0 %v5067_v7, %s4155_s16  ;;  %v2713_v38 = vsel %vm2693_vm9, %v2690_v33, %v2692_v34  ;;  %v1167_v14 = vpop.f32.mrf.mxu0 }
 0x33b   : > { %2880 = vrot.lane.b32.xlu1 %v5050_v20, %s4155_s16  ;;  %2770 = vmatprep.subr.mxu1 %v2713_v38  ;;  %v1276_v20 = vpop.f32.mrf.mxu1  ;;  %s3715_s16 = sshll.u32 %s4121_s24, 1  ;;  %s3472_s24 = sshll.u32 %s4335_s13, 4  ;;  %s5675_s24 = int_to_ptr.vmem [resolvable:$true] %s3472_s24 }
 0x33c   : > { %v2688_v39 = vpop.permute.xlu0 %2687  ;;  %3677 = vmatmul.mubr.msk.f32.gmra.mxu1 %vm1034_vm2, %v2102_v35  ;;  %3683 = vmatmul.mubr.msk.f32.gmra.mxu0 %vm1034_vm2, %v2388_v19  ;;  %v5259_v13 = vadd.f32 %v1276_v20, %v1139_v18  ;;  %v1169_v19 = vpop.f32.mrf.mxu0  ;;  %s3469_s8 = sadd.s32 %s3716_s14, %s3715_s16  ;;  %s4037_s9 = scalar_lea.vmem %s5675_s24, 2048 }
 0x33d   : > { %v2712_v7 = vsel %vm2693_vm9, %v2688_v39, %v2690_v33  ;;  %v2684_v42 = vpop.permute.xlu1 %2683  ;;  %2320 = vmatprep.mubr.f32.mxu1 %v5742_v21  ;;  %2596 = vmatprep.mubr.f32.mxu0 %v5742_v21  ;;  %v1280_v44 = vpop.f32.mrf.mxu1  ;;  %s3717_s7 = sshll.u32 %s3469_s8, 7  ;;  %p4038_p12 = scmp.ne.s32.totalorder %s5675_s24, %s4037_s9 }
 0x33e   : > { %2771 = vmatpush1.msra.mxu1 %v2712_v7  ;;  %v5263_v45 = vadd.f32 %v1280_v44, %v1143_v40  ;;  %3211 = vperm.xlu0 %3927, %v3173_v32   ;;  %v1509_v39 = vpop.f32.mrf.mxu0  ;;  %s5673_s15 = scalar_lea.hbm %s5738_s6, %s3717_s7  ;;  %p4044_p11 = scmp.lt.s32.totalorder %s5675_s24, %s4042_s20 }
 0x33f   : > { %v1282_v49 = vpop.f32.mrf.mxu1  ;;  %p4039_p1 = pnand %p4038_p12, %p4248_p3  ;;  %p4045_p13 = scmp.lt.s32.totalorder %s4043_s10, %s4037_s9 }
 0x340   : > { %v2686_v62 = vpop.permute.xlu0 %2685  ;;  %3678 = vmatmul.mubr.msk.f32.gmra.mxu1 %vm1034_vm2, %v2103_v43  ;;  %3684 = vmatmul.mubr.msk.f32.gmra.mxu0 %vm1034_vm2, %v2389_v61  ;;  %v5268_v50 = vadd.f32 %v1282_v49, %v1145_v0  ;;  %v5307_v61 = vadd.f32 %v1509_v39, %v5225_v16  ;;  %v1511_v44 = vpop.f32.mrf.mxu0 }
 0x341   : > { %v2937_v15 = vpop.permute.xlu1 %2936  ;;  %v2711_v47 = vsel %vm2693_vm9, %v2684_v42, %v2686_v62  ;;  %2326 = vmatprep.mubr.f32.mxu1 %v5742_v21  ;;  %2602 = vmatprep.mubr.f32.mxu0 %v5742_v21  ;;  %v1286_v51 = vpop.f32.mrf.mxu1  ;;  %v5313_v62 = vadd.f32 %v1511_v44, %v5235_v6  ;;  %v3168_v44 = vld [vmem:[%s5735_s3 + $0x10] sm:$0xff]  ;;  %p4040_p9 = pneg %p4039_p1  ;;  %p4046_p2 = por %p4045_p13, %p4044_p11 }
 0x342   : > { %2772 = vmatprep.subr.mxu1 %v2711_v47  ;;  %v5272_v53 = vadd.f32 %v1286_v51, %v1149_v46 }
 0x343   : > { %v1288_v11 = vpop.f32.mrf.mxu1  ;;  %p4047_p4 = pnand %p4046_p2, %p4040_p9 }
 0x344   : > { %v2939_v52 = vpop.permute.xlu0 %2938  ;;  %3679 = vmatmul.mubr.msk.f32.gmra.mxu1 %vm1034_vm2, %v2104_v63  ;;  %3685 = vmatmul.mubr.msk.f32.gmra.mxu0 %vm1034_vm2, %v2390_v48  ;;  %v5278_v3 = vadd.f32 %v1288_v11, %v1151_v1 }
 0x345   : > { %v2682_v2 = vpop.permute.xlu1 %2681  ;;  %v2960_v22 = vsel %vm2940_vm10, %v2937_v15, %v2939_v52  ;;  %2332 = vmatprep.mubr.f32.mxu1 %v5742_v21  ;;  %2608 = vmatprep.mubr.f32.mxu0 %v5742_v21  ;;  %v1292_v37 = vpop.f32.mrf.mxu1 }
 0x346   : > { %v2710_v24 = vsel %vm2693_vm9, %v2682_v2, %v2684_v42  ;;  %3017 = vmatprep.subr.mxu0 %v2960_v22  ;;  %v5282_v26 = vadd.f32 %v1292_v37, %v1155_v54  ;;  %v2394_v42 = vld [vmem:[#allocation6 + $0x178] sm:$0xff] }
 0x347   : > { %2773 = vmatpush1.msra.mxu1 %v2710_v24  ;;  %v1294_v29 = vpop.f32.mrf.mxu1 }
 0x348   : > { %v2935_v55 = vpop.permute.xlu0 %2934  ;;  %3680 = vmatmul.mubr.msk.f32.gmra.mxu1 %vm1034_vm2, %v2105_v23  ;;  %3686 = vmatmul.mubr.msk.f32.gmra.mxu0 %vm1034_vm2, %v2391_v10  ;;  %v5287_v5 = vadd.f32 %v1294_v29, %v1157_v25 }
 0x349   : > { %v2959_v4 = vsel %vm2940_vm10, %v2935_v55, %v2937_v15  ;;  %v2678_v57 = vpop.permute.xlu1 %2677  ;;  %2338 = vmatprep.mubr.f32.mxu1 %v5742_v21  ;;  %2614 = vmatprep.mubr.f32.mxu0 %v5742_v21  ;;  %v1298_v9 = vpop.f32.mrf.mxu1 }
 0x34a   : > { %3018 = vmatpush1.msra.mxu0 %v2959_v4  ;;  %v5291_v56 = vadd.f32 %v1298_v9, %v1161_v27  ;;  %v1515_v15 = vpop.f32.mrf.mxu0 }
 0x34b   : > { %v1300_v34 = vpop.f32.mrf.mxu1  ;;  %v5319_v16 = vadd.f32 %v1515_v15, %v5241_v8 }
 0x34c   : > { %v2680_v31 = vpop.permute.xlu0 %2679  ;;  %3681 = vmatmul.mubr.msk.f32.gmra.mxu1 %vm1034_vm2, %v2106_v28  ;;  %3687 = vmatmul.mubr.msk.f32.gmra.mxu0 %vm1034_vm2, %v2392_v41  ;;  %v5299_v35 = vadd.f32 %v1300_v34, %v1163_v30  ;;  %v1517_v48 = vpop.f32.mrf.mxu0 }
 0x34d   : > { %v2931_v17 = vpop.permute.xlu1 %2930  ;;  %v2709_v33 = vsel %vm2693_vm9, %v2678_v57, %v2680_v31  ;;  %2620 = vmatprep.mubr.f32.mxu0 %v5742_v21  ;;  %2822 = vmatprep.mubr.f32.mxu1 %v5742_v21  ;;  %v1304_v38 = vpop.f32.mrf.mxu1  ;;  %v5322_v49 = vadd.f32 %v1517_v48, %v5248_v36 }
 0x34e   : > { %2774 = vmatprep.subr.mxu1 %v2709_v33  ;;  %v5302_v60 = vadd.f32 %v1304_v38, %v1167_v14  ;;  %v1521_v6 = vpop.f32.mrf.mxu0 }
 0x34f   : > { %v1306_v43 = vpop.f32.mrf.mxu1  ;;  %v5326_v54 = vadd.f32 %v1521_v6, %v5254_v59  ;;  %v3166_v6 = vld [vmem:[%s5735_s3] sm:$0xff] }
 0x350   : > { %v2933_v18 = vpop.permute.xlu0 %2932  ;;  %3688 = vmatmul.mubr.msk.f32.gmra.mxu0 %vm1034_vm2, %v2393_v12  ;;  %v5310_v0 = vadd.f32 %v1306_v43, %v1169_v19  ;;  %v1523_v2 = vpop.f32.mrf.mxu0 }
 0x351   : > { %v2676_v40 = vpop.permute.xlu1 %2675  ;;  %v2958_v7 = vsel %vm2940_vm10, %v2931_v17, %v2933_v18  ;;  %2626 = vmatprep.mubr.f32.mxu0 %v5742_v21  ;;  %v5329_v22 = vadd.f32 %v1523_v2, %v5259_v13 }
 0x352   : > { %v2708_v20 = vsel %vm2693_vm9, %v2676_v40, %v2678_v57  ;;  %3019 = vmatprep.subr.mxu0 %v2958_v7  ;;  %v1527_v23 = vpop.f32.mrf.mxu0 }
 0x353   : > { %2775 = vmatpush1.msra.mxu1 %v2708_v20  ;;  %v5333_v36 = vadd.f32 %v1527_v23, %v5263_v45 }
 0x354   : > { %v2929_v46 = vpop.permute.xlu0 %2928  ;;  %3689 = vmatmul.mubr.msk.f32.gmra.mxu0 %vm1034_vm2, %v2394_v42  ;;  %v1529_v25 = vpop.f32.mrf.mxu0  ;;  %v3172_v42 = vld [vmem:[%s5735_s3 + $0x30] sm:$0xff] }
 0x355   : > { %v2957_v47 = vsel %vm2940_vm10, %v2929_v46, %v2931_v17  ;;  %v2672_v63 = vpop.permute.xlu1 %2671  ;;  %3069 = vmatprep.mubr.f32.mxu0 %v5742_v21  ;;  %v5337_v59 = vadd.f32 %v1529_v25, %v5268_v50  ;;  %3206 = vperm.xlu1 %3928, %v3172_v42   ;;  %v3171_v46 = vld [vmem:[%s5735_s3 + $0x28] sm:$0xff] }
 0x356   : > { %3020 = vmatpush1.msra.mxu0 %v2957_v47  ;;  %v1533_v55 = vpop.f32.mrf.mxu0 }
 0x357   : > { %v5341_v4 = vadd.f32 %v1533_v55, %v5272_v53 }
 0x358   : > { %v2674_v1 = vpop.permute.xlu0 %2673  ;;  %v1535_v57 = vpop.f32.mrf.mxu0 }
 0x359   : > { %v2925_v51 = vpop.permute.xlu1 %2924  ;;  %v2707_v52 = vsel %vm2693_vm9, %v2672_v63, %v2674_v1  ;;  %v5344_v45 = vadd.f32 %v1535_v57, %v5278_v3  ;;  %3201 = vperm.xlu1 %3928, %v3171_v46   ;;  %v3255_v46 = vld [vmem:[%s5737_s5 + $0x8] sm:$0xff] }
 0x35a   : > { %2776 = vmatprep.subr.mxu1 %v2707_v52  ;;  %v1539_v41 = vpop.f32.mrf.mxu0 }
 0x35b   : > { %v5348_v50 = vadd.f32 %v1539_v41, %v5282_v26 }
 0x35c   : > { %v2927_v8 = vpop.permute.xlu0 %2926  ;;  %v1541_v9 = vpop.f32.mrf.mxu0 }
 0x35d   : > { %v2670_v10 = vpop.permute.xlu1 %2669  ;;  %v2956_v11 = vsel %vm2940_vm10, %v2925_v51, %v2927_v8  ;;  %v5351_v31 = vadd.f32 %v1541_v9, %v5287_v5 }
 0x35e   : > { %v2706_v24 = vsel %vm2693_vm9, %v2670_v10, %v2672_v63  ;;  %3021 = vmatprep.subr.mxu0 %v2956_v11  ;;  %v1545_v14 = vpop.f32.mrf.mxu0  ;;  %v3167_v11 = vld [vmem:[%s5735_s3 + $0x8] sm:$0xff] }
 0x35f   : > { %2777 = vmatpush1.msra.mxu1 %v2706_v24  ;;  %v5355_v3 = vadd.f32 %v1545_v14, %v5291_v56 }
 0x360   : > { %v2923_v37 = vpop.permute.xlu0 %2922  ;;  %v1547_v12 = vpop.f32.mrf.mxu0 }
 0x361   : > { %v2955_v13 = vsel %vm2940_vm10, %v2923_v37, %v2925_v51  ;;  %v2666_v27 = vpop.permute.xlu1 %2665  ;;  %v5359_v26 = vadd.f32 %v1547_v12, %v5299_v35  ;;  %v3170_v35 = vld [vmem:[%s5735_s3 + $0x20] sm:$0xff]  ;;  %v3169_v51 = vld [vmem:[%s5735_s3 + $0x18] sm:$0xff] }
 0x362   : > { %3022 = vmatpush1.msra.mxu0 %v2955_v13  ;;  %v1551_v19 = vpop.f32.mrf.mxu0  ;;  %3196 = vperm.xlu0 %3927, %v3170_v35  }
 0x363   : > { %v5363_v38 = vadd.f32 %v1551_v19, %v5302_v60  ;;  %3191 = vperm.xlu1 %3928, %v3169_v51  }
 0x364   : > { %v2668_v28 = vpop.permute.xlu0 %2667  ;;  %v1553_v18 = vpop.f32.mrf.mxu0 }
 0x365   : > { %v2919_v29 = vpop.permute.xlu1 %2918  ;;  %v2705_v30 = vsel %vm2693_vm9, %v2666_v27, %v2668_v28  ;;  %v5366_v56 = vadd.f32 %v1553_v18, %v5310_v0 }
 0x366   : > { %2778 = vmatprep.subr.mxu1 %v2705_v30  ;;  %3186 = vperm.xlu0 %3927, %v3168_v44  }
 0x367   : > { %3181 = vperm.xlu1 %3928, %v3167_v11  }
 0x368   : > { %v2921_v53 = vpop.permute.xlu0 %2920 }
 0x369   : > { %v2664_v32 = vpop.permute.xlu1 %2663  ;;  %v2954_v17 = vsel %vm2940_vm10, %v2919_v29, %v2921_v53 }
 0x36a   : > { %v2704_v33 = vsel %vm2693_vm9, %v2664_v32, %v2666_v27  ;;  %3023 = vmatprep.subr.mxu0 %v2954_v17  ;;  %3176 = vperm.xlu0 %3927, %v3166_v6  }
 0x36b   : > { %2779 = vmatpush1.msra.mxu1 %v2704_v33 }
 0x36c   : > { %v2917_v34 = vpop.permute.xlu0 %2916 }
 0x36d   : > { %v2953_v5 = vsel %vm2940_vm10, %v2917_v34, %v2919_v29  ;;  %v2660_v58 = vpop.permute.xlu1 %2659 }
 0x36e   : > { %3024 = vmatpush1.msra.mxu0 %v2953_v5  ;;  %3269 = vperm.xlu0 %3927, %v3255_v46  }
 0x370   : > { %v2662_v39 = vpop.permute.xlu0 %2661 }
 0x371   : > { %v2913_v40 = vpop.permute.xlu1 %2912  ;;  %v2703_v7 = vsel %vm2693_vm9, %v2660_v58, %v2662_v39 }
 0x372   : > { %2780 = vmatprep.subr.mxu1 %v2703_v7 }
 0x374   : > { %v2915_v60 = vpop.permute.xlu0 %2914 }
 0x375   : > { %v2658_v43 = vpop.permute.xlu1 %2657  ;;  %v2952_v20 = vsel %vm2940_vm10, %v2913_v40, %v2915_v60 }
 0x376   : > { %v2702_v0 = vsel %vm2693_vm9, %v2658_v43, %v2660_v58  ;;  %3025 = vmatprep.subr.mxu0 %v2952_v20 }
 0x377   : > { %2781 = vmatpush1.msra.mxu1 %v2702_v0 }
 0x378   : > { %v2911_v15 = vpop.permute.xlu0 %2910  ;;  %v1813_v47 = vpop.f32.mrf.mxu1 }
 0x379   : > { %v2951_v63 = vsel %vm2940_vm10, %v2911_v15, %v2913_v40  ;;  %v2654_v48 = vpop.permute.xlu1 %2653  ;;  %v3254_v15 = vld [vmem:[%s5737_s5] sm:$0xff] }
 0x37a   : > { %3026 = vmatpush1.msra.mxu0 %v2951_v63  ;;  %v1815_v1 = vpop.f32.mrf.mxu1  ;;  %3264 = vperm.xlu1 %3928, %v3254_v15  }
 0x37c   : > { %v2656_v52 = vpop.permute.xlu0 %2655  ;;  %v1819_v2 = vpop.f32.mrf.mxu1 }
 0x37d   : > { %v2907_v8 = vpop.permute.xlu1 %2906  ;;  %v2701_v23 = vsel %vm2693_vm9, %v2654_v48, %v2656_v52 }
 0x37e   : > { %2782 = vmatprep.subr.mxu1 %v2701_v23  ;;  %v1821_v10 = vpop.f32.mrf.mxu1  ;;  %v3257_v23 = vld [vmem:[%s5737_s5 + $0x18] sm:$0xff] }
 0x37f   : > { %3279 = vperm.xlu0 %3927, %v3257_v23  }
 0x380   : > { %v2909_v24 = vpop.permute.xlu0 %2908  ;;  %v1825_v25 = vpop.f32.mrf.mxu1 }
 0x381   : > { %v2652_v37 = vpop.permute.xlu1 %2651  ;;  %v2950_v55 = vsel %vm2940_vm10, %v2907_v8, %v2909_v24  ;;  %v2051_v13 = vpop.f32.mrf.mxu0 }
 0x382   : > { %v2700_v27 = vsel %vm2693_vm9, %v2652_v37, %v2654_v48  ;;  %3027 = vmatprep.subr.mxu0 %v2950_v55  ;;  %v1827_v57 = vpop.f32.mrf.mxu1  ;;  %v5396_v28 = vadd.f32 %v2051_v13, %v1813_v47 }
 0x383   : > { %2783 = vmatpush1.msra.mxu1 %v2700_v27  ;;  %v2053_v41 = vpop.f32.mrf.mxu0  ;;  %v3258_v27 = vld [vmem:[%s5737_s5 + $0x20] sm:$0xff] }
 0x384   : > { %v2905_v29 = vpop.permute.xlu0 %2904  ;;  %v1831_v30 = vpop.f32.mrf.mxu1  ;;  %v5398_v9 = vadd.f32 %v2053_v41, %v1815_v1 }
 0x385   : > { %v2949_v53 = vsel %vm2940_vm10, %v2905_v29, %v2907_v8  ;;  %v2648_v14 = vpop.permute.xlu1 %2647  ;;  %v2057_v32 = vpop.f32.mrf.mxu0 }
 0x386   : > { %3028 = vmatpush1.msra.mxu0 %v2949_v53  ;;  %v1833_v17 = vpop.f32.mrf.mxu1  ;;  %v5401_v33 = vadd.f32 %v2057_v32, %v1819_v2 }
 0x387   : > { %v2059_v12 = vpop.f32.mrf.mxu0 }
 0x388   : > { %v2650_v34 = vpop.permute.xlu0 %2649  ;;  %v1837_v19 = vpop.f32.mrf.mxu1  ;;  %v5403_v5 = vadd.f32 %v2059_v12, %v1821_v10  ;;  %v3256_v10 = vld [vmem:[%s5737_s5 + $0x10] sm:$0xff] }
 0x389   : > { %v2901_v58 = vpop.permute.xlu1 %2900  ;;  %v2699_v18 = vsel %vm2693_vm9, %v2648_v14, %v2650_v34  ;;  %v2063_v39 = vpop.f32.mrf.mxu0  ;;  %3274 = vperm.xlu1 %3928, %v3256_v10   ;;  %v3260_v34 = vld [vmem:[%s5737_s5 + $0x30] sm:$0xff] }
 0x38a   : > { %2784 = vmatprep.subr.mxu1 %v2699_v18  ;;  %v1839_v40 = vpop.f32.mrf.mxu1  ;;  %v5406_v7 = vadd.f32 %v2063_v39, %v1825_v25  ;;  %v3259_v25 = vld [vmem:[%s5737_s5 + $0x28] sm:$0xff] }
 0x38b   : > { %v2065_v35 = vpop.f32.mrf.mxu0  ;;  %3289 = vperm.xlu0 %3927, %v3259_v25  }
 0x38c   : > { %v2903_v42 = vpop.permute.xlu0 %2902  ;;  %v1843_v60 = vpop.f32.mrf.mxu1  ;;  %v5408_v43 = vadd.f32 %v2065_v35, %v1827_v57 }
 0x38d   : > { %v2646_v20 = vpop.permute.xlu1 %2645  ;;  %v2948_v0 = vsel %vm2940_vm10, %v2901_v58, %v2903_v42  ;;  %v2069_v44 = vpop.f32.mrf.mxu0  ;;  %3284 = vperm.xlu1 %3928, %v3258_v27  }
 0x38e   : > { %v2698_v47 = vsel %vm2693_vm9, %v2646_v20, %v2648_v14  ;;  %3029 = vmatprep.subr.mxu0 %v2948_v0  ;;  %v5418_v63 = vadd.f32 %v2069_v44, %v1831_v30  ;;  %v1845_v6 = vpop.f32.mrf.mxu1  ;;  %v3261_v14 = vld [vmem:[%s5737_s5 + $0x38] sm:$0xff] }
 0x38f   : > { %2785 = vmatpush1.msra.mxu1 %v2698_v47  ;;  %v2071_v48 = vpop.f32.mrf.mxu0  ;;  %3299 = vperm.xlu0 %3927, %v3261_v14   ;;  %v2381_v14 = vld [vmem:[#allocation6 + $0x98] sm:$0xff] }
 0x390   : > { %v2899_v1 = vpop.permute.xlu0 %2898  ;;  %v5420_v51 = vadd.f32 %v2071_v48, %v1833_v17  ;;  %v1849_v55 = vpop.f32.mrf.mxu1 }
 0x391   : > { %v2947_v52 = vsel %vm2940_vm10, %v2899_v1, %v2901_v58  ;;  %v2642_v2 = vpop.permute.xlu1 %2641  ;;  %v2075_v8 = vpop.f32.mrf.mxu0  ;;  %3294 = vperm.xlu1 %3928, %v3260_v34   ;;  %v2874_v34 = vld [vmem:[#allocation6 + $0x210] sm:$0xff] }
 0x392   : > { %3030 = vmatpush1.msra.mxu0 %v2947_v52  ;;  %v5429_v11 = vadd.f32 %v2075_v8, %v1837_v19  ;;  %v1851_v17 = vpop.f32.mrf.mxu1  ;;  %v2378_v8 = vld [vmem:[#allocation6 + $0x80] sm:$0xff] }
 0x393   : > { %v2077_v24 = vpop.f32.mrf.mxu0 }
 0x394   : > { %v2644_v37 = vpop.permute.xlu0 %2643  ;;  %v5434_v13 = vadd.f32 %v2077_v24, %v1839_v40 }
 0x395   : > { %v2895_v57 = vpop.permute.xlu1 %2894  ;;  %v2697_v41 = vsel %vm2693_vm9, %v2642_v2, %v2644_v37  ;;  %v2081_v29 = vpop.f32.mrf.mxu0  ;;  %v2379_v37 = vld [vmem:[#allocation6 + $0x88] sm:$0xff] }
 0x396   : > { %2786 = vmatprep.subr.mxu1 %v2697_v41  ;;  %v5440_v30 = vadd.f32 %v2081_v29, %v1843_v60  ;;  %v1855_v60 = vpop.f32.mrf.mxu1  ;;  %v2380_v41 = vld [vmem:[#allocation6 + $0x90] sm:$0xff]  ;;  %v2872_v29 = vld [vmem:[#allocation6 + $0x200] sm:$0xff] }
 0x397   : > { %v2083_v53 = vpop.f32.mrf.mxu0 }
 0x398   : > { %v2897_v32 = vpop.permute.xlu0 %2896  ;;  %v5445_v12 = vadd.f32 %v2083_v53, %v1845_v6 }
 0x399   : > { %v2640_v19 = vpop.permute.xlu1 %2639  ;;  %v2946_v58 = vsel %vm2940_vm10, %v2895_v57, %v2897_v32  ;;  %v2087_v18 = vpop.f32.mrf.mxu0  ;;  %v2873_v32 = vld [vmem:[#allocation6 + $0x208] sm:$0xff] }
 0x39a   : > { %v2696_v39 = vsel %vm2693_vm9, %v2640_v19, %v2642_v2  ;;  %3031 = vmatprep.subr.mxu0 %v2946_v58  ;;  %v5452_v40 = vadd.f32 %v2087_v18, %v1849_v55  ;;  %v2383_v19 = vld [vmem:[#allocation6 + $0xa8] sm:$0xff]  ;;  %v2875_v58 = vld [vmem:[#allocation6 + $0x218] sm:$0xff]  ;;  %v2384_v18 = vld [vmem:[#allocation6 + $0xb0] sm:$0xff] }
 0x39b   : > { %2787 = vmatpush1.msra.mxu1 %v2696_v39  ;;  %v2089_v35 = vpop.f32.mrf.mxu0  ;;  %v2876_v39 = vld [vmem:[#allocation6 + $0x220] sm:$0xff] }
 0x39c   : > { %v2893_v42 = vpop.permute.xlu0 %2892  ;;  %v5454_v20 = vadd.f32 %v2089_v35, %v1851_v17  ;;  %v2382_v17 = vld [vmem:[#allocation6 + $0xa0] sm:$0xff]  ;;  %v2385_v35 = vld [vmem:[#allocation6 + $0xb8] sm:$0xff] }
 0x39d   : > { %v2945_v0 = vsel %vm2940_vm10, %v2893_v42, %v2895_v57  ;;  %v2636_v44 = vpop.permute.xlu1 %2635  ;;  %v2093_v46 = vpop.f32.mrf.mxu0  ;;  %v2877_v42 = vld [vmem:[#allocation6 + $0x228] sm:$0xff] }
 0x39e   : > { %3032 = vmatpush1.msra.mxu0 %v2945_v0  ;;  %v5457_v15 = vadd.f32 %v2093_v46, %v1855_v60  ;;  %v2878_v60 = vld [vmem:[#allocation6 + $0x230] sm:$0xff]  ;;  %v2879_v0 = vld [vmem:[#allocation6 + $0x238] sm:$0xff] }
 0x3a0   : > { %v2638_v47 = vpop.permute.xlu0 %2637 }
 0x3a1   : > { %v2889_v48 = vpop.permute.xlu1 %2888  ;;  %v2695_v1 = vsel %vm2693_vm9, %v2636_v44, %v2638_v47 }
 0x3a2   : > { %2788 = vmatprep.subr.mxu1 %v2695_v1 }
 0x3a4   : > { %v2891_v6 = vpop.permute.xlu0 %2890 }
 0x3a5   : > { %v2634_v52 = vpop.permute.xlu1 %2633  ;;  %v2944_v2 = vsel %vm2940_vm10, %v2889_v48, %v2891_v6 }
 0x3a6   : > { %v2694_v23 = vsel %vm2693_vm9, %v2634_v52, %v2636_v44  ;;  %3033 = vmatprep.subr.mxu0 %v2944_v2  ;;  %v847_v44 = vlaneseq  ;;  %v1857_v52 = vpop.f32.mrf.mxu1 }
 0x3a7   : > { %2789 = vmatpush1.msra.mxu1 %v2694_v23 }
 0x3a8   : > { %3690 = vmatmul.mubr.msk.f32.vlgmr.msra.gmra.mxu1 %vm1034_vm2, %v2378_v8  ;;  %v2887_v10 = vpop.permute.xlu0 %2886  ;;  %v5496_v46 = vand.u32 127, %v847_v44 }
 0x3a9   : > { %v2943_v24 = vsel %vm2940_vm10, %v2887_v10, %v2889_v48  ;;  %v2883_v25 = vpop.permute.xlu1 %2882  ;;  %2828 = vmatprep.mubr.f32.mxu1 %v5742_v21 }
 0x3aa   : > { %3034 = vmatpush1.msra.mxu0 %v2943_v24  ;;  %v5499_v47 = vadd.s32 128, %v5496_v46  ;;  %v854_v48 = vand.u32 15, %v5496_v46 }
 0x3ac   : > { %3691 = vmatmul.mubr.msk.f32.gmra.mxu1 %vm1034_vm2, %v2379_v37  ;;  %v2885_v55 = vpop.permute.xlu0 %2884  ;;  %v861_v1 = vand.u32 15, %v5499_v47  ;;  %vm874_vm11 = vcmp.gt.s32.totalorder %v854_v48, 0  ;;  %vm880_vm13 = vcmp.lt.s32.totalorder %v854_v48, 15 }
 0x3ad   : > { %v2881_v27 = vpop.permute.xlu1 %2880  ;;  %2834 = vmatprep.mubr.f32.mxu1 %v5742_v21  ;;  %v2942_v57 = vsel %vm2940_vm10, %v2883_v25, %v2885_v55  ;;  %v3630_v6 = vsel %vm874_vm11, 1.0, %v5742_v21 }
 0x3ae   : > { %v2941_v53 = vsel %vm2940_vm10, %v2881_v27, %v2883_v25  ;;  %3035 = vmatprep.subr.mxu0 %v2942_v57  ;;  %vm875_vm12 = vcmp.gt.s32.totalorder %v861_v1, 0  ;;  %v1572_v8 = vmul.f32 %v3630_v6, %v5307_v61  ;;  %v1574_v37 = vmul.f32 %v3630_v6, %v5319_v16 }
 0x3af   : > { %3036 = vmatpush1.msra.mxu0 %v2941_v53  ;;  %v3631_v2 = vsel %vm875_vm12, 1.0, %v5742_v21  ;;  %vm881_vm14 = vcmp.lt.s32.totalorder %v861_v1, 15 }
 0x3b0   : > { %3692 = vmatmul.mubr.msk.f32.gmra.mxu1 %vm1034_vm2, %v2380_v41  ;;  %3698 = vmatmul.mubr.msk.f32.vlgmr.msra.gmra.mxu0 %vm1034_vm2, %v2872_v29  ;;  %v1573_v10 = vmul.f32 %v3631_v2, %v5313_v62  ;;  %v1575_v41 = vmul.f32 %v3631_v2, %v5322_v49  ;;  %v1577_v16 = vmul.f32 %v3631_v2, %v5329_v22 }
 0x3b1   : > { %2840 = vmatprep.mubr.f32.mxu1 %v5742_v21  ;;  %3075 = vmatprep.mubr.f32.mxu0 %v5742_v21  ;;  %v1578_v49 = vmul.f32 %v3630_v6, %v5333_v36  ;;  %v1580_v22 = vmul.f32 %v3630_v6, %v5341_v4  ;;  %v1581_v36 = vmul.f32 %v3631_v2, %v5344_v45 }
 0x3b2   : > { %v1583_v4 = vmul.f32 %v3631_v2, %v5351_v31  ;;  %v1584_v45 = vmul.f32 %v3630_v6, %v5355_v3 }
 0x3b4   : > { %3693 = vmatmul.mubr.msk.f32.gmra.mxu1 %vm1034_vm2, %v2381_v14  ;;  %3699 = vmatmul.mubr.msk.f32.gmra.mxu0 %vm1034_vm2, %v2873_v32  ;;  %v1576_v14 = vmul.f32 %v3630_v6, %v5326_v54  ;;  %v1579_v54 = vmul.f32 %v3631_v2, %v5337_v59  ;;  %v1582_v59 = vmul.f32 %v3630_v6, %v5348_v50  ;;  %v2095_v50 = vpop.f32.mrf.mxu0 }
 0x3b5   : > { %2846 = vmatprep.mubr.f32.mxu1 %v5742_v21  ;;  %3081 = vmatprep.mubr.f32.mxu0 %v5742_v21  ;;  %v2096_v3 = vadd.f32 %v2095_v50, %v1857_v52 }
 0x3b8   : > { %3694 = vmatmul.mubr.msk.f32.gmra.mxu1 %vm1034_vm2, %v2382_v17  ;;  %3700 = vmatmul.mubr.msk.f32.gmra.mxu0 %vm1034_vm2, %v2874_v34 }
 0x3b9   : > { %2852 = vmatprep.mubr.f32.mxu1 %v5742_v21  ;;  %3087 = vmatprep.mubr.f32.mxu0 %v5742_v21 }
 0x3bc   : > { %3695 = vmatmul.mubr.msk.f32.gmra.mxu1 %vm1034_vm2, %v2383_v19  ;;  %3701 = vmatmul.mubr.msk.f32.gmra.mxu0 %vm1034_vm2, %v2875_v58 }
 0x3bd   : > { %2858 = vmatprep.mubr.f32.mxu1 %v5742_v21  ;;  %3093 = vmatprep.mubr.f32.mxu0 %v5742_v21 }
 0x3c0   : > { %3696 = vmatmul.mubr.msk.f32.gmra.mxu1 %vm1034_vm2, %v2384_v18  ;;  %3702 = vmatmul.mubr.msk.f32.gmra.mxu0 %vm1034_vm2, %v2876_v39 }
 0x3c1   : > { %2864 = vmatprep.mubr.f32.mxu1 %v5742_v21  ;;  %3099 = vmatprep.mubr.f32.mxu0 %v5742_v21 }
 0x3c4   : > { %3697 = vmatmul.mubr.msk.f32.gmra.mxu1 %vm1034_vm2, %v2385_v35  ;;  %3703 = vmatmul.mubr.msk.f32.gmra.mxu0 %vm1034_vm2, %v2877_v42 }
 0x3c5   : > { %3105 = vmatprep.mubr.f32.mxu0 %v5742_v21  ;;  %3391 = vmatprep.mubr.f32.mxu1 %v5742_v21 }
 0x3c8   : > { %3704 = vmatmul.mubr.msk.f32.gmra.mxu0 %vm1034_vm2, %v2878_v60 }
 0x3c9   : > { %3111 = vmatprep.mubr.f32.mxu0 %v5742_v21 }
 0x3cc   : > { %3705 = vmatmul.mubr.msk.f32.gmra.mxu0 %vm1034_vm2, %v2879_v0 }
 0x3d0   : > { %v3207_v1 = vpop.permute.xlu1 %3206 }
 0x3f0   : > { %v2298_v23 = vpop.f32.mrf.mxu1 }
 0x3f1   : > { %v2345_v24 = vadd.f32 %v2298_v23, %v5396_v28 }
 0x3f2   : > { %v2300_v25 = vpop.f32.mrf.mxu1 }
 0x3f3   : > { %v5513_v55 = vadd.f32 %v2345_v24, %v1572_v8  ;;  %v2346_v27 = vadd.f32 %v2300_v25, %v5398_v9 }
 0x3f4   : > { %v2304_v57 = vpop.f32.mrf.mxu1 }
 0x3f5   : > { %5752 = vst [vmem:[#allocation15_spill] sm:$0xff] %v5513_v55  ;;  %v5517_v29 = vadd.f32 %v2346_v27, %v1573_v10  ;;  %v2347_v53 = vadd.f32 %v2304_v57, %v5401_v33  ;;  %v1586_v57 = vmul.f32 %v3630_v6, %v5363_v38  ;;  %v5593_v55 = vsel %vm880_vm13, 1.0, %v5742_v21 }
 0x3f6   : > { %v2306_v61 = vpop.f32.mrf.mxu1 }
 0x3f7   : > { %5753 = vst [vmem:[#allocation16_spill] sm:$0xff] %v5517_v29  ;;  %v5521_v62 = vadd.f32 %v2347_v53, %v1574_v37  ;;  %v2348_v28 = vadd.f32 %v2306_v61, %v5403_v5  ;;  %v1585_v37 = vmul.f32 %v3631_v2, %v5359_v26  ;;  %v1587_v61 = vmul.f32 %v3631_v2, %v5366_v56 }
 0x3f8   : > { %v2310_v32 = vpop.f32.mrf.mxu1 }
 0x3f9   : > { %5754 = vst [vmem:[#allocation17_spill] sm:$0xff] %v5521_v62  ;;  %v5525_v17 = vadd.f32 %v2348_v28, %v1575_v41  ;;  %v2349_v9 = vadd.f32 %v2310_v32, %v5406_v7 }
 0x3fa   : > { %v2312_v34 = vpop.f32.mrf.mxu1 }
 0x3fb   : > { %5755 = vst [vmem:[#allocation18_spill] sm:$0xff] %v5525_v17  ;;  %v5529_v19 = vadd.f32 %v2349_v9, %v1576_v14  ;;  %v2350_v33 = vadd.f32 %v2312_v34, %v5408_v43 }
 0x3fc   : > { %v2316_v58 = vpop.f32.mrf.mxu1 }
 0x3fd   : > { %5756 = vst [vmem:[#allocation19_spill] sm:$0xff] %v5529_v19  ;;  %v5533_v18 = vadd.f32 %v2350_v33, %v1577_v16  ;;  %v2351_v5 = vadd.f32 %v2316_v58, %v5418_v63  ;;  %v2586_v16 = vpop.f32.mrf.mxu0  ;;  %v5596_v19 = vsel %vm881_vm14, 1.0, %v5742_v21  ;;  %v3212_v21 = vpop.permute.xlu0 %3211 }
 0x3fe   : > { %v2318_v39 = vpop.f32.mrf.mxu1 }
 0x3ff   : > { %5757 = vst [vmem:[#allocation20_spill] sm:$0xff] %v5533_v18  ;;  %v5537_v35 = vadd.f32 %v2351_v5, %v1578_v49  ;;  %v2352_v7 = vadd.f32 %v2318_v39, %v5420_v51  ;;  %v2588_v38 = vpop.f32.mrf.mxu0 }
 0x400   : > { %v2322_v42 = vpop.f32.mrf.mxu1 }
 0x401   : > { %5758 = vst [vmem:[#allocation21_spill] sm:$0xff] %v5537_v35  ;;  %v5541_v60 = vadd.f32 %v2352_v7, %v1579_v54  ;;  %v2353_v43 = vadd.f32 %v2322_v42, %v5429_v11  ;;  %v2592_v6 = vpop.f32.mrf.mxu0 }
 0x402   : > { %v2324_v0 = vpop.f32.mrf.mxu1 }
 0x403   : > { %5759 = vst [vmem:[#allocation22_spill] sm:$0xff] %v5541_v60  ;;  %v5545_v44 = vadd.f32 %v2353_v43, %v1580_v22  ;;  %v2354_v63 = vadd.f32 %v2324_v0, %v5434_v13  ;;  %v2594_v9 = vpop.f32.mrf.mxu0 }
 0x404   : > { %v2328_v8 = vpop.f32.mrf.mxu1 }
 0x405   : > { %5760 = vst [vmem:[#allocation23_spill] sm:$0xff] %v5545_v44  ;;  %v5549_v23 = vadd.f32 %v2354_v63, %v1581_v36  ;;  %v2355_v51 = vadd.f32 %v2328_v8, %v5440_v30  ;;  %v5572_v34 = vpop.f32.mrf.mxu0 }
 0x406   : > { %v2330_v10 = vpop.f32.mrf.mxu1 }
 0x407   : > { %5761 = vst [vmem:[#allocation24_spill] sm:$0xff] %v5549_v23  ;;  %v5553_v24 = vadd.f32 %v2355_v51, %v1582_v59  ;;  %v2356_v11 = vadd.f32 %v2330_v10, %v5445_v12 }
 0x408   : > { %v2334_v25 = vpop.f32.mrf.mxu1 }
 0x409   : > { %5762 = vst [vmem:[#allocation25_spill] sm:$0xff] %v5553_v24  ;;  %v5557_v27 = vadd.f32 %v2356_v11, %v1583_v4  ;;  %v2357_v13 = vadd.f32 %v2334_v25, %v5452_v40 }
 0x40a   : > { %v2336_v31 = vpop.f32.mrf.mxu1 }
 0x40b   : > { %5763 = vst [vmem:[#allocation26_spill] sm:$0xff] %v5557_v27  ;;  %v5561_v41 = vadd.f32 %v2357_v13, %v1584_v45  ;;  %v2358_v30 = vadd.f32 %v2336_v31, %v5454_v20  ;;  %v5574_v20 = vpop.f32.mrf.mxu0 }
 0x40c   : > { %v2340_v53 = vpop.f32.mrf.mxu1 }
 0x40d   : > { %v5565_v12 = vadd.f32 %v2358_v30, %v1585_v37  ;;  %v2359_v14 = vadd.f32 %v2340_v53, %v5457_v15  ;;  %v5576_v52 = vpop.f32.mrf.mxu0 }
 0x40e   : > { %v2342_v26 = vpop.f32.mrf.mxu1 }
 0x40f   : > { %v5568_v28 = vadd.f32 %v2359_v14, %v1586_v57  ;;  %v2360_v32 = vadd.f32 %v2342_v26, %v2096_v3  ;;  %v2606_v56 = vpop.f32.mrf.mxu0 }
 0x411   : > { %v5570_v40 = vadd.f32 %v2360_v32, %v1587_v61  ;;  %v2610_v2 = vpop.f32.mrf.mxu0 }
 0x413   : > { %5764 = vst [vmem:[#allocation27_spill] sm:$0xff] %v5570_v40  ;;  %v2612_v49 = vpop.f32.mrf.mxu0 }
 0x415   : > { %v2616_v15 = vpop.f32.mrf.mxu0 }
 0x417   : > { %v2618_v33 = vpop.f32.mrf.mxu0 }
 0x419   : > { %v2622_v58 = vpop.f32.mrf.mxu0 }
 0x41b   : > { %v2624_v54 = vpop.f32.mrf.mxu0 }
 0x41d   : > { %v2628_v22 = vpop.f32.mrf.mxu0 }
 0x41f   : > { %v2630_v42 = vpop.f32.mrf.mxu0 }
 0x468   : > { %v2824_v5 = vpop.f32.mrf.mxu1 }
 0x469   : > { %v2825_v17 = vadd.f32 %v2824_v5, %v2586_v16 }
 0x46a   : > { %v2826_v39 = vpop.f32.mrf.mxu1 }
 0x46b   : > { %v2827_v60 = vadd.f32 %v2826_v39, %v2588_v38 }
 0x46c   : > { %v2830_v7 = vpop.f32.mrf.mxu1 }
 0x46d   : > { %v2831_v44 = vadd.f32 %v2830_v7, %v2592_v6 }
 0x46e   : > { %v2832_v36 = vpop.f32.mrf.mxu1 }
 0x46f   : > { %v2833_v27 = vadd.f32 %v2832_v36, %v2594_v9 }
 0x470   : > { %v2836_v43 = vpop.f32.mrf.mxu1  ;;  %v5578_v0 = vpop.f32.mrf.mxu0 }
 0x471   : > { %5765 = vst [vmem:[#allocation28_spill] sm:$0xff] %v5578_v0 }
 0x472   : > { %v2838_v59 = vpop.f32.mrf.mxu1  ;;  %v5580_v63 = vpop.f32.mrf.mxu0 }
 0x474   : > { %v2842_v8 = vpop.f32.mrf.mxu1  ;;  %v5582_v4 = vpop.f32.mrf.mxu0 }
 0x475   : > { %5766 = vst [vmem:[#allocation29_spill] sm:$0xff] %v5582_v4 }
 0x476   : > { %v2844_v51 = vpop.f32.mrf.mxu1  ;;  %v5584_v10 = vpop.f32.mrf.mxu0 }
 0x477   : > { %5767 = vst [vmem:[#allocation30_spill] sm:$0xff] %v5584_v10 }
 0x478   : > { %v2848_v45 = vpop.f32.mrf.mxu1  ;;  %v5586_v11 = vpop.f32.mrf.mxu0 }
 0x47a   : > { %v2850_v25 = vpop.f32.mrf.mxu1  ;;  %v3085_v50 = vpop.f32.mrf.mxu0 }
 0x47b   : > { %v2851_v23 = vadd.f32 %v2850_v25, %v2612_v49 }
 0x47c   : > { %v2854_v37 = vpop.f32.mrf.mxu1  ;;  %v3089_v13 = vpop.f32.mrf.mxu0 }
 0x47d   : > { %v2855_v46 = vadd.f32 %v2854_v37, %v2616_v15  ;;  %v2839_v15 = vadd.f32 %v2838_v59, %v5574_v20 }
 0x47e   : > { %v2856_v31 = vpop.f32.mrf.mxu1  ;;  %v3091_v57 = vpop.f32.mrf.mxu0  ;;  %v5768_v59 = vld [vmem:[#allocation30_spill] sm:$0xff] }
 0x47f   : > { %v2857_v18 = vadd.f32 %v2856_v31, %v2618_v33 }
 0x480   : > { %v2860_v30 = vpop.f32.mrf.mxu1  ;;  %v3095_v3 = vpop.f32.mrf.mxu0 }
 0x481   : > { %v2861_v29 = vadd.f32 %v2860_v30, %v2622_v58  ;;  %v2845_v58 = vadd.f32 %v2844_v51, %v2606_v56  ;;  %v2849_v30 = vadd.f32 %v2848_v45, %v2610_v2  ;;  %v5769_v51 = vld [vmem:[#allocation26_spill] sm:$0xff] }
 0x482   : > { %v2862_v53 = vpop.f32.mrf.mxu1  ;;  %v3097_v61 = vpop.f32.mrf.mxu0 }
 0x483   : > { %v2863_v35 = vadd.f32 %v2862_v53, %v2624_v54  ;;  %v3127_v10 = vadd.f32 %v3097_v61, %v2851_v23  ;;  %v2837_v23 = vadd.f32 %v2836_v43, %v5572_v34  ;;  %v3123_v54 = vadd.f32 %v3085_v50, %v2839_v15  ;;  %v3197_v43 = vpop.permute.xlu0 %3196  ;;  %v5775_v61 = vld [vmem:[#allocation23_spill] sm:$0xff] }
 0x484   : > { %v3101_v14 = vpop.f32.mrf.mxu0  ;;  %v2866_v26 = vpop.f32.mrf.mxu1 }
 0x485   : > { %v2867_v24 = vadd.f32 %v2866_v26, %v2628_v22  ;;  %v3128_v16 = vadd.f32 %v3101_v14, %v2855_v46  ;;  %v3143_v20 = vmul.f32 %v5596_v19, %v3127_v10  ;;  %v3122_v36 = vadd.f32 %v5586_v11, %v2837_v23  ;;  %v5776_v46 = vld [vmem:[#allocation22_spill] sm:$0xff] }
 0x486   : > { %v3103_v32 = vpop.f32.mrf.mxu0  ;;  %v2868_v48 = vpop.f32.mrf.mxu1  ;;  %v3139_v37 = vmul.f32 %v5596_v19, %v3123_v54 }
 0x487   : > { %v3129_v4 = vadd.f32 %v3103_v32, %v2857_v18  ;;  %v2869_v33 = vadd.f32 %v2868_v48, %v2630_v42  ;;  %v3119_v42 = vadd.f32 %v5580_v63, %v2827_v60  ;;  %v5772_v60 = vld [vmem:[#allocation25_spill] sm:$0xff]  ;;  %v3138_v53 = vmul.f32 %v5593_v55, %v3122_v36 }
 0x488   : > { %v3107_v62 = vpop.f32.mrf.mxu0 }
 0x489   : > { %v3130_v0 = vadd.f32 %v3107_v62, %v2861_v29  ;;  %v2843_v29 = vadd.f32 %v2842_v8, %v5576_v52  ;;  %v3126_v62 = vadd.f32 %v3095_v3, %v2849_v30  ;;  %v3145_v9 = vmul.f32 %v5596_v19, %v3129_v4 }
 0x48a   : > { %v3109_v47 = vpop.f32.mrf.mxu0  ;;  %v3121_v8 = vadd.f32 %v5768_v59, %v2833_v27  ;;  %v5774_v27 = vld [vmem:[#allocation28_spill] sm:$0xff] }
 0x48b   : > { %v3131_v40 = vadd.f32 %v3109_v47, %v2863_v35  ;;  %v3146_v49 = vmul.f32 %v5593_v55, %v3130_v0  ;;  %v3125_v35 = vadd.f32 %v3091_v57, %v2845_v58  ;;  %v3124_v39 = vadd.f32 %v3089_v13, %v2843_v29  ;;  %v5773_v13 = vld [vmem:[#allocation24_spill] sm:$0xff] }
 0x48c   : > { %v3113_v5 = vpop.f32.mrf.mxu0  ;;  %v3142_v0 = vmul.f32 %v5593_v55, %v3126_v62  ;;  %v3161_v10 = vadd.f32 %v3145_v9, %v5769_v51  ;;  %v3118_v3 = vadd.f32 %v5774_v27, %v2825_v17  ;;  %v3135_v17 = vmul.f32 %v5596_v19, %v3119_v42  ;;  %v5783_v42 = vld [vmem:[#allocation15_spill] sm:$0xff]  ;;  %v3251_v27 = vld [vmem:[#allocation8 + $0x28] sm:$0xff] }
 0x48d   : > { %v3147_v38 = vmul.f32 %v5596_v19, %v3131_v40  ;;  %v3132_v6 = vadd.f32 %v3113_v5, %v2867_v24  ;;  %v3144_v24 = vmul.f32 %v5593_v55, %v3128_v16  ;;  %v3202_v40 = vpop.permute.xlu1 %3201  ;;  %v3162_v34 = vadd.f32 %v3146_v49, %v5561_v41  ;;  %v5777_v16 = vld [vmem:[#allocation21_spill] sm:$0xff]  ;;  %v5779_v49 = vld [vmem:[#allocation19_spill] sm:$0xff] }
 0x48e   : > { %v3115_v18 = vpop.f32.mrf.mxu0  ;;  %v3141_v4 = vmul.f32 %v5596_v19, %v3125_v35  ;;  %v3140_v50 = vmul.f32 %v5593_v55, %v3124_v39  ;;  %v3159_v41 = vadd.f32 %v3143_v20, %v5773_v13  ;;  %v3158_v14 = vadd.f32 %v3142_v0, %v5775_v61  ;;  %v5781_v39 = vld [vmem:[#allocation17_spill] sm:$0xff]  ;;  %v5782_v20 = vld [vmem:[#allocation16_spill] sm:$0xff] }
 0x48f   : > { %v3148_v56 = vmul.f32 %v5593_v55, %v3132_v6  ;;  %v3133_v2 = vadd.f32 %v3115_v18, %v2869_v33  ;;  %v3163_v52 = vadd.f32 %v3147_v38, %v5565_v12  ;;  %v5770_v12 = vld [vmem:[#allocation27_spill] sm:$0xff]  ;;  %v3160_v63 = vadd.f32 %v3144_v24, %v5772_v60  ;;  %v3187_v38 = vpop.permute.xlu0 %3186  ;;  %v5778_v6 = vld [vmem:[#allocation20_spill] sm:$0xff] }
 0x490   : > { %v3226_v26 = vadd.f32 %v3207_v1, %v3162_v34  ;;  %v3157_v48 = vadd.f32 %v3141_v4, %v5776_v46  ;;  %v3225_v58 = vadd.f32 %v3202_v40, %v3161_v10  ;;  %v3156_v5 = vadd.f32 %v3140_v50, %v5777_v16  ;;  %v3247_v13 = vld [vmem:[#allocation8 + $0x8] sm:$0xff] }
 0x491   : > { %v3164_v22 = vadd.f32 %v3148_v56, %v5568_v28  ;;  %v3149_v7 = vmul.f32 %v5596_v19, %v3133_v2  ;;  %v5771_v28 = vld [vmem:[#allocation29_spill] sm:$0xff]  ;;  %v3227_v57 = vadd.f32 %v3207_v1, %v3163_v52  ;;  %v3192_v32 = vpop.permute.xlu1 %3191  ;;  %v3155_v15 = vadd.f32 %v3139_v37, %v5778_v6  ;;  %v5780_v56 = vld [vmem:[#allocation18_spill] sm:$0xff] }
 0x492   : > { %v3120_v25 = vadd.f32 %v5771_v28, %v2831_v44  ;;  %v3137_v44 = vmul.f32 %v5596_v19, %v3121_v8  ;;  %v3223_v29 = vadd.f32 %v3197_v43, %v3159_v41  ;;  %v3134_v62 = vmul.f32 %v5593_v55, %v3118_v3  ;;  %v3248_v41 = vld [vmem:[#allocation8 + $0x10] sm:$0xff] }
 0x493   : > { %v3165_v45 = vadd.f32 %v3149_v7, %v5770_v12  ;;  %v3228_v11 = vadd.f32 %v3212_v21, %v3164_v22  ;;  %v3243_v1 = vmax.f32 %v3227_v57, 0.0  ;;  %v3154_v18 = vadd.f32 %v3138_v53, %v5779_v49  ;;  %v3250_v57 = vld [vmem:[#allocation8 + $0x20] sm:$0xff]  ;;  %v3252_v3 = vld [vmem:[#allocation8 + $0x30] sm:$0xff]  ;;  %v3253_v53 = vld [vmem:[#allocation8 + $0x38] sm:$0xff] }
 0x494   : > { %v3136_v30 = vmul.f32 %v5593_v55, %v3120_v25  ;;  %v3222_v35 = vadd.f32 %v3197_v43, %v3158_v14  ;;  %v3242_v9 = vmax.f32 %v3226_v26, 0.0  ;;  %v3153_v2 = vadd.f32 %v3137_v44, %v5780_v56  ;;  %v3177_v43 = vpop.permute.xlu0 %3176 }
 0x495   : > { %v3229_v31 = vadd.f32 %v3212_v21, %v3165_v45  ;;  %v3224_v21 = vadd.f32 %v3202_v40, %v3160_v63  ;;  %v3244_v33 = vmax.f32 %v3228_v11, 0.0  ;;  %v3241_v23 = vmax.f32 %v3225_v58, 0.0  ;;  %v3182_v22 = vpop.permute.xlu1 %3181  ;;  %v3246_v11 = vld [vmem:[#allocation8] sm:$0xff] }
 0x496   : > { %v3221_v54 = vadd.f32 %v3192_v32, %v3157_v48  ;;  %v3152_v24 = vadd.f32 %v3136_v30, %v5781_v39  ;;  %v3220_v19 = vadd.f32 %v3192_v32, %v3156_v5  ;;  %v3151_v52 = vadd.f32 %v3135_v17, %v5782_v20 }
 0x497   : > { %v3245_v47 = vmax.f32 %v3229_v31, 0.0  ;;  %v3240_v40 = vmax.f32 %v3224_v21, 0.0  ;;  %v3239_v55 = vmax.f32 %v3223_v29, 0.0  ;;  %v3219_v7 = vadd.f32 %v3187_v38, %v3155_v15  ;;  %v3249_v31 = vld [vmem:[#allocation8 + $0x18] sm:$0xff] }
 0x498   : > { %v3150_v36 = vadd.f32 %v3134_v62, %v5783_v42  ;;  %v3218_v0 = vadd.f32 %v3187_v38, %v3154_v18  ;;  %v3238_v34 = vmax.f32 %v3222_v35, 0.0  ;;  %v3217_v59 = vadd.f32 %v3182_v22, %v3153_v2  ;;  %v3270_v46 = vpop.permute.xlu0 %3269 }
 0x499   : > { %3343 = vmatprep.subr.mxu1 %v3245_v47  ;;  %v3237_v8 = vmax.f32 %v3221_v54, 0.0  ;;  %v3216_v4 = vadd.f32 %v3182_v22, %v3152_v24  ;;  %v3236_v51 = vmax.f32 %v3220_v19, 0.0  ;;  %v3215_v10 = vadd.f32 %v3177_v43, %v3151_v52  ;;  %v3265_v61 = vpop.permute.xlu1 %3264 }
 0x49a   : > { %3344 = vmatpush1.msra.mxu1 %v3244_v33  ;;  %v3235_v12 = vmax.f32 %v3219_v7, 0.0  ;;  %v3214_v45 = vadd.f32 %v3177_v43, %v3150_v36  ;;  %v3234_v28 = vmax.f32 %v3218_v0, 0.0  ;;  %v3233_v25 = vmax.f32 %v3217_v59, 0.0 }
 0x49b   : > { %3345 = vmatprep.subr.mxu1 %v3243_v1  ;;  %v3232_v50 = vmax.f32 %v3216_v4, 0.0  ;;  %v3231_v60 = vmax.f32 %v3215_v10, 0.0  ;;  %v5784_v37 = vmov 0.0  }
 0x49c   : > { %3346 = vmatpush1.msra.mxu1 %v3242_v9  ;;  %v3230_v63 = vmax.f32 %v3214_v45, 0.0  ;;  %v3280_v17 = vpop.permute.xlu0 %3279 }
 0x49d   : > { %3347 = vmatprep.subr.mxu1 %v3241_v23  ;;  %v3275_v16 = vpop.permute.xlu1 %3274 }
 0x49e   : > { %3348 = vmatpush1.msra.mxu1 %v3240_v40 }
 0x49f   : > { %3349 = vmatprep.subr.mxu1 %v3239_v55 }
 0x4a0   : > { %3350 = vmatpush1.msra.mxu1 %v3238_v34  ;;  %v3290_v56 = vpop.permute.xlu0 %3289 }
 0x4a1   : > { %3351 = vmatprep.subr.mxu1 %v3237_v8  ;;  %v3285_v62 = vpop.permute.xlu1 %3284 }
 0x4a2   : > { %3352 = vmatpush1.msra.mxu1 %v3236_v51 }
 0x4a3   : > { %3353 = vmatprep.subr.mxu1 %v3235_v12 }
 0x4a4   : > { %3354 = vmatpush1.msra.mxu1 %v3234_v28  ;;  %v3300_v22 = vpop.permute.xlu0 %3299 }
 0x4a5   : > { %3355 = vmatprep.subr.mxu1 %v3233_v25  ;;  %v3295_v24 = vpop.permute.xlu1 %3294 }
 0x4a6   : > { %3356 = vmatpush1.msra.mxu1 %v3232_v50 }
 0x4a7   : > { %3357 = vmatprep.subr.mxu1 %v3231_v60 }
 0x4a8   : > { %3358 = vmatpush1.msra.mxu1 %v3230_v63 }
 0x4a9   : > { %3706 = vmatmul.mubr.msk.f32.vlgmr.msra.gmra.mxu1 %vm3302_vm15, %v3246_v11 }
 0x4aa   : > { %3397 = vmatprep.mubr.f32.mxu1 %v5784_v37 }
 0x4ad   : > { %3707 = vmatmul.mubr.msk.f32.gmra.mxu1 %vm3302_vm15, %v3247_v13 }
 0x4ae   : > { %3403 = vmatprep.mubr.f32.mxu1 %v5784_v37 }
 0x4b1   : > { %3708 = vmatmul.mubr.msk.f32.gmra.mxu1 %vm3302_vm15, %v3248_v41 }
 0x4b2   : > { %3409 = vmatprep.mubr.f32.mxu1 %v5784_v37 }
 0x4b5   : > { %3709 = vmatmul.mubr.msk.f32.gmra.mxu1 %vm3302_vm15, %v3249_v31 }
 0x4b6   : > { %3415 = vmatprep.mubr.f32.mxu1 %v5784_v37 }
 0x4b9   : > { %3710 = vmatmul.mubr.msk.f32.gmra.mxu1 %vm3302_vm15, %v3250_v57 }
 0x4ba   : > { %3421 = vmatprep.mubr.f32.mxu1 %v5784_v37 }
 0x4bd   : > { %3711 = vmatmul.mubr.msk.f32.gmra.mxu1 %vm3302_vm15, %v3251_v27 }
 0x4be   : > { %3427 = vmatprep.mubr.f32.mxu1 %v5784_v37 }
 0x4c1   : > { %3712 = vmatmul.mubr.msk.f32.gmra.mxu1 %vm3302_vm15, %v3252_v3 }
 0x4c2   : > { %3433 = vmatprep.mubr.f32.mxu1 %v5784_v37 }
 0x4c5   : > { %3713 = vmatmul.mubr.msk.f32.gmra.mxu1 %vm3302_vm15, %v3253_v53 }
 0x569   : > { %v3393_v14 = vpop.f32.mrf.mxu1 }
 0x56a   : > { %v3394_v26 = vadd.f32 %v3393_v14, %v3265_v61 }
 0x56b   : > { %v3395_v44 = vpop.f32.mrf.mxu1 }
 0x56c   : > { %3440 = vst [vmem:[%s4335_s13] sm:$0xff] %v3394_v26  ;;  %v3396_v32 = vadd.f32 %v3395_v44, %v3265_v61 }
 0x56d   : > { %v3399_v48 = vpop.f32.mrf.mxu1 }
 0x56e   : > { %3441 = vst [vmem:[%s4335_s13 + $0x8] sm:$0xff] %v3396_v32  ;;  %v3400_v47 = vadd.f32 %v3399_v48, %v3270_v46 }
 0x56f   : > { %v3401_v58 = vpop.f32.mrf.mxu1 }
 0x570   : > { %3442 = vst [vmem:[%s4335_s13 + $0x10] sm:$0xff] %v3400_v47  ;;  %v3402_v30 = vadd.f32 %v3401_v58, %v3270_v46 }
 0x571   : > { %v3405_v5 = vpop.f32.mrf.mxu1 }
 0x572   : > { %3443 = vst [vmem:[%s4335_s13 + $0x18] sm:$0xff] %v3402_v30  ;;  %v3406_v21 = vadd.f32 %v3405_v5, %v3275_v16 }
 0x573   : > { %v3407_v33 = vpop.f32.mrf.mxu1 }
 0x574   : > { %3444 = vst [vmem:[%s4335_s13 + $0x20] sm:$0xff] %v3406_v21  ;;  %v3408_v38 = vadd.f32 %v3407_v33, %v3275_v16 }
 0x575   : > { %v3411_v6 = vpop.f32.mrf.mxu1 }
 0x576   : > { %3445 = vst [vmem:[%s4335_s13 + $0x28] sm:$0xff] %v3408_v38  ;;  %v3412_v15 = vadd.f32 %v3411_v6, %v3280_v17 }
 0x577   : > { %v3413_v1 = vpop.f32.mrf.mxu1 }
 0x578   : > { %3446 = vst [vmem:[%s4335_s13 + $0x30] sm:$0xff] %v3412_v15  ;;  %v3414_v29 = vadd.f32 %v3413_v1, %v3280_v17 }
 0x579   : > { %v3417_v49 = vpop.f32.mrf.mxu1 }
 0x57a   : > { %3447 = vst [vmem:[%s4335_s13 + $0x38] sm:$0xff] %v3414_v29  ;;  %v3418_v18 = vadd.f32 %v3417_v49, %v3285_v62 }
 0x57b   : > { %v3419_v35 = vpop.f32.mrf.mxu1 }
 0x57c   : > { %3448 = vst [vmem:[%s4335_s13 + $0x40] sm:$0xff] %v3418_v18  ;;  %v3420_v9 = vadd.f32 %v3419_v35, %v3285_v62 }
 0x57d   : > { %v3423_v2 = vpop.f32.mrf.mxu1 }
 0x57e   : > { %3449 = vst [vmem:[%s4335_s13 + $0x48] sm:$0xff] %v3420_v9  ;;  %v3424_v23 = vadd.f32 %v3423_v2, %v3290_v56 }
 0x57f   : > { %v3425_v54 = vpop.f32.mrf.mxu1 }
 0x580   : > { %3450 = vst [vmem:[%s4335_s13 + $0x50] sm:$0xff] %v3424_v23  ;;  %v3426_v39 = vadd.f32 %v3425_v54, %v3290_v56 }
 0x581   : > { %v3429_v19 = vpop.f32.mrf.mxu1 }
 0x582   : > { %3451 = vst [vmem:[%s4335_s13 + $0x58] sm:$0xff] %v3426_v39  ;;  %v3430_v40 = vadd.f32 %v3429_v19, %v3295_v24 }
 0x583   : > { %v3431_v20 = vpop.f32.mrf.mxu1 }
 0x584   : > { %3452 = vst [vmem:[%s4335_s13 + $0x60] sm:$0xff] %v3430_v40  ;;  %v3432_v52 = vadd.f32 %v3431_v20, %v3295_v24 }
 0x585   : > { %v3435_v55 = vpop.f32.mrf.mxu1 }
 0x586   : > { %3453 = vst [vmem:[%s4335_s13 + $0x68] sm:$0xff] %v3432_v52  ;;  %v3436_v7 = vadd.f32 %v3435_v55, %v3300_v22 }
 0x587   : > { %v3437_v42 = vpop.f32.mrf.mxu1 }
 0x588   : > { %3454 = vst [vmem:[%s4335_s13 + $0x70] sm:$0xff] %v3436_v7  ;;  %v3438_v36 = vadd.f32 %v3437_v42, %v3300_v22 }
 0x58a   : > { %3455 = vst [vmem:[%s4335_s13 + $0x78] sm:$0xff] %v3438_v36 }
 0x58b   : > { %4050 = shalt.err (!%p4047_p4)
}
 0x58c   : > { %s4051_s18 = scalar_lea.hbm %s5673_s15, 2048  ;;  %s4055_s14 = scalar_lea.hbm %s5738_s6, 8192 }
 0x58d   : > { %p4052_p5 = scmp.ne.s32.totalorder %s5673_s15, %s4051_s18  ;;  %p4056_p0 = scmp.lt.s32.totalorder %s5673_s15, %s5738_s6 }
 0x58e   : > { %p4057_p10 = scmp.lt.s32.totalorder %s4055_s14, %s4051_s18 }
 0x58f   : > { %p4053_p6 = pnand %p4052_p5, %p4248_p3 }
 0x590   : > { %p4058_p12 = por %p4057_p10, %p4056_p0 }
 0x591   : > { %p4054_p7 = pneg %p4053_p6 }
 0x593   : > { %p4059_p1 = pnand %p4058_p12, %p4054_p7 }
 0x595   : > { %4062 = shalt.err (!%p4059_p1)
}
 0x596   : > { %s4158_s25 = smov 256   ;;  %s4159_s19 = smov 512  }
 0x597   : > { %s4160_s9 = smov 16  }
 0x598   : > { %3819 = dma.vmem_to_hbm [thread:$0]  (%p4248_p3), %s5675_s24, 2048, %s5673_s15, %s5681_s30, %s4158_s25, %s4159_s19, %s4160_s9  }
 0x599 PF: > { %p3841_p9 = scmp.ge.s32.totalorder %s4137_s28, 2  ;;  %s3487_s29 = sand.u32 1, %s4109_s21  }
 0x59a   : > { %s3488_s20 = scalar_lea.sflag [#allocation5], %s3487_s29 }
 0x59b   : > { %p3832_p11 = pnand %p3841_p9, %p4257_p8 }
 0x59d   : > { %p3833_p13 = pneg %p3832_p11 }
 0x59f   : > { %4104 = dma.done.wait (%p3833_p13), %s3488_s20, 2048  }
 0x5a0   : > { %4106 = vsyncadd (%p3833_p13), %s3488_s20, 4294965248  ;;  %s21_s28 = sadd.s32 1, %s4137_s28   ;;  %s5785_s11 = sld [smem:[#allocation13_spill]] }
 0x5a1   : > { %p18_p2 = scmp.ge.s32.totalorder %s21_s28, 6   ;;  %s5786_s15 = sld [smem:[#allocation14_spill]] }
 0x5a2   : > { %s5787_s21 = smov %s4113_s22  ;;  %s5788_s22 = smov %s4117_s23 }
 0x5a3   : > { %s5789_s23 = smov %s4275_s17  ;;  %s5790_s24 = smov %s4129_s26 }
 0x5a4   : > { %s5791_s25 = smov %s4133_s27  ;;  %20 = sbr.rel (!%p18_p2) target bundleno = 7 (0x7), region = 105 }
 0x5a6   : > { %s5792_s26 = smov %s5785_s11 }
 0x5a7   : > { %s5793_s27 = smov %s5786_s15 }
 0x5a9   :  { %3493 = vsyncpa [#allocation4], 1 }
 0x5aa   :  { %3495 = vsyncpa [#allocation4 + $0x1], 1 }
 0x5ab   :  { %3496 = vsyncpa [#allocation7], 1 }
 0x5ac   :  { %3497 = vsyncpa [#allocation5], 1 }
 0x5ad   :  { %3499 = vsyncpa [#allocation5 + $0x1], 1 }

</bundles_post_ra>
